<compile_context>
chip_gen: v5e
topology: v5e:2x2
jax: 0.10.0
libtpu: 0.0.40
codegen_flags: <defaults>
</compile_context>

<pallas_src>
import jax
import jax.numpy as jnp
from jax import lax
from jax.experimental import pallas as pl
from jax.experimental.pallas import tpu as pltpu

# ----------------------------- constants / layout -----------------------------
N = 2                    # batch
N_FILTERS = 128          # n_filters used by Connect4Model's residual tower
H, W = 6, 7              # Connect-4 board
Hp, Wp = 8, 8            # padded board (Hp = H+2; Wp rounded so M is a clean 128)
M = N * Hp * Wp          # 128 rows in the flattened padded activation slab
PADR = 16                # zero border rows on each side of the in-kernel scratch (sublane aligned)
XPAD_ROWS = PADR + M + PADR
EPS = 1e-5

# tap k = dy*3 + dx reads xpad[row + start_k]; start_k = PADR - (Wp+1) + dy*Wp + dx
TAP_STARTS = tuple(PADR - (Wp + 1) + dy * Wp + dx for dy in range(3) for dx in range(3))
assert min(TAP_STARTS) >= 0
assert max(TAP_STARTS) + M <= XPAD_ROWS  # static OOB guard (VMEM has no runtime check)

VMEM_SPEC = pl.BlockSpec(memory_space=pltpu.MemorySpace.VMEM)


# --------------------------------- kernel ------------------------------------
def resblock_kernel(x_ref, w1_ref, b1_ref, w2_ref, b2_ref, mask_ref, o_ref,
                    xpad_ref, patch_ref):
    C = x_ref.shape[1]

    # Zero only the border rows (they provide conv zero-padding, including across the
    # batch boundary and the wrapped right-pad column); the center is fully overwritten.
    xpad_ref[pl.ds(0, PADR), :] = jnp.zeros((PADR, C), xpad_ref.dtype)
    xpad_ref[pl.ds(PADR + M, PADR), :] = jnp.zeros((PADR, C), xpad_ref.dtype)
    # Single f32 -> bf16 cast of the input activation.
    xpad_ref[pl.ds(PADR, M), :] = x_ref[...].astype(jnp.bfloat16)

    def conv_bn(w_ref, b_ref):
        # im2col: 9 shifted (M, C) bf16 views -> one lane-dense (M, 9C) slab (pure copies).
        for k, s in enumerate(TAP_STARTS):
            patch_ref[:, pl.ds(k * C, C)] = xpad_ref[pl.ds(s, M), :]
        # Single long-K MXU matmul (K = 9*C), f32 accumulation, folded-BN bias epilogue.
        return jnp.dot(patch_ref[...], w_ref[...],
                       preferred_element_type=jnp.float32) + b_ref[...]

    # conv1 -> BN1 -> ReLU ; re-zero pad positions so conv2 sees proper zero padding.
    h = jnp.maximum(conv_bn(w1_ref, b1_ref), 0.0) * mask_ref[...]
    xpad_ref[pl.ds(PADR, M), :] = h.astype(jnp.bfloat16)

    # conv2 -> BN2 -> + residual -> ReLU  (residual and output stay f32).
    o_ref[...] = jnp.maximum(conv_bn(w2_ref, b2_ref) + x_ref[...], 0.0)


# ------------------------------ layout glue -----------------------------------
def to_padded_flat(x_nchw):
    """NCHW -> zero-padded flattened NHWC slab (M, C), f32."""
    x = jnp.transpose(x_nchw, (0, 2, 3, 1))                              # NHWC
    x = jnp.pad(x, ((0, 0), (1, Hp - H - 1), (1, Wp - W - 1), (0, 0)))   # (N, Hp, Wp, C)
    return x.reshape(M, x.shape[-1])


def from_padded_flat(a_flat, c):
    """Padded flat slab -> NCHW (crop the pad rows/cols)."""
    a = a_flat.reshape(N, Hp, Wp, c)[:, 1:1 + H, 1:1 + W, :]
    return jnp.transpose(a, (0, 3, 1, 2))


def make_mask():
    m = jnp.zeros((N, Hp, Wp), jnp.float32).at[:, 1:1 + H, 1:1 + W].set(1.0)
    return m.reshape(M, 1)


# ---------------------------------- wrapper -----------------------------------
def residual_block(x_nchw, kparams):
    """Fused ResidualBlock forward: relu(bn2(conv2(relu(bn1(conv1(x))))) + x)."""
    w1, b1, w2, b2 = kparams
    c = x_nchw.shape[1]
    x_flat = to_padded_flat(x_nchw)
    mask = make_mask()

    flops = 2 * 2 * M * (9 * c) * c
    bytes_accessed = (x_flat.size * 4 + w1.size * 2 + w2.size * 2
                      + b1.size * 4 + b2.size * 4 + mask.size * 4 + M * c * 4)

    out_flat = pl.pallas_call(
        resblock_kernel,
        out_shape=jax.ShapeDtypeStruct((M, c), jnp.float32),
        in_specs=[VMEM_SPEC] * 6,
        out_specs=VMEM_SPEC,
        scratch_shapes=[
            pltpu.VMEM((XPAD_ROWS, c), jnp.bfloat16),     # zero-bordered activation slab (bf16)
            pltpu.VMEM((M, 9 * c), jnp.bfloat16),         # im2col patches
        ],
        cost_estimate=pl.CostEstimate(flops=flops, transcendentals=0,
                                      bytes_accessed=bytes_accessed),
    )(x_flat, w1, b1, w2, b2, mask)
    return from_padded_flat(out_flat, c)


# ----------------------------- parameters / folding ----------------------------
def init_conv_bn(key, cin, cout):
    kw, kb, kg, kbe, km, kv = jax.random.split(key, 6)
    return {
        "w": jax.random.normal(kw, (cout, cin, 3, 3), jnp.float32) / jnp.sqrt(9.0 * cin),
        "b": 0.05 * jax.random.normal(kb, (cout,), jnp.float32),
        "gamma": 1.0 + 0.1 * jax.random.normal(kg, (cout,), jnp.float32),
        "beta": 0.05 * jax.random.normal(kbe, (cout,), jnp.float32),
        "mean": 0.05 * jax.random.normal(km, (cout,), jnp.float32),
        "var": 1.0 + 0.1 * jax.random.uniform(kv, (cout,), jnp.float32),
    }


def fold_conv_bn(p):
    """Fold eval-mode BN (and the conv bias) into bf16 weights + one f32 bias row."""
    cout, cin = p["w"].shape[0], p["w"].shape[1]
    scale = p["gamma"] / jnp.sqrt(p["var"] + EPS)                    # (cout,)
    w9 = jnp.transpose(p["w"], (2, 3, 1, 0)).reshape(9 * cin, cout)  # tap-major, cin within
    w9 = (w9 * scale[None, :]).astype(jnp.bfloat16)                  # fold BN scale
    bias = (p["beta"] + (p["b"] - p["mean"]) * scale).reshape(1, cout).astype(jnp.float32)
    return w9, bias


# ------------------------------- pure-JAX reference -----------------------------
def reference_resblock(x, p1, p2):
    def conv_bn(x, p):
        y = lax.conv_general_dilated(
            x, p["w"], window_strides=(1, 1), padding=((1, 1), (1, 1)),
            dimension_numbers=("NCHW", "OIHW", "NCHW"))
        y = y + p["b"][None, :, None, None]
        inv = (p["gamma"] / jnp.sqrt(p["var"] + EPS))[None, :, None, None]
        return (y - p["mean"][None, :, None, None]) * inv + p["beta"][None, :, None, None]

    h = jax.nn.relu(conv_bn(x, p1))
    return jax.nn.relu(conv_bn(h, p2) + x)


# ----------------------------------- main --------------------------------------
if __name__ == "__main__":
    key = jax.random.PRNGKey(0)
    kx, k1, k2 = jax.random.split(key, 3)

    x = jax.random.normal(kx, (N, N_FILTERS, H, W), jnp.float32)   # NCHW, like PyTorch
    p1 = init_conv_bn(k1, N_FILTERS, N_FILTERS)
    p2 = init_conv_bn(k2, N_FILTERS, N_FILTERS)
    kparams = fold_conv_bn(p1) + fold_conv_bn(p2)                  # (w1, b1, w2, b2)

    fwd = jax.jit(residual_block)
    out = fwd(x, kparams)
    jax.block_until_ready(out)

    ref = reference_resblock(x, p1, p2)
    assert out.shape == (N, N_FILTERS, H, W)
    assert bool(jnp.all(jnp.isfinite(out)))
    max_err = float(jnp.max(jnp.abs(out - ref)))
    assert max_err < 1e-1, f"max abs err vs reference: {max_err}"
    print("KERNEL_OK")
</pallas_src>

<mosaic_0001>
module attributes {stable_mosaic.version = 11 : i64} {
  func.func @resblock_kernel(%arg0: memref<128x128xf32, #tpu.memory_space<vmem>>, %arg1: memref<1152x128xbf16, #tpu.memory_space<vmem>>, %arg2: memref<1x128xf32, #tpu.memory_space<vmem>>, %arg3: memref<1152x128xbf16, #tpu.memory_space<vmem>>, %arg4: memref<1x128xf32, #tpu.memory_space<vmem>>, %arg5: memref<128x1xf32, #tpu.memory_space<vmem>>, %arg6: memref<128x128xf32, #tpu.memory_space<vmem>>, %arg7: memref<160x128xbf16, #tpu.memory_space<vmem>>, %arg8: memref<128x1152xbf16, #tpu.memory_space<vmem>>) attributes {dimension_semantics = [], scalar_prefetch = 0 : i64, scratch_operands = 2 : i64, tpu.core_type = #tpu.core_type<tc>} {
    %cst = arith.constant 0.000000e+00 : bf16
    %0 = vector.broadcast %cst : bf16 to vector<16x128xbf16>
    %c0 = arith.constant 0 : index
    %c0_0 = arith.constant 0 : index
    %1 = vector.load %arg7[%c0, %c0_0] : memref<160x128xbf16, #tpu.memory_space<vmem>>, vector<16x128xbf16>
    tpu.vector_store %arg7[%c0, %c0_0], %0 {strides = array<i32>} : memref<160x128xbf16, #tpu.memory_space<vmem>>, vector<16x128xbf16>,
    %cst_1 = arith.constant 0.000000e+00 : bf16
    %2 = vector.broadcast %cst_1 : bf16 to vector<16x128xbf16>
    %c144 = arith.constant 144 : index
    %c0_2 = arith.constant 0 : index
    %3 = vector.load %arg7[%c144, %c0_2] : memref<160x128xbf16, #tpu.memory_space<vmem>>, vector<16x128xbf16>
    tpu.vector_store %arg7[%c144, %c0_2], %2 {strides = array<i32>} : memref<160x128xbf16, #tpu.memory_space<vmem>>, vector<16x128xbf16>,
    %c0_3 = arith.constant 0 : index
    %c0_4 = arith.constant 0 : index
    %4 = vector.load %arg0[%c0_3, %c0_4] : memref<128x128xf32, #tpu.memory_space<vmem>>, vector<128x128xf32>
    %5 = arith.truncf %4 : vector<128x128xf32> to vector<128x128xbf16>
    %c16 = arith.constant 16 : index
    %c0_5 = arith.constant 0 : index
    %6 = vector.load %arg7[%c16, %c0_5] : memref<160x128xbf16, #tpu.memory_space<vmem>>, vector<128x128xbf16>
    tpu.vector_store %arg7[%c16, %c0_5], %5 {strides = array<i32>} : memref<160x128xbf16, #tpu.memory_space<vmem>>, vector<128x128xbf16>,
    %c7 = arith.constant 7 : index
    %c0_6 = arith.constant 0 : index
    %7 = vector.load %arg7[%c7, %c0_6] : memref<160x128xbf16, #tpu.memory_space<vmem>>, vector<128x128xbf16>
    %c0_7 = arith.constant 0 : index
    %c0_8 = arith.constant 0 : index
    %8 = vector.load %arg8[%c0_7, %c0_8] : memref<128x1152xbf16, #tpu.memory_space<vmem>>, vector<128x128xbf16>
    tpu.vector_store %arg8[%c0_7, %c0_8], %7 {strides = array<i32>} : memref<128x1152xbf16, #tpu.memory_space<vmem>>, vector<128x128xbf16>,
    %c8 = arith.constant 8 : index
    %c0_9 = arith.constant 0 : index
    %9 = vector.load %arg7[%c8, %c0_9] : memref<160x128xbf16, #tpu.memory_space<vmem>>, vector<128x128xbf16>
    %c0_10 = arith.constant 0 : index
    %c128 = arith.constant 128 : index
    %10 = vector.load %arg8[%c0_10, %c128] : memref<128x1152xbf16, #tpu.memory_space<vmem>>, vector<128x128xbf16>
    tpu.vector_store %arg8[%c0_10, %c128], %9 {strides = array<i32>} : memref<128x1152xbf16, #tpu.memory_space<vmem>>, vector<128x128xbf16>,
    %c9 = arith.constant 9 : index
    %c0_11 = arith.constant 0 : index
    %11 = vector.load %arg7[%c9, %c0_11] : memref<160x128xbf16, #tpu.memory_space<vmem>>, vector<128x128xbf16>
    %c0_12 = arith.constant 0 : index
    %c256 = arith.constant 256 : index
    %12 = vector.load %arg8[%c0_12, %c256] : memref<128x1152xbf16, #tpu.memory_space<vmem>>, vector<128x128xbf16>
    tpu.vector_store %arg8[%c0_12, %c256], %11 {strides = array<i32>} : memref<128x1152xbf16, #tpu.memory_space<vmem>>, vector<128x128xbf16>,
    %c15 = arith.constant 15 : index
    %c0_13 = arith.constant 0 : index
    %13 = vector.load %arg7[%c15, %c0_13] : memref<160x128xbf16, #tpu.memory_space<vmem>>, vector<128x128xbf16>
    %c0_14 = arith.constant 0 : index
    %c384 = arith.constant 384 : index
    %14 = vector.load %arg8[%c0_14, %c384] : memref<128x1152xbf16, #tpu.memory_space<vmem>>, vector<128x128xbf16>
    tpu.vector_store %arg8[%c0_14, %c384], %13 {strides = array<i32>} : memref<128x1152xbf16, #tpu.memory_space<vmem>>, vector<128x128xbf16>,
    %c16_15 = arith.constant 16 : index
    %c0_16 = arith.constant 0 : index
    %15 = vector.load %arg7[%c16_15, %c0_16] : memref<160x128xbf16, #tpu.memory_space<vmem>>, vector<128x128xbf16>
    %c0_17 = arith.constant 0 : index
    %c512 = arith.constant 512 : index
    %16 = vector.load %arg8[%c0_17, %c512] : memref<128x1152xbf16, #tpu.memory_space<vmem>>, vector<128x128xbf16>
    tpu.vector_store %arg8[%c0_17, %c512], %15 {strides = array<i32>} : memref<128x1152xbf16, #tpu.memory_space<vmem>>, vector<128x128xbf16>,
    %c17 = arith.constant 17 : index
    %c0_18 = arith.constant 0 : index
    %17 = vector.load %arg7[%c17, %c0_18] : memref<160x128xbf16, #tpu.memory_space<vmem>>, vector<128x128xbf16>
    %c0_19 = arith.constant 0 : index
    %c640 = arith.constant 640 : index
    %18 = vector.load %arg8[%c0_19, %c640] : memref<128x1152xbf16, #tpu.memory_space<vmem>>, vector<128x128xbf16>
    tpu.vector_store %arg8[%c0_19, %c640], %17 {strides = array<i32>} : memref<128x1152xbf16, #tpu.memory_space<vmem>>, vector<128x128xbf16>,
    %c23 = arith.constant 23 : index
    %c0_20 = arith.constant 0 : index
    %19 = vector.load %arg7[%c23, %c0_20] : memref<160x128xbf16, #tpu.memory_space<vmem>>, vector<128x128xbf16>
    %c0_21 = arith.constant 0 : index
    %c768 = arith.constant 768 : index
    %20 = vector.load %arg8[%c0_21, %c768] : memref<128x1152xbf16, #tpu.memory_space<vmem>>, vector<128x128xbf16>
    tpu.vector_store %arg8[%c0_21, %c768], %19 {strides = array<i32>} : memref<128x1152xbf16, #tpu.memory_space<vmem>>, vector<128x128xbf16>,
    %c24 = arith.constant 24 : index
    %c0_22 = arith.constant 0 : index
    %21 = vector.load %arg7[%c24, %c0_22] : memref<160x128xbf16, #tpu.memory_space<vmem>>, vector<128x128xbf16>
    %c0_23 = arith.constant 0 : index
    %c896 = arith.constant 896 : index
    %22 = vector.load %arg8[%c0_23, %c896] : memref<128x1152xbf16, #tpu.memory_space<vmem>>, vector<128x128xbf16>
    tpu.vector_store %arg8[%c0_23, %c896], %21 {strides = array<i32>} : memref<128x1152xbf16, #tpu.memory_space<vmem>>, vector<128x128xbf16>,
    %c25 = arith.constant 25 : index
    %c0_24 = arith.constant 0 : index
    %23 = vector.load %arg7[%c25, %c0_24] : memref<160x128xbf16, #tpu.memory_space<vmem>>, vector<128x128xbf16>
    %c0_25 = arith.constant 0 : index
    %c1024 = arith.constant 1024 : index
    %24 = vector.load %arg8[%c0_25, %c1024] : memref<128x1152xbf16, #tpu.memory_space<vmem>>, vector<128x128xbf16>
    tpu.vector_store %arg8[%c0_25, %c1024], %23 {strides = array<i32>} : memref<128x1152xbf16, #tpu.memory_space<vmem>>, vector<128x128xbf16>,
    %c0_26 = arith.constant 0 : index
    %c0_27 = arith.constant 0 : index
    %25 = vector.load %arg8[%c0_26, %c0_27] : memref<128x1152xbf16, #tpu.memory_space<vmem>>, vector<128x1152xbf16>
    %c0_28 = arith.constant 0 : index
    %c0_29 = arith.constant 0 : index
    %26 = vector.load %arg1[%c0_28, %c0_29] : memref<1152x128xbf16, #tpu.memory_space<vmem>>, vector<1152x128xbf16>
    %cst_30 = arith.constant dense<0.000000e+00> : vector<128x128xf32>
    %27 = tpu.matmul %25, %26, %cst_30 {dimension_numbers = #tpu.dot_dimension_numbers<[1], [0], [0], [1], [0, 0, 1, 1], [], []>} : vector<128x1152xbf16>, vector<1152x128xbf16>, vector<128x128xf32> -> vector<128x128xf32>
    %c0_31 = arith.constant 0 : index
    %c0_32 = arith.constant 0 : index
    %28 = vector.load %arg2[%c0_31, %c0_32] : memref<1x128xf32, #tpu.memory_space<vmem>>, vector<1x128xf32>
    %29 = vector.broadcast %28 : vector<1x128xf32> to vector<128x128xf32>
    %30 = arith.addf %27, %29 : vector<128x128xf32>
    %cst_33 = arith.constant 0.000000e+00 : f32
    %31 = vector.broadcast %cst_33 : f32 to vector<128x128xf32>
    %32 = arith.maximumf %30, %31 : vector<128x128xf32>
    %c0_34 = arith.constant 0 : index
    %c0_35 = arith.constant 0 : index
    %33 = vector.load %arg5[%c0_34, %c0_35] : memref<128x1xf32, #tpu.memory_space<vmem>>, vector<128x1xf32>
    %34 = vector.broadcast %33 : vector<128x1xf32> to vector<128x128xf32>
    %35 = arith.mulf %32, %34 : vector<128x128xf32>
    %36 = arith.truncf %35 : vector<128x128xf32> to vector<128x128xbf16>
    %c16_36 = arith.constant 16 : index
    %c0_37 = arith.constant 0 : index
    %37 = vector.load %arg7[%c16_36, %c0_37] : memref<160x128xbf16, #tpu.memory_space<vmem>>, vector<128x128xbf16>
    tpu.vector_store %arg7[%c16_36, %c0_37], %36 {strides = array<i32>} : memref<160x128xbf16, #tpu.memory_space<vmem>>, vector<128x128xbf16>,
    %c7_38 = arith.constant 7 : index
    %c0_39 = arith.constant 0 : index
    %38 = vector.load %arg7[%c7_38, %c0_39] : memref<160x128xbf16, #tpu.memory_space<vmem>>, vector<128x128xbf16>
    %c0_40 = arith.constant 0 : index
    %c0_41 = arith.constant 0 : index
    %39 = vector.load %arg8[%c0_40, %c0_41] : memref<128x1152xbf16, #tpu.memory_space<vmem>>, vector<128x128xbf16>
    tpu.vector_store %arg8[%c0_40, %c0_41], %38 {strides = array<i32>} : memref<128x1152xbf16, #tpu.memory_space<vmem>>, vector<128x128xbf16>,
    %c8_42 = arith.constant 8 : index
    %c0_43 = arith.constant 0 : index
    %40 = vector.load %arg7[%c8_42, %c0_43] : memref<160x128xbf16, #tpu.memory_space<vmem>>, vector<128x128xbf16>
    %c0_44 = arith.constant 0 : index
    %c128_45 = arith.constant 128 : index
    %41 = vector.load %arg8[%c0_44, %c128_45] : memref<128x1152xbf16, #tpu.memory_space<vmem>>, vector<128x128xbf16>
    tpu.vector_store %arg8[%c0_44, %c128_45], %40 {strides = array<i32>} : memref<128x1152xbf16, #tpu.memory_space<vmem>>, vector<128x128xbf16>,
    %c9_46 = arith.constant 9 : index
    %c0_47 = arith.constant 0 : index
    %42 = vector.load %arg7[%c9_46, %c0_47] : memref<160x128xbf16, #tpu.memory_space<vmem>>, vector<128x128xbf16>
    %c0_48 = arith.constant 0 : index
    %c256_49 = arith.constant 256 : index
    %43 = vector.load %arg8[%c0_48, %c256_49] : memref<128x1152xbf16, #tpu.memory_space<vmem>>, vector<128x128xbf16>
    tpu.vector_store %arg8[%c0_48, %c256_49], %42 {strides = array<i32>} : memref<128x1152xbf16, #tpu.memory_space<vmem>>, vector<128x128xbf16>,
    %c15_50 = arith.constant 15 : index
    %c0_51 = arith.constant 0 : index
    %44 = vector.load %arg7[%c15_50, %c0_51] : memref<160x128xbf16, #tpu.memory_space<vmem>>, vector<128x128xbf16>
    %c0_52 = arith.constant 0 : index
    %c384_53 = arith.constant 384 : index
    %45 = vector.load %arg8[%c0_52, %c384_53] : memref<128x1152xbf16, #tpu.memory_space<vmem>>, vector<128x128xbf16>
    tpu.vector_store %arg8[%c0_52, %c384_53], %44 {strides = array<i32>} : memref<128x1152xbf16, #tpu.memory_space<vmem>>, vector<128x128xbf16>,
    %c16_54 = arith.constant 16 : index
    %c0_55 = arith.constant 0 : index
    %46 = vector.load %arg7[%c16_54, %c0_55] : memref<160x128xbf16, #tpu.memory_space<vmem>>, vector<128x128xbf16>
    %c0_56 = arith.constant 0 : index
    %c512_57 = arith.constant 512 : index
    %47 = vector.load %arg8[%c0_56, %c512_57] : memref<128x1152xbf16, #tpu.memory_space<vmem>>, vector<128x128xbf16>
    tpu.vector_store %arg8[%c0_56, %c512_57], %46 {strides = array<i32>} : memref<128x1152xbf16, #tpu.memory_space<vmem>>, vector<128x128xbf16>,
    %c17_58 = arith.constant 17 : index
    %c0_59 = arith.constant 0 : index
    %48 = vector.load %arg7[%c17_58, %c0_59] : memref<160x128xbf16, #tpu.memory_space<vmem>>, vector<128x128xbf16>
    %c0_60 = arith.constant 0 : index
    %c640_61 = arith.constant 640 : index
    %49 = vector.load %arg8[%c0_60, %c640_61] : memref<128x1152xbf16, #tpu.memory_space<vmem>>, vector<128x128xbf16>
    tpu.vector_store %arg8[%c0_60, %c640_61], %48 {strides = array<i32>} : memref<128x1152xbf16, #tpu.memory_space<vmem>>, vector<128x128xbf16>,
    %c23_62 = arith.constant 23 : index
    %c0_63 = arith.constant 0 : index
    %50 = vector.load %arg7[%c23_62, %c0_63] : memref<160x128xbf16, #tpu.memory_space<vmem>>, vector<128x128xbf16>
    %c0_64 = arith.constant 0 : index
    %c768_65 = arith.constant 768 : index
    %51 = vector.load %arg8[%c0_64, %c768_65] : memref<128x1152xbf16, #tpu.memory_space<vmem>>, vector<128x128xbf16>
    tpu.vector_store %arg8[%c0_64, %c768_65], %50 {strides = array<i32>} : memref<128x1152xbf16, #tpu.memory_space<vmem>>, vector<128x128xbf16>,
    %c24_66 = arith.constant 24 : index
    %c0_67 = arith.constant 0 : index
    %52 = vector.load %arg7[%c24_66, %c0_67] : memref<160x128xbf16, #tpu.memory_space<vmem>>, vector<128x128xbf16>
    %c0_68 = arith.constant 0 : index
    %c896_69 = arith.constant 896 : index
    %53 = vector.load %arg8[%c0_68, %c896_69] : memref<128x1152xbf16, #tpu.memory_space<vmem>>, vector<128x128xbf16>
    tpu.vector_store %arg8[%c0_68, %c896_69], %52 {strides = array<i32>} : memref<128x1152xbf16, #tpu.memory_space<vmem>>, vector<128x128xbf16>,
    %c25_70 = arith.constant 25 : index
    %c0_71 = arith.constant 0 : index
    %54 = vector.load %arg7[%c25_70, %c0_71] : memref<160x128xbf16, #tpu.memory_space<vmem>>, vector<128x128xbf16>
    %c0_72 = arith.constant 0 : index
    %c1024_73 = arith.constant 1024 : index
    %55 = vector.load %arg8[%c0_72, %c1024_73] : memref<128x1152xbf16, #tpu.memory_space<vmem>>, vector<128x128xbf16>
    tpu.vector_store %arg8[%c0_72, %c1024_73], %54 {strides = array<i32>} : memref<128x1152xbf16, #tpu.memory_space<vmem>>, vector<128x128xbf16>,
    %c0_74 = arith.constant 0 : index
    %c0_75 = arith.constant 0 : index
    %56 = vector.load %arg8[%c0_74, %c0_75] : memref<128x1152xbf16, #tpu.memory_space<vmem>>, vector<128x1152xbf16>
    %c0_76 = arith.constant 0 : index
    %c0_77 = arith.constant 0 : index
    %57 = vector.load %arg3[%c0_76, %c0_77] : memref<1152x128xbf16, #tpu.memory_space<vmem>>, vector<1152x128xbf16>
    %cst_78 = arith.constant dense<0.000000e+00> : vector<128x128xf32>
    %58 = tpu.matmul %56, %57, %cst_78 {dimension_numbers = #tpu.dot_dimension_numbers<[1], [0], [0], [1], [0, 0, 1, 1], [], []>} : vector<128x1152xbf16>, vector<1152x128xbf16>, vector<128x128xf32> -> vector<128x128xf32>
    %c0_79 = arith.constant 0 : index
    %c0_80 = arith.constant 0 : index
    %59 = vector.load %arg4[%c0_79, %c0_80] : memref<1x128xf32, #tpu.memory_space<vmem>>, vector<1x128xf32>
    %60 = vector.broadcast %59 : vector<1x128xf32> to vector<128x128xf32>
    %61 = arith.addf %58, %60 : vector<128x128xf32>
    %c0_81 = arith.constant 0 : index
    %c0_82 = arith.constant 0 : index
    %62 = vector.load %arg0[%c0_81, %c0_82] : memref<128x128xf32, #tpu.memory_space<vmem>>, vector<128x128xf32>
    %63 = arith.addf %61, %62 : vector<128x128xf32>
    %cst_83 = arith.constant 0.000000e+00 : f32
    %64 = vector.broadcast %cst_83 : f32 to vector<128x128xf32>
    %65 = arith.maximumf %63, %64 : vector<128x128xf32>
    %c0_84 = arith.constant 0 : index
    %c0_85 = arith.constant 0 : index
    %66 = vector.load %arg6[%c0_84, %c0_85] : memref<128x128xf32, #tpu.memory_space<vmem>>, vector<128x128xf32>
    tpu.vector_store %arg6[%c0_84, %c0_85], %65 {strides = array<i32>} : memref<128x128xf32, #tpu.memory_space<vmem>>, vector<128x128xf32>,
    return
  }
}

</mosaic_0001>

<bundles_post_ra>
// kernel: residual_block.1
= control target key start
LH: loop header
LB: loop body
LE: loop exit
PB: predicated region body
PF: predicated region fallthrough
CT: control target
= control target key end

     0   :  { %11 = vsyncpa [#allocation5], 0  ;;  %s7513_s24 = smov [#allocation4]   ;;  %s7514_s26 = smov 64   ;;  %s9265_s0 = inlined_call_operand.vmem [shape: f32[128,128], index: 0, kind: input, shape index: {}]   ;;  %s9266_s1 = inlined_call_operand.vmem [shape: bf16[1152,128], index: 1, kind: input, shape index: {}]   ;;  %s9267_s2 = inlined_call_operand.vmem [shape: f32[1,128], index: 2, kind: input, shape index: {}]   ;;  %s9268_s3 = inlined_call_operand.hbm [shape: bf16[1152,128], index: 3, kind: input, shape index: {}]   ;;  %s9269_s4 = inlined_call_operand.vmem [shape: f32[1,128], index: 4, kind: input, shape index: {}]   ;;  %s9270_s5 = inlined_call_operand.vmem [shape: f32[128,1], index: 5, kind: input, shape index: {}]   ;;  %s9271_s6 = inlined_call_operand.vmem [shape: f32[128,128], index: 6, kind: output, shape index: {}]  }
   0x1   :  { %s22_s23 = sshll.u32 %s9268_s3, 4  ;;  %s24_s25 = sshll.u32 %s7513_s24, 4  ;;  %s23_s23 = int_to_ptr.hbm [resolvable:$true] %s22_s23  ;;  %s25_s25 = int_to_ptr.vmem [resolvable:$true] %s24_s25 }
   0x2   :  { %s7515_s27 = smov 4  }
   0x3   :  { %30 = dma.hbm_to_vmem [thread:$0]  %s23_s23, 9216, %s25_s25, [#allocation5], %s7514_s26, %s7514_s26, %s7515_s27  }
   0x4   :  { %7511 = dma.done.wait [#allocation5], 9216  }
   0x5   :  { %7512 = vsyncadd [#allocation5], 4294958080  ;;  %v7516_v0 = vmov 0   ;;  %v7154_v1 = vld [vmem:[%s9266_s1 + $0x38] sm:$0xff]  ;;  %v7153_v3 = vld [vmem:[%s9266_s1 + $0x30] sm:$0xff] }
   0x6   :  { %40 = vst [vmem:[#allocation2] sm:$0xf] %v7516_v0  ;;  %7479 = vset.pattern.permute.xlu0 %v7516_v0  ;;  %7480 = vset.pattern.permute.xlu1 %v7516_v0  ;;  %v7162_v2 = vld [vmem:[%s9266_s1 + $0x78] sm:$0xff]  ;;  %v7161_v4 = vld [vmem:[%s9266_s1 + $0x70] sm:$0xff]  ;;  %v7152_v5 = vld [vmem:[%s9266_s1 + $0x28] sm:$0xff] }
   0x7   :  { %41 = vst [vmem:[#allocation2 + $0x4] sm:$0xf] %v7516_v0  ;;  %7481 = vset.pattern.permute.xlu2 %v7516_v0  ;;  %7459 = vmatpush.bf16.msra.mxu2 %v7154_v1  ;;  %v50_v6 = vld [vmem:[%s9265_s0 + $0x30] sm:$0xff]  ;;  %v51_v7 = vld [vmem:[%s9265_s0 + $0x38] sm:$0xff]  ;;  %v7160_v8 = vld [vmem:[%s9266_s1 + $0x68] sm:$0xff] }
   0x8   :  { %42 = vst [vmem:[#allocation2 + $0x48] sm:$0xf] %v7516_v0  ;;  %7467 = vmatpush.bf16.msra.mxu3 %v7162_v2  ;;  %2452 = vmatpush.bf16.msra.mxu0 %v7154_v1  ;;  %v52_v9 = vld [vmem:[%s9265_s0 + $0x40] sm:$0xff]  ;;  %v53_v10 = vld [vmem:[%s9265_s0 + $0x48] sm:$0xff]  ;;  %v7381_v11 = vpack.c.bf16 %v51_v7, %v50_v6  ;;  %vm109_vm0 = vsmask.f32 256 }
   0x9   :  { %43 = vst [vmem:[#allocation2 + $0x4c] sm:$0xf] %v7516_v0  ;;  %2501 = vmatpush.bf16.msra.mxu1 %v7162_v2  ;;  %v7386_v12 = vpack.c.bf16 %v53_v10, %v52_v9  ;;  %v44_v13 = vld [vmem:[%s9265_s0] sm:$0xff]  ;;  %v45_v14 = vld [vmem:[%s9265_s0 + $0x8] sm:$0xff]  ;;  %vm110_vm1 = vsmask.f32 4368 }
   0xa   :  { %7446 = vst [vmem:[#allocation2 + $0x20] sm:$0xff] %v7381_v11   ;;  %v7366_v16 = vpack.c.bf16 %v45_v14, %v44_v13  ;;  %v7151_v22 = vld [vmem:[%s9266_s1 + $0x20] sm:$0xff]  ;;  %v54_v29 = vld [vmem:[%s9265_s0 + $0x50] sm:$0xff]  ;;  %v55_v31 = vld [vmem:[%s9265_s0 + $0x58] sm:$0xff]  ;;  %vm341_vm3 = vsmask.f32 3328 }
   0xb   :  { %7460 = vmatpush.bf16.msra.mxu2 %v7153_v3  ;;  %7447 = vst [vmem:[#allocation2 + $0x28] sm:$0xff] %v7386_v12   ;;  %v7159_v23 = vld [vmem:[%s9266_s1 + $0x60] sm:$0xff]  ;;  %v7150_v32 = vld [vmem:[%s9266_s1 + $0x18] sm:$0xff]  ;;  %vm7617_vm2 = vmor %vm109_vm0, %vm110_vm1  ;;  %v7391_v38 = vpack.c.bf16 %v55_v31, %v54_v29  ;;  %vm342_vm4 = vsmask.f32 7440 }
   0xc   :  { %7468 = vmatpush.bf16.msra.mxu3 %v7161_v4  ;;  %2453 = vmatpush.bf16.msra.mxu0 %v7153_v3  ;;  %7443 = vst [vmem:[#allocation2 + $0x8] sm:$0xff] %v7366_v16   ;;  %v7158_v33 = vld [vmem:[%s9266_s1 + $0x58] sm:$0xff]  ;;  %v7149_v42 = vld [vmem:[%s9266_s1 + $0x10] sm:$0xff]  ;;  %v7148_v62 = vld [vmem:[%s9266_s1 + $0x8] sm:$0xff] }
   0xd   :  { %2502 = vmatpush.bf16.msra.mxu1 %v7161_v4  ;;  %v92_v15 = vld [vmem:[#allocation2] sm:$0x8]  ;;  %v7157_v43 = vld [vmem:[%s9266_s1 + $0x50] sm:$0xff]  ;;  %7448 = vst [vmem:[#allocation2 + $0x30] sm:$0xff] %v7391_v38   ;;  %v47_v50 = vld [vmem:[%s9265_s0 + $0x18] sm:$0xff] }
   0xe   :  { %v93_v17 = vld [vmem:[#allocation2 + $0x4] sm:$0xf]  ;;  %v113_v18 = vshrl.u32 %v92_v15, 16  ;;  %v3053_v26 = vld [vmem:[#allocation2] sm:$0x8]  ;;  %v46_v49 = vld [vmem:[%s9265_s0 + $0x10] sm:$0xff] }
   0xf   :  { %v118_v19 = vshrl.u32 %v93_v17, 16  ;;  %v121_v20 = vshll.u32 %v93_v17, 16  ;;  %v7591_v21 = vld [vmem:[#allocation2 + $0x4] sm:$0xf]  ;;  %7461 = vmatpush.bf16.msra.mxu2 %v7152_v5  ;;  %v3071_v35 = vshrl.u32 %v3053_v26, 16  ;;  %v7371_v9 = vpack.c.bf16 %v47_v50, %v46_v49  ;;  %v7156_v10 = vld [vmem:[%s9266_s1 + $0x48] sm:$0xff]  ;;  %vm7847_vm5 = vmor %vm341_vm3, %vm342_vm4 }
  0x10   :  { %7469 = vmatpush.bf16.msra.mxu3 %v7160_v8  ;;  %v3076_v24 = vshrl.u32 %v7591_v21, 16  ;;  %2454 = vmatpush.bf16.msra.mxu0 %v7152_v5  ;;  %v292_v27 = vld [vmem:[#allocation2 + $0x4] sm:$0xf]  ;;  %v5917_v28 = vrot.slane %v113_v18, 11  ;;  %v3079_v37 = vshll.u32 %v7591_v21, 16  ;;  %v7186_v49 = vld [vmem:[%s9266_s1 + $0x138] sm:$0xff] }
  0x11   :  { %2503 = vmatpush.bf16.msra.mxu1 %v7160_v8  ;;  %v7600_v25 = vrot.slane %v118_v19, 7  ;;  %308 = vst [vmem:[#allocation3 + $0x4] sm:$0xf] %v292_v27  ;;  %v7624_v39 = vld [vmem:[#allocation2 + $0x20] sm:$0xf]  ;;  %v6496_v61 = vrot.slane %v3071_v35, 11 }
  0x12   :  { %v7621_v36 = vrot.slane %v3076_v24, 7  ;;  %v101_v40 = vld [vmem:[#allocation2 + $0x24] sm:$0xf]  ;;  %v102_v44 = vld [vmem:[#allocation2 + $0x28] sm:$0xf]  ;;  %v181_v45 = vshrl.u32 %v7624_v39, 16 }
  0x13   :  { %v123_v30 = vor.u32 %v121_v20, %v7600_v25  ;;  %7462 = vmatpush.bf16.msra.mxu2 %v7151_v22  ;;  %v300_v41 = vld [vmem:[#allocation2 + $0x24] sm:$0xf]  ;;  %v190_v46 = vshrl.u32 %v101_v40, 16  ;;  %v193_v47 = vshll.u32 %v101_v40, 16  ;;  %v199_v51 = vshrl.u32 %v102_v44, 16  ;;  %v57_v19 = vld [vmem:[%s9265_s0 + $0x68] sm:$0xff] }
  0x14   :  { %7470 = vmatpush.bf16.msra.mxu3 %v7159_v23  ;;  %2455 = vmatpush.bf16.msra.mxu0 %v7151_v22  ;;  %v202_v52 = vshll.u32 %v102_v44, 16  ;;  %v301_v53 = vld [vmem:[#allocation2 + $0x28] sm:$0xf]  ;;  %316 = vst [vmem:[#allocation3 + $0x124] sm:$0xf] %v300_v41  ;;  %v7641_v55 = vrot.slane %v181_v45, 7  ;;  %v3081_v2 = vor.u32 %v3079_v37, %v7621_v36 }
  0x15   :  { %2504 = vmatpush.bf16.msra.mxu1 %v7159_v23  ;;  %v124_v48 = vsel %vm7617_vm2, %v5917_v28, %v123_v30  ;;  %v3250_v54 = vld [vmem:[#allocation2 + $0x4] sm:$0xf]  ;;  %v192_v56 = vrot.slane %v190_v46, 7  ;;  %317 = vst [vmem:[#allocation3 + $0x148] sm:$0xf] %v301_v53  ;;  %v7643_v58 = vrot.slane %v199_v51, 7 }
  0x16   :  { %v94_v57 = vld [vmem:[#allocation2 + $0x8] sm:$0xf]  ;;  %276 = vst [vmem:[#allocation3] sm:$0xf] %v124_v48  ;;  %v188_v63 = vrot.slane %v7641_v55, 4  ;;  %v125_v6 = vrot.slane %v7600_v25, 4  ;;  %v3082_v22 = vsel %vm7617_vm2, %v6496_v61, %v3081_v2 }
  0x17   :  { %7463 = vmatpush.bf16.msra.mxu2 %v7150_v32  ;;  %v127_v59 = vshrl.u32 %v94_v57, 16  ;;  %v130_v60 = vshll.u32 %v94_v57, 16  ;;  %v195_v0 = vor.u32 %v193_v47, %v192_v56  ;;  %v197_v1 = vrot.slane %v192_v56, 4  ;;  %v293_v3 = vld [vmem:[#allocation2 + $0x8] sm:$0xf]  ;;  %v7664_v14 = vld [vmem:[%s9265_s0 + $0x60] sm:$0xff] }
  0x18   :  { %7471 = vmatpush.bf16.msra.mxu3 %v7158_v33  ;;  %2456 = vmatpush.bf16.msra.mxu0 %v7150_v32  ;;  %v7650_v4 = vld [vmem:[#allocation3 + $0x4] sm:$0xf]  ;;  %v204_v5 = vor.u32 %v202_v52, %v7643_v58  ;;  %309 = vst [vmem:[#allocation3 + $0x28] sm:$0xf] %v293_v3  ;;  %v103_v8 = vld [vmem:[#allocation2 + $0x2c] sm:$0xf]  ;;  %v7396_v41 = vpack.c.bf16 %v57_v19, %v7664_v14 }
  0x19   :  { %2505 = vmatpush.bf16.msra.mxu1 %v7158_v33  ;;  %v7654_v7 = vrot.slane %v127_v59, 7  ;;  %v196_v11 = vsel %vm7617_vm2, %v188_v63, %v195_v0  ;;  %3266 = vst [vmem:[#allocation3 + $0x4] sm:$0xf] %v3250_v54  ;;  %v208_v12 = vshrl.u32 %v103_v8, 16  ;;  %v211_v13 = vshll.u32 %v103_v8, 16  ;;  %v7147_v20 = vld [vmem:[%s9266_s1] sm:$0xff] }
  0x1a   :  { %v205_v15 = vsel %vm7617_vm2, %v197_v1, %v204_v5  ;;  %284 = vst [vmem:[#allocation3 + $0x120] sm:$0xf] %v196_v11  ;;  %v104_v17 = vld [vmem:[#allocation2 + $0x30] sm:$0xf]  ;;  %v206_v18 = vrot.slane %v7643_v58, 4  ;;  %v7155_v21 = vld [vmem:[%s9266_s1 + $0x40] sm:$0xff] }
  0x1b   :  { %7464 = vmatpush.bf16.msra.mxu2 %v7149_v42  ;;  %v132_v16 = vor.u32 %v130_v60, %v7654_v7  ;;  %285 = vst [vmem:[#allocation3 + $0x144] sm:$0xf] %v205_v15  ;;  %v210_v23 = vrot.slane %v208_v12, 7  ;;  %v217_v24 = vshrl.u32 %v104_v17, 16  ;;  %v302_v25 = vld [vmem:[#allocation2 + $0x2c] sm:$0xf] }
  0x1c   :  { %7472 = vmatpush.bf16.msra.mxu3 %v7157_v43  ;;  %2457 = vmatpush.bf16.msra.mxu0 %v7149_v42  ;;  %v7111_v26 = vld [vmem:[#allocation3 + $0x124] sm:$0xf]  ;;  %v6068_v27 = vld [vmem:[#allocation3 + $0x144] sm:$0xf0]  ;;  %v220_v30 = vshll.u32 %v104_v17, 16  ;;  %7444 = vst [vmem:[#allocation2 + $0x10] sm:$0xff] %v7371_v9  }
  0x1d   :  { %2506 = vmatpush.bf16.msra.mxu1 %v7157_v43  ;;  %v7170_v28 = vld [vmem:[%s9266_s1 + $0xb8] sm:$0xff]  ;;  %v133_v29 = vsel %vm7617_vm2, %v125_v6, %v132_v16  ;;  %v7686_v31 = vld [vmem:[#allocation3] sm:$0xf]  ;;  %v213_v33 = vor.u32 %v211_v13, %v210_v23  ;;  %v215_v35 = vrot.slane %v210_v23, 4  ;;  %v7691_v37 = vrot.slane %v217_v24, 7  ;;  %7449 = vst [vmem:[#allocation2 + $0x38] sm:$0xff] %v7396_v41  }
  0x1e   :  { %277 = vst [vmem:[#allocation3 + $0x24] sm:$0xf] %v133_v29  ;;  %v7178_v32 = vld [vmem:[%s9266_s1 + $0xf8] sm:$0xff]  ;;  %v303_v38 = vld [vmem:[#allocation2 + $0x30] sm:$0xf]  ;;  %v6071_v47 = vor.u32 %v7111_v26, %v6068_v27  ;;  %v134_v52 = vrot.slane %v7654_v7, 4 }
  0x1f   :  { %7465 = vmatpush.bf16.msra.mxu2 %v7148_v62  ;;  %3234 = vst [vmem:[#allocation3] sm:$0xf] %v3082_v22  ;;  %v95_v40 = vld [vmem:[#allocation2 + $0xc] sm:$0xf]  ;;  %v5924_v42 = vld [vmem:[#allocation3 + $0x24] sm:$0xf0]  ;;  %v214_v43 = vsel %vm7617_vm2, %v206_v18, %v213_v33  ;;  %v222_v44 = vor.u32 %v220_v30, %v7691_v37 }
  0x20   :  { %7473 = vmatpush.bf16.msra.mxu3 %v7156_v10  ;;  %2458 = vmatpush.bf16.msra.mxu0 %v7148_v62  ;;  %318 = vst [vmem:[#allocation3 + $0x16c] sm:$0xf] %v302_v25  ;;  %v136_v45 = vshrl.u32 %v95_v40, 16  ;;  %v139_v46 = vshll.u32 %v95_v40, 16  ;;  %v7169_v48 = vld [vmem:[%s9266_s1 + $0xb0] sm:$0xff]  ;;  %v5927_v58 = vor.u32 %v7650_v4, %v5924_v42  ;;  %v48_v1 = vld [vmem:[%s9265_s0 + $0x20] sm:$0xff] }
  0x21   :  { %2507 = vmatpush.bf16.msra.mxu1 %v7156_v10  ;;  %286 = vst [vmem:[#allocation3 + $0x168] sm:$0xf] %v214_v43  ;;  %v294_v50 = vld [vmem:[#allocation2 + $0xc] sm:$0xf]  ;;  %v6066_v51 = vld [vmem:[#allocation3 + $0x120] sm:$0xf]  ;;  %v223_v54 = vsel %vm7617_vm2, %v215_v35, %v222_v44 }
  0x22   :  { %v7177_v53 = vld [vmem:[%s9266_s1 + $0xf0] sm:$0xff]  ;;  %319 = vst [vmem:[#allocation3 + $0x190] sm:$0xf] %v303_v38  ;;  %v138_v56 = vrot.slane %v136_v45, 7  ;;  %v7168_v10 = vld [vmem:[%s9266_s1 + $0xa8] sm:$0xff]  ;;  %v224_v14 = vrot.slane %v7691_v37, 4 }
  0x23   :  { %7466 = vmatpush.bf16.msra.mxu2 %v7147_v20  ;;  %v7115_v57 = vld [vmem:[#allocation3 + $0x140] sm:$0xf0]  ;;  %287 = vst [vmem:[#allocation3 + $0x18c] sm:$0xf] %v223_v54  ;;  %v96_v61 = vld [vmem:[#allocation2 + $0x10] sm:$0xf] }
  0x24   :  { %7474 = vmatpush.bf16.msra.mxu3 %v7155_v21  ;;  %2459 = vmatpush.bf16.msra.mxu0 %v7147_v20  ;;  %v105_v59 = vld [vmem:[#allocation2 + $0x34] sm:$0xf]  ;;  %v6067_v60 = vor.u32 %v7115_v57, %v6066_v51  ;;  %v141_v62 = vor.u32 %v139_v46, %v138_v56  ;;  %v295_v0 = vld [vmem:[#allocation2 + $0x10] sm:$0xf]  ;;  %v145_v3 = vshrl.u32 %v96_v61, 16  ;;  %v148_v4 = vshll.u32 %v96_v61, 16 }
  0x25   :  { %2508 = vmatpush.bf16.msra.mxu1 %v7155_v21  ;;  %v7185_v63 = vld [vmem:[%s9266_s1 + $0x130] sm:$0xff]  ;;  %310 = vst [vmem:[#allocation3 + $0x4c] sm:$0xf] %v294_v50  ;;  %v226_v7 = vshrl.u32 %v105_v59, 16  ;;  %v229_v8 = vshll.u32 %v105_v59, 16  ;;  %v143_v11 = vrot.slane %v138_v56, 4 }
  0x26   :  { %v7079_v2 = vld [vmem:[#allocation3 + $0x20] sm:$0xf0]  ;;  %2480 = vmatmul.bf16.vlgmr.msra.gmra.mxu2 %v6067_v60  ;;  %v142_v6 = vsel %vm7617_vm2, %v134_v52, %v141_v62  ;;  %311 = vst [vmem:[#allocation3 + $0x70] sm:$0xf] %v295_v0  ;;  %v147_v12 = vrot.slane %v145_v3, 7  ;;  %v7176_v13 = vld [vmem:[%s9266_s1 + $0xe8] sm:$0xff] }
  0x27   :  { %2550 = vmatpush.bf16.msrb.mxu2 %v7170_v28  ;;  %2529 = vmatmul.bf16.vlgmr.msra.gmra.mxu3 %v6071_v47  ;;  %v5923_v5 = vor.u32 %v7079_v2, %v7686_v31  ;;  %v304_v9 = vld [vmem:[#allocation2 + $0x34] sm:$0xf]  ;;  %278 = vst [vmem:[#allocation3 + $0x48] sm:$0xf] %v142_v6  ;;  %v7726_v15 = vrot.slane %v226_v7, 7  ;;  %v49_v16 = vld [vmem:[%s9265_s0 + $0x28] sm:$0xff] }
  0x28   :  { %2599 = vmatpush.bf16.msrb.mxu3 %v7178_v32  ;;  %2648 = vmatpush.bf16.msrb.mxu0 %v7186_v49  ;;  %320 = vst [vmem:[#allocation3 + $0x1b4] sm:$0xf] %v304_v9  ;;  %v150_v17 = vor.u32 %v148_v4, %v147_v12  ;;  %v7184_v18 = vld [vmem:[%s9266_s1 + $0x128] sm:$0xff]  ;;  %v7376_v19 = vpack.c.bf16 %v49_v16, %v48_v1  ;;  %v97_v20 = vld [vmem:[#allocation2 + $0x14] sm:$0xf]  ;;  %v7167_v21 = vld [vmem:[%s9266_s1 + $0xa0] sm:$0xff] }
  0x29   :  { %2509 = vmatmul.bf16.vlgmr.msra.gmra.mxu1 %v5927_v58  ;;  %2460 = vmatmul.bf16.vlgmr.msra.gmra.mxu0 %v5923_v5  ;;  %v231_v22 = vor.u32 %v229_v8, %v7726_v15  ;;  %v154_v23 = vshrl.u32 %v97_v20, 16  ;;  %v7738_v24 = vld [vmem:[#allocation3 + $0x16c] sm:$0xf]  ;;  %v7740_v25 = vld [vmem:[#allocation3 + $0x18c] sm:$0xf0]  ;;  %v157_v29 = vshll.u32 %v97_v20, 16 }
  0x2a   :  { %v151_v26 = vsel %vm7617_vm2, %v143_v11, %v150_v17  ;;  %v106_v27 = vld [vmem:[#allocation2 + $0x38] sm:$0xf]  ;;  %7445 = vst [vmem:[#allocation2 + $0x18] sm:$0xff] %v7376_v19   ;;  %v7175_v30 = vld [vmem:[%s9266_s1 + $0xe0] sm:$0xff]  ;;  %v152_v35 = vrot.slane %v147_v12, 4  ;;  %v233_v45 = vrot.slane %v7726_v15, 4  ;;  %v6107_v52 = vor.u32 %v7738_v24, %v7740_v25 }
  0x2b   :  { %2551 = vmatpush.bf16.msrb.mxu2 %v7169_v48  ;;  %v305_v28 = vld [vmem:[#allocation2 + $0x38] sm:$0xf]  ;;  %279 = vst [vmem:[#allocation3 + $0x6c] sm:$0xf] %v151_v26  ;;  %v232_v31 = vsel %vm7617_vm2, %v224_v14, %v231_v22  ;;  %v235_v32 = vshrl.u32 %v106_v27, 16  ;;  %v238_v33 = vshll.u32 %v106_v27, 16 }
  0x2c   :  { %2600 = vmatpush.bf16.msrb.mxu3 %v7177_v53  ;;  %2649 = vmatpush.bf16.msrb.mxu0 %v7185_v63  ;;  %v6102_v37 = vld [vmem:[#allocation3 + $0x168] sm:$0xf]  ;;  %v7124_v38 = vld [vmem:[#allocation3 + $0x188] sm:$0xf0]  ;;  %288 = vst [vmem:[#allocation3 + $0x1b0] sm:$0xf] %v232_v31 }
  0x2d   :  { %v7166_v40 = vld [vmem:[%s9266_s1 + $0x98] sm:$0xff]  ;;  %v7752_v41 = vrot.slane %v154_v23, 7  ;;  %v7183_v42 = vld [vmem:[%s9266_s1 + $0x120] sm:$0xff]  ;;  %v7758_v46 = vrot.slane %v235_v32, 7  ;;  %321 = vst [vmem:[#allocation3 + $0x1d8] sm:$0xf] %v305_v28  ;;  %v6103_v1 = vor.u32 %v7124_v38, %v6102_v37 }
  0x2e   :  { %v7084_v43 = vld [vmem:[#allocation3 + $0x4c] sm:$0xf]  ;;  %v5960_v44 = vld [vmem:[#allocation3 + $0x6c] sm:$0xf0]  ;;  %v5958_v48 = vld [vmem:[#allocation3 + $0x48] sm:$0xf] }
  0x2f   :  { %2552 = vmatpush.bf16.msrb.mxu2 %v7168_v10  ;;  %v7174_v47 = vld [vmem:[%s9266_s1 + $0xd8] sm:$0xff]  ;;  %v159_v49 = vor.u32 %v157_v29, %v7752_v41  ;;  %v296_v50 = vld [vmem:[#allocation2 + $0x14] sm:$0xf]  ;;  %v240_v53 = vor.u32 %v238_v33, %v7758_v46  ;;  %v161_v59 = vrot.slane %v7752_v41, 4  ;;  %v5963_v6 = vor.u32 %v7084_v43, %v5960_v44  ;;  %v299_v17 = vld [vmem:[#allocation2 + $0x20] sm:$0xf] }
  0x30   :  { %2601 = vmatpush.bf16.msrb.mxu3 %v7176_v13  ;;  %2650 = vmatpush.bf16.msrb.mxu0 %v7184_v18  ;;  %v7194_v51 = vld [vmem:[%s9266_s1 + $0x178] sm:$0xff]  ;;  %312 = vst [vmem:[#allocation3 + $0x94] sm:$0xf] %v296_v50  ;;  %v58_v54 = vld [vmem:[%s9265_s0 + $0x70] sm:$0xff]  ;;  %v242_v11 = vrot.slane %v7758_v46, 4  ;;  %v184_v16 = vshll.u32 %v7624_v39, 16 }
  0x31   :  { %v59_v56 = vld [vmem:[%s9265_s0 + $0x78] sm:$0xff]  ;;  %v160_v58 = vsel %vm7617_vm2, %v152_v35, %v159_v49  ;;  %v7165_v60 = vld [vmem:[%s9266_s1 + $0x90] sm:$0xff]  ;;  %2697 = vmatpush.bf16.msrb.mxu1 %v7194_v51  ;;  %v241_v2 = vsel %vm7617_vm2, %v233_v45, %v240_v53  ;;  %v7172_v24 = vld [vmem:[%s9266_s1 + $0xc8] sm:$0xff]  ;;  %315 = vst [vmem:[#allocation3 + $0x100] sm:$0xf] %v299_v17 }
  0x32   :  { %v107_v57 = vld [vmem:[#allocation2 + $0x3c] sm:$0xf]  ;;  %v7401_v62 = vpack.c.bf16 %v59_v56, %v58_v54  ;;  %v98_v3 = vld [vmem:[#allocation2 + $0x18] sm:$0xf]  ;;  %280 = vst [vmem:[#allocation3 + $0x90] sm:$0xf] %v160_v58 }
  0x33   :  { %2553 = vmatpush.bf16.msrb.mxu2 %v7167_v21  ;;  %v7182_v61 = vld [vmem:[%s9266_s1 + $0x118] sm:$0xff]  ;;  %v244_v63 = vshrl.u32 %v107_v57, 16  ;;  %289 = vst [vmem:[#allocation3 + $0x1d4] sm:$0xf] %v241_v2  ;;  %v163_v7 = vshrl.u32 %v98_v3, 16  ;;  %v166_v8 = vshll.u32 %v98_v3, 16 }
  0x34   :  { %2602 = vmatpush.bf16.msrb.mxu3 %v7175_v30  ;;  %2651 = vmatpush.bf16.msrb.mxu0 %v7183_v42  ;;  %v306_v0 = vld [vmem:[#allocation2 + $0x3c] sm:$0xf]  ;;  %v297_v4 = vld [vmem:[#allocation2 + $0x18] sm:$0xf]  ;;  %v7173_v10 = vld [vmem:[%s9266_s1 + $0xd0] sm:$0xff]  ;;  %v247_v13 = vshll.u32 %v107_v57, 16  ;;  %v186_v30 = vor.u32 %v184_v16, %v7641_v55 }
  0x35   :  { %v7088_v5 = vld [vmem:[#allocation3 + $0x68] sm:$0xf0]  ;;  %313 = vst [vmem:[#allocation3 + $0xb8] sm:$0xf] %v297_v4  ;;  %v7791_v12 = vrot.slane %v244_v63, 7  ;;  %v165_v14 = vrot.slane %v163_v7, 7 }
  0x36   :  { %v5959_v9 = vor.u32 %v7088_v5, %v5958_v48  ;;  %7450 = vst [vmem:[#allocation2 + $0x40] sm:$0xff] %v7401_v62   ;;  %v7193_v15 = vld [vmem:[%s9266_s1 + $0x170] sm:$0xff]  ;;  %2485 = vmatmul.bf16.gmra.mxu2 %v6103_v1  ;;  %v99_v19 = vld [vmem:[#allocation2 + $0x1c] sm:$0xf]  ;;  %v7164_v21 = vld [vmem:[%s9266_s1 + $0x88] sm:$0xff] }
  0x37   :  { %2554 = vmatpush.bf16.msrb.mxu2 %v7166_v40  ;;  %2534 = vmatmul.bf16.gmra.mxu3 %v6107_v52  ;;  %v249_v18 = vor.u32 %v247_v13, %v7791_v12  ;;  %322 = vst [vmem:[#allocation3 + $0x1fc] sm:$0xf] %v306_v0  ;;  %v168_v20 = vor.u32 %v166_v8, %v165_v14  ;;  %v172_v22 = vshrl.u32 %v99_v19, 16  ;;  %v175_v23 = vshll.u32 %v99_v19, 16  ;;  %v7181_v25 = vld [vmem:[%s9266_s1 + $0x110] sm:$0xff]  ;;  %v7192_v31 = vld [vmem:[%s9266_s1 + $0x168] sm:$0xff] }
  0x38   :  { %2603 = vmatpush.bf16.msrb.mxu3 %v7174_v47  ;;  %2652 = vmatpush.bf16.msrb.mxu0 %v7182_v61  ;;  %v298_v26 = vld [vmem:[#allocation2 + $0x1c] sm:$0xf]  ;;  %v170_v28 = vrot.slane %v165_v14, 4  ;;  %v7163_v35 = vld [vmem:[%s9266_s1 + $0x80] sm:$0xff]  ;;  %v6140_v41 = vld [vmem:[#allocation3 + $0x1d4] sm:$0xf0] }
  0x39   :  { %2514 = vmatmul.bf16.gmra.mxu1 %v5963_v6  ;;  %2465 = vmatmul.bf16.gmra.mxu0 %v5959_v9  ;;  %v250_v39 = vsel %vm7617_vm2, %v242_v11, %v249_v18  ;;  %v169_v27 = vsel %vm7617_vm2, %v161_v59, %v168_v20  ;;  %v174_v29 = vrot.slane %v172_v22, 7  ;;  %314 = vst [vmem:[#allocation3 + $0xdc] sm:$0xf] %v298_v26  ;;  %v7171_v37 = vld [vmem:[%s9266_s1 + $0xc0] sm:$0xff]  ;;  %v7180_v44 = vld [vmem:[%s9266_s1 + $0x108] sm:$0xff]  ;;  %v251_v50 = vrot.slane %v7791_v12, 4 }
  0x3a   :  { %290 = vst [vmem:[#allocation3 + $0x1f8] sm:$0xf] %v250_v39  ;;  %2698 = vmatpush.bf16.msrb.mxu1 %v7193_v15  ;;  %v6138_v38 = vld [vmem:[#allocation3 + $0x1b0] sm:$0xf]  ;;  %v7133_v55 = vld [vmem:[#allocation3 + $0x1d0] sm:$0xf0] }
  0x3b   :  { %2555 = vmatpush.bf16.msrb.mxu2 %v7165_v60  ;;  %281 = vst [vmem:[#allocation3 + $0xb4] sm:$0xf] %v169_v27  ;;  %v177_v32 = vor.u32 %v175_v23, %v174_v29  ;;  %v179_v33 = vrot.slane %v174_v29, 4  ;;  %v7129_v40 = vld [vmem:[#allocation3 + $0x1b4] sm:$0xf]  ;;  %v6139_v60 = vor.u32 %v7133_v55, %v6138_v38  ;;  %v7190_v1 = vld [vmem:[%s9266_s1 + $0x158] sm:$0xff] }
  0x3c   :  { %2604 = vmatpush.bf16.msrb.mxu3 %v7173_v10  ;;  %2653 = vmatpush.bf16.msrb.mxu0 %v7181_v25  ;;  %v7191_v49 = vld [vmem:[%s9266_s1 + $0x160] sm:$0xff]  ;;  %v5996_v57 = vld [vmem:[#allocation3 + $0xb4] sm:$0xf0]  ;;  %v7835_v59 = vld [vmem:[#allocation2 + $0xc] sm:$0xf]  ;;  %v6143_v61 = vor.u32 %v7129_v40, %v6140_v41 }
  0x3d   :  { %v108_v42 = vld [vmem:[#allocation2 + $0x40] sm:$0xf]  ;;  %v178_v47 = vsel %vm7617_vm2, %v170_v28, %v177_v32  ;;  %v187_v48 = vsel %vm7617_vm2, %v179_v33, %v186_v30  ;;  %v324_v52 = vld [vmem:[#allocation2 + $0x4] sm:$0xf]  ;;  %v325_v58 = vld [vmem:[#allocation2 + $0x8] sm:$0xf] }
  0x3e   :  { %v307_v43 = vld [vmem:[#allocation2 + $0x40] sm:$0xf]  ;;  %v253_v45 = vshrl.u32 %v108_v42, 16  ;;  %v256_v46 = vshll.u32 %v108_v42, 16  ;;  %2699 = vmatpush.bf16.msrb.mxu1 %v7192_v31  ;;  %282 = vst [vmem:[#allocation3 + $0xd8] sm:$0xf] %v178_v47 }
  0x3f   :  { %2556 = vmatpush.bf16.msrb.mxu2 %v7164_v21  ;;  %323 = vst [vmem:[#allocation3 + $0x220] sm:$0xf] %v307_v43  ;;  %v7179_v51 = vld [vmem:[%s9266_s1 + $0x100] sm:$0xff]  ;;  %v345_v56 = vshrl.u32 %v324_v52, 16  ;;  %v348_v3 = vshll.u32 %v324_v52, 16  ;;  %v354_v4 = vshll.u32 %v325_v58, 16 }
  0x40   :  { %2605 = vmatpush.bf16.msrb.mxu3 %v7172_v24  ;;  %2654 = vmatpush.bf16.msrb.mxu0 %v7180_v44  ;;  %v7093_v53 = vld [vmem:[#allocation3 + $0x94] sm:$0xf]  ;;  %v255_v54 = vrot.slane %v253_v45, 7  ;;  %283 = vst [vmem:[#allocation3 + $0xfc] sm:$0xf] %v187_v48  ;;  %v358_v7 = vshrl.u32 %v325_v58, 16 }
  0x41   :  { %v5994_v62 = vld [vmem:[#allocation3 + $0x90] sm:$0xf]  ;;  %v347_v2 = vrot.slane %v345_v56, 4  ;;  %v5999_v5 = vor.u32 %v7093_v53, %v5996_v57  ;;  %v364_v8 = vshll.u32 %v7835_v59, 16  ;;  %v540_v9 = vld [vmem:[#allocation2 + $0x4] sm:$0x8] }
  0x42   :  { %v7097_v63 = vld [vmem:[#allocation3 + $0xb0] sm:$0xf0]  ;;  %v258_v0 = vor.u32 %v256_v46, %v255_v54  ;;  %2700 = vmatpush.bf16.msrb.mxu1 %v7191_v49  ;;  %v541_v10 = vld [vmem:[#allocation2 + $0x8] sm:$0xf]  ;;  %v350_v12 = vrot.slane %v348_v3, 5  ;;  %v356_v13 = vrot.slane %v354_v4, 5 }
  0x43   :  { %2557 = vmatpush.bf16.msrb.mxu2 %v7163_v35  ;;  %v5995_v11 = vor.u32 %v7097_v63, %v5994_v62  ;;  %v360_v14 = vrot.slane %v358_v7, 4  ;;  %v542_v15 = vld [vmem:[#allocation2 + $0xc] sm:$0xf]  ;;  %v558_v17 = vshrl.u32 %v540_v9, 16  ;;  %v563_v18 = vshrl.u32 %v541_v10, 16  ;;  %v7202_v20 = vld [vmem:[%s9266_s1 + $0x1b8] sm:$0xff] }
  0x44   :  { %2606 = vmatpush.bf16.msrb.mxu3 %v7171_v37  ;;  %2655 = vmatpush.bf16.msrb.mxu0 %v7179_v51  ;;  %v259_v6 = vsel %vm7617_vm2, %v251_v50, %v258_v0  ;;  %v351_v16 = vor.u32 %v350_v12, %v347_v2  ;;  %v566_v19 = vshll.u32 %v541_v10, 16  ;;  %v7851_v23 = vrot.slane %v364_v8, 5  ;;  %v7189_v25 = vld [vmem:[%s9266_s1 + $0x150] sm:$0xff]  ;;  %v737_v26 = vld [vmem:[#allocation2 + $0x8] sm:$0xf]  ;;  %v7210_v31 = vld [vmem:[%s9266_s1 + $0x1f8] sm:$0xff] }
  0x45   :  { %291 = vst [vmem:[#allocation3 + $0x21c] sm:$0xf] %v259_v6  ;;  %v361_v22 = vor.u32 %v360_v14, %v356_v13  ;;  %v572_v39 = vshrl.u32 %v542_v15, 16  ;;  %v575_v24 = vshll.u32 %v542_v15, 16  ;;  %v5918_v28 = vrot.slane %v558_v17, 11  ;;  %v7188_v35 = vld [vmem:[%s9266_s1 + $0x148] sm:$0xff] }
  0x46   :  { %2701 = vmatpush.bf16.msrb.mxu1 %v7190_v1  ;;  %2490 = vmatmul.bf16.gmra.mxu2 %v6139_v60  ;;  %v352_v27 = vrot.slane %v351_v16, 4  ;;  %v565_v29 = vrot.slane %v563_v18, 7  ;;  %v738_v30 = vld [vmem:[#allocation2 + $0xc] sm:$0xf]  ;;  %753 = vst [vmem:[#allocation3 + $0x10] sm:$0xf] %v737_v26 }
  0x47   :  { %2539 = vmatmul.bf16.gmra.mxu3 %v6143_v61  ;;  %2746 = vmatpush.bf16.msra.mxu2 %v7202_v20  ;;  %v362_v32 = vrot.slane %v361_v22, 4  ;;  %v7859_v33 = vrot.slane %v572_v39, 7  ;;  %754 = vst [vmem:[#allocation3 + $0x34] sm:$0xf] %v738_v30  ;;  %v7218_v40 = vld [vmem:[%s9266_s1 + $0x238] sm:$0xff]  ;;  %v7187_v54 = vld [vmem:[%s9266_s1 + $0x140] sm:$0xff] }
  0x48   :  { %v357_v37 = vsel %vm7847_vm5, %v352_v27, %v356_v13  ;;  %v568_v38 = vor.u32 %v566_v19, %v565_v29  ;;  %v570_v55 = vrot.slane %v565_v29, 4  ;;  %2795 = vmatpush.bf16.msra.mxu3 %v7210_v31  ;;  %v769_v41 = vld [vmem:[#allocation2 + $0x8] sm:$0xf]  ;;  %v770_v44 = vld [vmem:[#allocation2 + $0xc] sm:$0xf]  ;;  %2844 = vmatpush.bf16.msra.mxu0 %v7218_v40 }
  0x49   :  { %2519 = vmatmul.bf16.gmra.mxu1 %v5999_v5  ;;  %2470 = vmatmul.bf16.gmra.mxu0 %v5995_v11  ;;  %v367_v42 = vsel %vm7847_vm5, %v362_v32, %v7851_v23  ;;  %524 = vst [vmem:[#allocation3 + $0x8] sm:$0xf] %v357_v37  ;;  %v577_v43 = vor.u32 %v575_v24, %v7859_v33  ;;  %v7138_v45 = vld [vmem:[#allocation3 + $0x1fc] sm:$0xf]  ;;  %v6176_v46 = vld [vmem:[#allocation3 + $0x21c] sm:$0xf0] }
  0x4a   :  { %2702 = vmatpush.bf16.msrb.mxu1 %v7189_v25  ;;  %525 = vst [vmem:[#allocation3 + $0x2c] sm:$0xf] %v367_v42  ;;  %v569_v47 = vsel %vm7617_vm2, %v5918_v28, %v568_v38  ;;  %v7875_v48 = vld [vmem:[#allocation2 + $0x10] sm:$0xf]  ;;  %v787_v49 = vshrl.u32 %v769_v41, 16  ;;  %v790_v50 = vshll.u32 %v769_v41, 16  ;;  %v6179_v11 = vor.u32 %v7138_v45, %v6176_v46 }
  0x4b   :  { %v6174_v51 = vld [vmem:[#allocation3 + $0x1f8] sm:$0xf]  ;;  %v578_v53 = vsel %vm7617_vm2, %v570_v55, %v577_v43  ;;  %721 = vst [vmem:[#allocation3 + $0xc] sm:$0xf] %v569_v47  ;;  %v796_v56 = vshll.u32 %v770_v44, 16  ;;  %v800_v57 = vshrl.u32 %v770_v44, 16 }
  0x4c   :  { %v7142_v52 = vld [vmem:[#allocation3 + $0x218] sm:$0xf0]  ;;  %v806_v58 = vshll.u32 %v7875_v48, 16  ;;  %v6030_v60 = vld [vmem:[#allocation3 + $0xd8] sm:$0xf]  ;;  %v789_v63 = vrot.slane %v787_v49, 4 }
  0x4d   :  { %v7102_v61 = vld [vmem:[#allocation3 + $0xdc] sm:$0xf]  ;;  %v6032_v62 = vld [vmem:[#allocation3 + $0xfc] sm:$0xf0]  ;;  %722 = vst [vmem:[#allocation3 + $0x30] sm:$0xf] %v578_v53  ;;  %v6175_v16 = vor.u32 %v7142_v52, %v6174_v51 }
  0x4e   :  { %2703 = vmatpush.bf16.msrb.mxu1 %v7188_v35  ;;  %v792_v0 = vrot.slane %v790_v50, 5  ;;  %v327_v1 = vld [vmem:[#allocation2 + $0x10] sm:$0xf]  ;;  %v798_v2 = vrot.slane %v796_v56, 5  ;;  %v802_v3 = vrot.slane %v800_v57, 4  ;;  %v368_v5 = vshrl.u32 %v7835_v59, 16 }
  0x4f   :  { %v7883_v4 = vld [vmem:[#allocation2 + $0x14] sm:$0xf]  ;;  %v7106_v6 = vld [vmem:[#allocation3 + $0xf8] sm:$0xf0]  ;;  %v374_v8 = vshll.u32 %v327_v1, 16  ;;  %v378_v9 = vshrl.u32 %v327_v1, 16  ;;  %v6035_v22 = vor.u32 %v7102_v61, %v6032_v62 }
  0x50   :  { %v793_v7 = vor.u32 %v792_v0, %v789_v63  ;;  %v384_v10 = vshll.u32 %v7883_v4, 16  ;;  %v803_v12 = vor.u32 %v802_v3, %v798_v2  ;;  %v7887_v13 = vrot.slane %v806_v58, 5  ;;  %v543_v15 = vld [vmem:[#allocation2 + $0x10] sm:$0xf]  ;;  %v544_v24 = vld [vmem:[#allocation2 + $0x14] sm:$0xf] }
  0x51   :  { %v370_v14 = vrot.slane %v368_v5, 4  ;;  %v376_v18 = vrot.slane %v374_v8, 5  ;;  %v380_v19 = vrot.slane %v378_v9, 4  ;;  %v6031_v20 = vor.u32 %v7106_v6, %v6030_v60  ;;  %v739_v29 = vld [vmem:[#allocation2 + $0x10] sm:$0xf] }
  0x52   :  { %2704 = vmatpush.bf16.msrb.mxu1 %v7187_v54  ;;  %v794_v17 = vrot.slane %v793_v7, 4  ;;  %v804_v59 = vrot.slane %v803_v12, 4  ;;  %v7892_v27 = vrot.slane %v384_v10, 5  ;;  %v581_v28 = vshrl.u32 %v543_v15, 16  ;;  %v7201_v55 = vld [vmem:[%s9266_s1 + $0x1b0] sm:$0xff] }
  0x53   :  { %v371_v39 = vor.u32 %v370_v14, %v7851_v23  ;;  %v381_v26 = vor.u32 %v380_v19, %v376_v18  ;;  %v579_v32 = vrot.slane %v7859_v33, 4  ;;  %v584_v35 = vshll.u32 %v543_v15, 16  ;;  %v740_v42 = vld [vmem:[#allocation2 + $0x14] sm:$0xf]  ;;  %755 = vst [vmem:[#allocation3 + $0x58] sm:$0xf] %v739_v29  ;;  %2747 = vmatpush.bf16.msra.mxu2 %v7201_v55 }
  0x54   :  { %v799_v25 = vsel %vm7847_vm5, %v794_v17, %v798_v2  ;;  %v809_v30 = vsel %vm7847_vm5, %v804_v59, %v7887_v13  ;;  %v583_v37 = vrot.slane %v581_v28, 7  ;;  %v590_v38 = vshrl.u32 %v544_v24, 16  ;;  %v7209_v47 = vld [vmem:[%s9266_s1 + $0x1f0] sm:$0xff]  ;;  %v7915_v50 = vld [vmem:[#allocation2 + $0x18] sm:$0xf] }
  0x55   :  { %966 = vst [vmem:[#allocation3 + $0x14] sm:$0xf] %v799_v25  ;;  %v372_v31 = vrot.slane %v371_v39, 4  ;;  %v382_v23 = vrot.slane %v381_v26, 4  ;;  %v593_v41 = vshll.u32 %v544_v24, 16  ;;  %v810_v43 = vshrl.u32 %v7875_v48, 16  ;;  %2796 = vmatpush.bf16.msra.mxu3 %v7209_v47 }
  0x56   :  { %2495 = vmatmul.bf16.gmra.mxu2 %v6175_v16  ;;  %967 = vst [vmem:[#allocation3 + $0x38] sm:$0xf] %v809_v30  ;;  %v586_v44 = vor.u32 %v584_v35, %v583_v37  ;;  %v588_v45 = vrot.slane %v583_v37, 4  ;;  %v7907_v46 = vrot.slane %v590_v38, 7  ;;  %v7217_v49 = vld [vmem:[%s9266_s1 + $0x230] sm:$0xff]  ;;  %v826_v60 = vshll.u32 %v7915_v50, 16 }
  0x57   :  { %2544 = vmatmul.bf16.gmra.mxu3 %v6179_v11  ;;  %v377_v40 = vsel %vm7847_vm5, %v372_v31, %v376_v18  ;;  %v387_v33 = vsel %vm7847_vm5, %v382_v23, %v7892_v27  ;;  %v772_v48 = vld [vmem:[#allocation2 + $0x14] sm:$0xf]  ;;  %756 = vst [vmem:[#allocation3 + $0x7c] sm:$0xf] %v740_v42  ;;  %2845 = vmatpush.bf16.msra.mxu0 %v7217_v49  ;;  %v812_v53 = vrot.slane %v810_v43, 4  ;;  %v388_v7 = vshrl.u32 %v7883_v4, 16 }
  0x58   :  { %526 = vst [vmem:[#allocation3 + $0x50] sm:$0xf] %v377_v40  ;;  %v587_v51 = vsel %vm7617_vm2, %v579_v32, %v586_v44  ;;  %v595_v52 = vor.u32 %v593_v41, %v7907_v46  ;;  %v816_v54 = vshll.u32 %v772_v48, 16  ;;  %v7920_v56 = vld [vmem:[#allocation3 + $0x10] sm:$0xf]  ;;  %v820_v58 = vshrl.u32 %v772_v48, 16 }
  0x59   :  { %2524 = vmatmul.bf16.gmra.mxu1 %v6035_v22  ;;  %2475 = vmatmul.bf16.gmra.mxu0 %v6031_v20  ;;  %527 = vst [vmem:[#allocation3 + $0x74] sm:$0xf] %v387_v33  ;;  %v7922_v57 = vld [vmem:[#allocation3 + $0x30] sm:$0xf0]  ;;  %v329_v61 = vld [vmem:[#allocation2 + $0x18] sm:$0xf]  ;;  %v813_v3 = vor.u32 %v812_v53, %v7887_v13 }
  0x5a   :  { %723 = vst [vmem:[#allocation3 + $0x54] sm:$0xf] %v587_v51  ;;  %v5930_v62 = vld [vmem:[#allocation3 + $0x8] sm:$0xf]  ;;  %v7080_v63 = vld [vmem:[#allocation3 + $0x28] sm:$0xf0]  ;;  %v596_v2 = vsel %vm7617_vm2, %v588_v45, %v595_v52  ;;  %v5939_v13 = vor.u32 %v7922_v57, %v7920_v56 }
  0x5b   :  { %v7076_v0 = vld [vmem:[#allocation3 + $0xc] sm:$0xf]  ;;  %v5932_v1 = vld [vmem:[#allocation3 + $0x2c] sm:$0xf0]  ;;  %v818_v5 = vrot.slane %v816_v54, 5  ;;  %v822_v9 = vrot.slane %v820_v58, 4  ;;  %v5931_v24 = vor.u32 %v7080_v63, %v5930_v62 }
  0x5c   :  { %v7928_v6 = vld [vmem:[#allocation2 + $0x1c] sm:$0xf]  ;;  %v7077_v8 = vld [vmem:[#allocation3 + $0x14] sm:$0xf]  ;;  %724 = vst [vmem:[#allocation3 + $0x78] sm:$0xf] %v596_v2  ;;  %v5935_v25 = vor.u32 %v7076_v0, %v5932_v1 }
  0x5d   :  { %v814_v10 = vrot.slane %v813_v3, 4  ;;  %v390_v11 = vrot.slane %v388_v7, 4  ;;  %v394_v12 = vshll.u32 %v329_v61, 16  ;;  %v545_v14 = vld [vmem:[#allocation2 + $0x18] sm:$0xf]  ;;  %v823_v16 = vor.u32 %v822_v9, %v818_v5  ;;  %v7200_v49 = vld [vmem:[%s9266_s1 + $0x1a8] sm:$0xff] }
  0x5e   :  { %v5940_v15 = vld [vmem:[#allocation3 + $0x34] sm:$0xf0]  ;;  %v7931_v17 = vrot.slane %v826_v60, 5  ;;  %v398_v18 = vshrl.u32 %v329_v61, 16  ;;  %v404_v19 = vshll.u32 %v7928_v6, 16  ;;  %v599_v32 = vshrl.u32 %v545_v14, 16  ;;  %2748 = vmatpush.bf16.msra.mxu2 %v7200_v49 }
  0x5f   :  { %v819_v4 = vsel %vm7847_vm5, %v814_v10, %v818_v5  ;;  %v391_v20 = vor.u32 %v390_v11, %v7892_v27  ;;  %v396_v22 = vrot.slane %v394_v12, 5  ;;  %v546_v59 = vld [vmem:[#allocation2 + $0x1c] sm:$0xf]  ;;  %v741_v39 = vld [vmem:[#allocation2 + $0x18] sm:$0xf]  ;;  %v824_v26 = vrot.slane %v823_v16, 4 }
  0x60   :  { %968 = vst [vmem:[#allocation3 + $0x5c] sm:$0xf] %v819_v4  ;;  %v400_v28 = vrot.slane %v398_v18, 4  ;;  %v5943_v29 = vor.u32 %v7077_v8, %v5940_v15  ;;  %v7939_v31 = vrot.slane %v404_v19, 5  ;;  %v602_v37 = vshll.u32 %v545_v14, 16  ;;  %v7208_v57 = vld [vmem:[%s9266_s1 + $0x1e8] sm:$0xff] }
  0x61   :  { %v392_v30 = vrot.slane %v391_v20, 4  ;;  %v829_v35 = vsel %vm7847_vm5, %v824_v26, %v7931_v17  ;;  %v608_v27 = vshrl.u32 %v546_v59, 16  ;;  %v742_v38 = vld [vmem:[#allocation2 + $0x1c] sm:$0xf]  ;;  %757 = vst [vmem:[#allocation3 + $0xa0] sm:$0xf] %v741_v39  ;;  %2797 = vmatpush.bf16.msra.mxu3 %v7208_v57 }
  0x62   :  { %v401_v23 = vor.u32 %v400_v28, %v396_v22  ;;  %969 = vst [vmem:[#allocation3 + $0x80] sm:$0xf] %v829_v35  ;;  %v597_v40 = vrot.slane %v7907_v46, 4  ;;  %v601_v41 = vrot.slane %v599_v32, 7  ;;  %v611_v42 = vshll.u32 %v546_v59, 16  ;;  %v7216_v58 = vld [vmem:[%s9266_s1 + $0x228] sm:$0xff] }
  0x63   :  { %v397_v55 = vsel %vm7847_vm5, %v392_v30, %v396_v22  ;;  %v7947_v33 = vrot.slane %v608_v27, 7  ;;  %v774_v44 = vld [vmem:[#allocation2 + $0x1c] sm:$0xf]  ;;  %758 = vst [vmem:[#allocation3 + $0xc4] sm:$0xf] %v742_v38  ;;  %v830_v52 = vshrl.u32 %v7915_v50, 16  ;;  %2846 = vmatpush.bf16.msra.mxu0 %v7216_v58 }
  0x64   :  { %v402_v43 = vrot.slane %v401_v23, 4  ;;  %528 = vst [vmem:[#allocation3 + $0x98] sm:$0xf] %v397_v55  ;;  %v604_v45 = vor.u32 %v602_v37, %v601_v41  ;;  %v606_v47 = vrot.slane %v601_v41, 4  ;;  %v7956_v51 = vld [vmem:[#allocation2 + $0x20] sm:$0xf] }
  0x65   :  { %v613_v48 = vor.u32 %v611_v42, %v7947_v33  ;;  %v836_v53 = vshll.u32 %v774_v44, 16  ;;  %v331_v54 = vld [vmem:[#allocation2 + $0x20] sm:$0xf]  ;;  %v7967_v60 = vld [vmem:[#allocation2 + $0x24] sm:$0xf]  ;;  %v832_v61 = vrot.slane %v830_v52, 4 }
  0x66   :  { %2558 = vmatmul.bf16.vlgmr.msrb.gmra.mxu2 %v5931_v24  ;;  %v407_v46 = vsel %vm7847_vm5, %v402_v43, %v7939_v31  ;;  %v605_v56 = vsel %vm7617_vm2, %v597_v40, %v604_v45  ;;  %v840_v63 = vshrl.u32 %v774_v44, 16  ;;  %v7971_v0 = vld [vmem:[#allocation3 + $0x50] sm:$0xf]  ;;  %v846_v1 = vshll.u32 %v7956_v51, 16  ;;  %v7089_v3 = vld [vmem:[#allocation3 + $0x70] sm:$0xf0] }
  0x67   :  { %2607 = vmatmul.bf16.vlgmr.msrb.gmra.mxu3 %v5935_v25  ;;  %529 = vst [vmem:[#allocation3 + $0xbc] sm:$0xf] %v407_v46  ;;  %v614_v50 = vsel %vm7617_vm2, %v606_v47, %v613_v48  ;;  %v838_v62 = vrot.slane %v836_v53, 5  ;;  %v408_v2 = vshrl.u32 %v7928_v6, 16  ;;  %v833_v5 = vor.u32 %v832_v61, %v7931_v17  ;;  %v7085_v10 = vld [vmem:[#allocation3 + $0x54] sm:$0xf] }
  0x68   :  { %725 = vst [vmem:[#allocation3 + $0x9c] sm:$0xf] %v605_v56  ;;  %v842_v7 = vrot.slane %v840_v63, 4  ;;  %v414_v8 = vshll.u32 %v331_v54, 16  ;;  %v418_v9 = vshrl.u32 %v331_v54, 16  ;;  %v7976_v11 = vrot.slane %v846_v1, 5 }
  0x69   :  { %2705 = vmatmul.bf16.vlgmr.msrb.gmra.mxu1 %v5943_v29  ;;  %2656 = vmatmul.bf16.vlgmr.msrb.gmra.mxu0 %v5939_v13  ;;  %726 = vst [vmem:[#allocation3 + $0xc0] sm:$0xf] %v614_v50  ;;  %v410_v12 = vrot.slane %v408_v2, 4  ;;  %v424_v14 = vshll.u32 %v7967_v60, 16  ;;  %v5968_v15 = vld [vmem:[#allocation3 + $0x74] sm:$0xf0]  ;;  %v5967_v4 = vor.u32 %v7089_v3, %v7971_v0 }
  0x6a   :  { %v834_v16 = vrot.slane %v833_v5, 4  ;;  %v843_v18 = vor.u32 %v842_v7, %v838_v62  ;;  %v416_v19 = vrot.slane %v414_v8, 5  ;;  %v420_v13 = vrot.slane %v418_v9, 4  ;;  %v547_v17 = vld [vmem:[#allocation2 + $0x20] sm:$0xf] }
  0x6b   :  { %v411_v6 = vor.u32 %v410_v12, %v7939_v31  ;;  %v7981_v20 = vrot.slane %v424_v14, 5  ;;  %v548_v22 = vld [vmem:[#allocation2 + $0x24] sm:$0xf]  ;;  %v5974_v59 = vld [vmem:[#allocation3 + $0x58] sm:$0xf]  ;;  %v617_v30 = vshrl.u32 %v547_v17, 16  ;;  %v5971_v32 = vor.u32 %v7085_v10, %v5968_v15 }
  0x6c   :  { %v7090_v39 = vld [vmem:[#allocation3 + $0x78] sm:$0xf0]  ;;  %v5976_v25 = vld [vmem:[#allocation3 + $0x7c] sm:$0xf0]  ;;  %v839_v26 = vsel %vm7847_vm5, %v834_v16, %v838_v62  ;;  %v844_v28 = vrot.slane %v843_v18, 4  ;;  %v421_v29 = vor.u32 %v420_v13, %v416_v19  ;;  %v615_v23 = vrot.slane %v7947_v33, 4 }
  0x6d   :  { %v7086_v24 = vld [vmem:[#allocation3 + $0x5c] sm:$0xf]  ;;  %970 = vst [vmem:[#allocation3 + $0xa4] sm:$0xf] %v839_v26  ;;  %v412_v35 = vrot.slane %v411_v6, 4  ;;  %v620_v31 = vshll.u32 %v547_v17, 16  ;;  %v5975_v52 = vor.u32 %v7090_v39, %v5974_v59 }
  0x6e   :  { %v849_v37 = vsel %vm7847_vm5, %v844_v28, %v7976_v11  ;;  %v422_v27 = vrot.slane %v421_v29, 4  ;;  %v619_v38 = vrot.slane %v617_v30, 7  ;;  %v626_v55 = vshrl.u32 %v548_v22, 16  ;;  %v743_v40 = vld [vmem:[#allocation2 + $0x20] sm:$0xf] }
  0x6f   :  { %v5979_v41 = vor.u32 %v7086_v24, %v5976_v25  ;;  %971 = vst [vmem:[#allocation3 + $0xc8] sm:$0xf] %v849_v37  ;;  %v417_v42 = vsel %vm7847_vm5, %v412_v35, %v416_v19  ;;  %v629_v43 = vshll.u32 %v548_v22, 16  ;;  %v744_v44 = vld [vmem:[#allocation2 + $0x24] sm:$0xf]  ;;  %v850_v45 = vshrl.u32 %v7956_v51, 16 }
  0x70   :  { %v427_v33 = vsel %vm7847_vm5, %v422_v27, %v7981_v20  ;;  %530 = vst [vmem:[#allocation3 + $0xe0] sm:$0xf] %v417_v42  ;;  %v622_v47 = vor.u32 %v620_v31, %v619_v38  ;;  %v624_v49 = vrot.slane %v619_v38, 4  ;;  %v7995_v46 = vrot.slane %v626_v55, 7  ;;  %v776_v48 = vld [vmem:[#allocation2 + $0x24] sm:$0xf] }
  0x71   :  { %531 = vst [vmem:[#allocation3 + $0x104] sm:$0xf] %v427_v33  ;;  %v7997_v53 = vld [vmem:[#allocation2 + $0x28] sm:$0xf]  ;;  %v852_v54 = vrot.slane %v850_v45, 4  ;;  %v856_v56 = vshll.u32 %v776_v48, 16 }
  0x72   :  { %v623_v51 = vsel %vm7617_vm2, %v615_v23, %v622_v47  ;;  %v631_v57 = vor.u32 %v629_v43, %v7995_v46  ;;  %759 = vst [vmem:[#allocation3 + $0xe8] sm:$0xf] %v743_v40  ;;  %v860_v58 = vshrl.u32 %v776_v48, 16  ;;  %v866_v50 = vshll.u32 %v7997_v53, 16  ;;  %v7199_v61 = vld [vmem:[%s9266_s1 + $0x1a0] sm:$0xff] }
  0x73   :  { %727 = vst [vmem:[#allocation3 + $0xe4] sm:$0xf] %v623_v51  ;;  %v853_v62 = vor.u32 %v852_v54, %v7976_v11  ;;  %v858_v63 = vrot.slane %v856_v56, 5  ;;  %v333_v2 = vld [vmem:[#allocation2 + $0x28] sm:$0xf]  ;;  %2749 = vmatpush.bf16.msra.mxu2 %v7199_v61  ;;  %v7207_v3 = vld [vmem:[%s9266_s1 + $0x1e0] sm:$0xff] }
  0x74   :  { %v632_v0 = vsel %vm7617_vm2, %v624_v49, %v631_v57  ;;  %760 = vst [vmem:[#allocation3 + $0x10c] sm:$0xf] %v744_v44  ;;  %v862_v1 = vrot.slane %v860_v58, 4  ;;  %v7215_v5 = vld [vmem:[%s9266_s1 + $0x220] sm:$0xff]  ;;  %v428_v8 = vshrl.u32 %v7967_v60, 16  ;;  %v8016_v10 = vrot.slane %v866_v50, 5  ;;  %2798 = vmatpush.bf16.msra.mxu3 %v7207_v3 }
  0x75   :  { %728 = vst [vmem:[#allocation3 + $0x108] sm:$0xf] %v632_v0  ;;  %v854_v7 = vrot.slane %v853_v62, 4  ;;  %v8018_v11 = vld [vmem:[#allocation2 + $0x2c] sm:$0xf]  ;;  %2847 = vmatpush.bf16.msra.mxu0 %v7215_v5  ;;  %v434_v15 = vshll.u32 %v333_v2, 16 }
  0x76   :  { %2563 = vmatmul.bf16.gmra.mxu2 %v5967_v4  ;;  %v863_v9 = vor.u32 %v862_v1, %v858_v63  ;;  %v430_v14 = vrot.slane %v428_v8, 4  ;;  %v549_v16 = vld [vmem:[#allocation2 + $0x28] sm:$0xf]  ;;  %v8022_v18 = vld [vmem:[#allocation3 + $0xa0] sm:$0xf]  ;;  %v438_v60 = vshrl.u32 %v333_v2, 16 }
  0x77   :  { %2612 = vmatmul.bf16.gmra.mxu3 %v5971_v32  ;;  %v859_v12 = vsel %vm7847_vm5, %v854_v7, %v858_v63  ;;  %v8024_v19 = vld [vmem:[#allocation3 + $0xc0] sm:$0xf0]  ;;  %v6002_v4 = vld [vmem:[#allocation3 + $0x98] sm:$0xf]  ;;  %v7098_v6 = vld [vmem:[#allocation3 + $0xb8] sm:$0xf0] }
  0x78   :  { %v864_v13 = vrot.slane %v863_v9, 4  ;;  %972 = vst [vmem:[#allocation3 + $0xec] sm:$0xf] %v859_v12  ;;  %v7094_v17 = vld [vmem:[#allocation3 + $0x9c] sm:$0xf]  ;;  %v431_v59 = vor.u32 %v430_v14, %v7981_v20  ;;  %v436_v39 = vrot.slane %v434_v15, 5  ;;  %v6011_v55 = vor.u32 %v8024_v19, %v8022_v18 }
  0x79   :  { %2710 = vmatmul.bf16.gmra.mxu1 %v5979_v41  ;;  %2661 = vmatmul.bf16.gmra.mxu0 %v5975_v52  ;;  %v6004_v22 = vld [vmem:[#allocation3 + $0xbc] sm:$0xf0]  ;;  %v444_v24 = vshll.u32 %v8018_v11, 16  ;;  %v7095_v25 = vld [vmem:[#allocation3 + $0xa4] sm:$0xf]  ;;  %v440_v28 = vrot.slane %v438_v60, 4  ;;  %v6003_v44 = vor.u32 %v7098_v6, %v6002_v4 }
  0x7a   :  { %v869_v26 = vsel %vm7847_vm5, %v864_v13, %v8016_v10  ;;  %v550_v29 = vld [vmem:[#allocation2 + $0x2c] sm:$0xf]  ;;  %v635_v30 = vshrl.u32 %v549_v16, 16  ;;  %v6012_v32 = vld [vmem:[#allocation3 + $0xc4] sm:$0xf0]  ;;  %v432_v35 = vrot.slane %v431_v59, 4  ;;  %v6007_v45 = vor.u32 %v7094_v17, %v6004_v22 }
  0x7b   :  { %973 = vst [vmem:[#allocation3 + $0x110] sm:$0xf] %v869_v26  ;;  %v633_v23 = vrot.slane %v7995_v46, 4  ;;  %v441_v31 = vor.u32 %v440_v28, %v436_v39  ;;  %v8032_v37 = vrot.slane %v444_v24, 5  ;;  %v638_v27 = vshll.u32 %v549_v16, 16  ;;  %v7198_v5 = vld [vmem:[%s9266_s1 + $0x198] sm:$0xff] }
  0x7c   :  { %v637_v20 = vrot.slane %v635_v30, 7  ;;  %v745_v38 = vld [vmem:[#allocation2 + $0x28] sm:$0xf]  ;;  %v437_v40 = vsel %vm7847_vm5, %v432_v35, %v436_v39  ;;  %v644_v41 = vshrl.u32 %v550_v29, 16  ;;  %v647_v42 = vshll.u32 %v550_v29, 16  ;;  %2750 = vmatpush.bf16.msra.mxu2 %v7198_v5  ;;  %v7206_v15 = vld [vmem:[%s9266_s1 + $0x1d8] sm:$0xff] }
  0x7d   :  { %v746_v43 = vld [vmem:[#allocation2 + $0x2c] sm:$0xf]  ;;  %761 = vst [vmem:[#allocation3 + $0x130] sm:$0xf] %v745_v38  ;;  %v442_v33 = vrot.slane %v441_v31, 4  ;;  %v6015_v46 = vor.u32 %v7095_v25, %v6012_v32  ;;  %v870_v54 = vshrl.u32 %v7997_v53, 16  ;;  %2799 = vmatpush.bf16.msra.mxu3 %v7206_v15 }
  0x7e   :  { %532 = vst [vmem:[#allocation3 + $0x128] sm:$0xf] %v437_v40  ;;  %v640_v47 = vor.u32 %v638_v27, %v637_v20  ;;  %v778_v49 = vld [vmem:[#allocation2 + $0x2c] sm:$0xf]  ;;  %v642_v48 = vrot.slane %v637_v20, 4  ;;  %v8038_v52 = vrot.slane %v644_v41, 7 }
  0x7f   :  { %762 = vst [vmem:[#allocation3 + $0x154] sm:$0xf] %v746_v43  ;;  %v447_v56 = vsel %vm7847_vm5, %v442_v33, %v8032_v37  ;;  %v8046_v57 = vld [vmem:[#allocation2 + $0x30] sm:$0xf]  ;;  %v876_v58 = vshll.u32 %v778_v49, 16  ;;  %v880_v50 = vshrl.u32 %v778_v49, 16 }
  0x80   :  { %v641_v51 = vsel %vm7617_vm2, %v633_v23, %v640_v47  ;;  %v335_v61 = vld [vmem:[#allocation2 + $0x30] sm:$0xf]  ;;  %533 = vst [vmem:[#allocation3 + $0x14c] sm:$0xf] %v447_v56  ;;  %v649_v62 = vor.u32 %v647_v42, %v8038_v52  ;;  %v872_v63 = vrot.slane %v870_v54, 4  ;;  %v886_v0 = vshll.u32 %v8046_v57, 16 }
  0x81   :  { %v448_v53 = vshrl.u32 %v8018_v11, 16  ;;  %729 = vst [vmem:[#allocation3 + $0x12c] sm:$0xf] %v641_v51  ;;  %v878_v1 = vrot.slane %v876_v58, 5  ;;  %v882_v2 = vrot.slane %v880_v50, 4  ;;  %v454_v14 = vshll.u32 %v335_v61, 16 }
  0x82   :  { %v650_v3 = vsel %vm7617_vm2, %v642_v48, %v649_v62  ;;  %v873_v7 = vor.u32 %v872_v63, %v8016_v10  ;;  %v8057_v8 = vld [vmem:[#allocation2 + $0x34] sm:$0xf]  ;;  %v8059_v11 = vrot.slane %v886_v0, 5  ;;  %v458_v18 = vshrl.u32 %v335_v61, 16  ;;  %v551_v4 = vld [vmem:[#allocation2 + $0x30] sm:$0xf] }
  0x83   :  { %730 = vst [vmem:[#allocation3 + $0x150] sm:$0xf] %v650_v3  ;;  %v883_v9 = vor.u32 %v882_v2, %v878_v1  ;;  %v450_v12 = vrot.slane %v448_v53, 4  ;;  %v464_v19 = vshll.u32 %v8057_v8, 16  ;;  %v456_v60 = vrot.slane %v454_v14, 5  ;;  %v7214_v47 = vld [vmem:[%s9266_s1 + $0x218] sm:$0xff] }
  0x84   :  { %v874_v16 = vrot.slane %v873_v7, 4  ;;  %v460_v17 = vrot.slane %v458_v18, 4  ;;  %v552_v22 = vld [vmem:[#allocation2 + $0x34] sm:$0xf]  ;;  %v6040_v25 = vld [vmem:[#allocation3 + $0x104] sm:$0xf0]  ;;  %2848 = vmatpush.bf16.msra.mxu0 %v7214_v47 }
  0x85   :  { %v884_v10 = vrot.slane %v883_v9, 4  ;;  %v451_v13 = vor.u32 %v450_v12, %v8032_v37  ;;  %v7103_v24 = vld [vmem:[#allocation3 + $0xe4] sm:$0xf]  ;;  %v8071_v28 = vrot.slane %v464_v19, 5  ;;  %v653_v29 = vshrl.u32 %v551_v4, 16 }
  0x86   :  { %2568 = vmatmul.bf16.gmra.mxu2 %v6003_v44  ;;  %v879_v6 = vsel %vm7847_vm5, %v874_v16, %v878_v1  ;;  %v461_v26 = vor.u32 %v460_v17, %v456_v60  ;;  %v656_v30 = vshll.u32 %v551_v4, 16  ;;  %v6038_v32 = vld [vmem:[#allocation3 + $0xe0] sm:$0xf]  ;;  %v7107_v35 = vld [vmem:[#allocation3 + $0x100] sm:$0xf0]  ;;  %v662_v20 = vshrl.u32 %v552_v22, 16 }
  0x87   :  { %2617 = vmatmul.bf16.gmra.mxu3 %v6007_v45  ;;  %v889_v59 = vsel %vm7847_vm5, %v884_v10, %v8059_v11  ;;  %974 = vst [vmem:[#allocation3 + $0x134] sm:$0xf] %v879_v6  ;;  %v452_v39 = vrot.slane %v451_v13, 4  ;;  %v7104_v23 = vld [vmem:[#allocation3 + $0xec] sm:$0xf]  ;;  %v665_v27 = vshll.u32 %v552_v22, 16  ;;  %v6043_v54 = vor.u32 %v7103_v24, %v6040_v25 }
  0x88   :  { %975 = vst [vmem:[#allocation3 + $0x158] sm:$0xf] %v889_v59  ;;  %v6048_v31 = vld [vmem:[#allocation3 + $0x10c] sm:$0xf0]  ;;  %v747_v38 = vld [vmem:[#allocation2 + $0x30] sm:$0xf] }
  0x89   :  { %2715 = vmatmul.bf16.gmra.mxu1 %v6015_v46  ;;  %2666 = vmatmul.bf16.gmra.mxu0 %v6011_v55  ;;  %v457_v37 = vsel %vm7847_vm5, %v452_v39, %v456_v60  ;;  %v748_v55 = vld [vmem:[#allocation2 + $0x34] sm:$0xf]  ;;  %v462_v40 = vrot.slane %v461_v26, 4  ;;  %v651_v41 = vrot.slane %v8038_v52, 4  ;;  %v655_v42 = vrot.slane %v653_v29, 7 }
  0x8a   :  { %534 = vst [vmem:[#allocation3 + $0x170] sm:$0xf] %v457_v37  ;;  %v6046_v43 = vld [vmem:[#allocation3 + $0xe8] sm:$0xf]  ;;  %v8076_v44 = vrot.slane %v662_v20, 7  ;;  %v890_v33 = vshrl.u32 %v8046_v57, 16  ;;  %v6039_v57 = vor.u32 %v7107_v35, %v6038_v32  ;;  %v6051_v61 = vor.u32 %v7104_v23, %v6048_v31 }
  0x8b   :  { %763 = vst [vmem:[#allocation3 + $0x178] sm:$0xf] %v747_v38  ;;  %v780_v45 = vld [vmem:[#allocation2 + $0x34] sm:$0xf]  ;;  %v467_v49 = vsel %vm7847_vm5, %v462_v40, %v8071_v28  ;;  %v658_v46 = vor.u32 %v656_v30, %v655_v42  ;;  %v660_v48 = vrot.slane %v655_v42, 4  ;;  %v468_v9 = vshrl.u32 %v8057_v8, 16 }
  0x8c   :  { %764 = vst [vmem:[#allocation3 + $0x19c] sm:$0xf] %v748_v55  ;;  %v896_v52 = vshll.u32 %v780_v45, 16  ;;  %v7108_v56 = vld [vmem:[#allocation3 + $0x108] sm:$0xf0]  ;;  %v667_v51 = vor.u32 %v665_v27, %v8076_v44  ;;  %v892_v58 = vrot.slane %v890_v33, 4 }
  0x8d   :  { %535 = vst [vmem:[#allocation3 + $0x194] sm:$0xf] %v467_v49  ;;  %v900_v50 = vshrl.u32 %v780_v45, 16  ;;  %v659_v62 = vsel %vm7617_vm2, %v651_v41, %v658_v46  ;;  %v8088_v63 = vld [vmem:[#allocation2 + $0x38] sm:$0xf]  ;;  %v6047_v5 = vor.u32 %v7108_v56, %v6046_v43  ;;  %v7197_v18 = vld [vmem:[%s9266_s1 + $0x190] sm:$0xff] }
  0x8e   :  { %v898_v0 = vrot.slane %v896_v52, 5  ;;  %v668_v53 = vsel %vm7617_vm2, %v660_v48, %v667_v51  ;;  %731 = vst [vmem:[#allocation3 + $0x174] sm:$0xf] %v659_v62  ;;  %v893_v1 = vor.u32 %v892_v58, %v8059_v11  ;;  %v906_v3 = vshll.u32 %v8088_v63, 16  ;;  %v337_v7 = vld [vmem:[#allocation2 + $0x38] sm:$0xf]  ;;  %2751 = vmatpush.bf16.msra.mxu2 %v7197_v18 }
  0x8f   :  { %v902_v2 = vrot.slane %v900_v50, 4  ;;  %732 = vst [vmem:[#allocation3 + $0x198] sm:$0xf] %v668_v53  ;;  %v474_v16 = vshll.u32 %v337_v7, 16  ;;  %v8100_v11 = vld [vmem:[#allocation2 + $0x3c] sm:$0xf] }
  0x90   :  { %v894_v12 = vrot.slane %v893_v1, 4  ;;  %v8095_v15 = vrot.slane %v906_v3, 5  ;;  %v470_v19 = vrot.slane %v468_v9, 4  ;;  %v478_v60 = vshrl.u32 %v337_v7, 16  ;;  %v7205_v4 = vld [vmem:[%s9266_s1 + $0x1d0] sm:$0xff] }
  0x91   :  { %v903_v14 = vor.u32 %v902_v2, %v898_v0  ;;  %v476_v8 = vrot.slane %v474_v16, 5  ;;  %v484_v17 = vshll.u32 %v8100_v11, 16  ;;  %v553_v39 = vld [vmem:[#allocation2 + $0x38] sm:$0xf]  ;;  %v554_v24 = vld [vmem:[#allocation2 + $0x3c] sm:$0xf]  ;;  %2800 = vmatpush.bf16.msra.mxu3 %v7205_v4 }
  0x92   :  { %v899_v10 = vsel %vm7847_vm5, %v894_v12, %v898_v0  ;;  %v471_v6 = vor.u32 %v470_v19, %v8071_v28  ;;  %v480_v59 = vrot.slane %v478_v60, 4  ;;  %v671_v30 = vshrl.u32 %v553_v39, 16  ;;  %v7112_v23 = vld [vmem:[#allocation3 + $0x12c] sm:$0xf]  ;;  %v6076_v28 = vld [vmem:[#allocation3 + $0x14c] sm:$0xf0] }
  0x93   :  { %v904_v13 = vrot.slane %v903_v14, 4  ;;  %976 = vst [vmem:[#allocation3 + $0x17c] sm:$0xf] %v899_v10  ;;  %v8112_v26 = vrot.slane %v484_v17, 5  ;;  %v674_v32 = vshll.u32 %v553_v39, 16  ;;  %v680_v35 = vshrl.u32 %v554_v24, 16 }
  0x94   :  { %v472_v25 = vrot.slane %v471_v6, 4  ;;  %v481_v29 = vor.u32 %v480_v59, %v476_v8  ;;  %v683_v37 = vshll.u32 %v554_v24, 16  ;;  %v6074_v20 = vld [vmem:[#allocation3 + $0x128] sm:$0xf]  ;;  %v7116_v27 = vld [vmem:[#allocation3 + $0x148] sm:$0xf0] }
  0x95   :  { %v909_v22 = vsel %vm7847_vm5, %v904_v13, %v8095_v15  ;;  %v669_v55 = vrot.slane %v8076_v44, 4  ;;  %v673_v40 = vrot.slane %v671_v30, 7  ;;  %v8117_v41 = vrot.slane %v680_v35, 7  ;;  %v6082_v42 = vld [vmem:[#allocation3 + $0x130] sm:$0xf]  ;;  %v7213_v44 = vld [vmem:[%s9266_s1 + $0x210] sm:$0xff] }
  0x96   :  { %2573 = vmatmul.bf16.gmra.mxu2 %v6039_v57  ;;  %977 = vst [vmem:[#allocation3 + $0x1a0] sm:$0xf] %v909_v22  ;;  %v477_v31 = vsel %vm7847_vm5, %v472_v25, %v476_v8  ;;  %v482_v38 = vrot.slane %v481_v29, 4  ;;  %v7117_v43 = vld [vmem:[#allocation3 + $0x150] sm:$0xf0]  ;;  %v910_v51 = vshrl.u32 %v8088_v63, 16  ;;  %v6079_v57 = vor.u32 %v7112_v23, %v6076_v28  ;;  %2849 = vmatpush.bf16.msra.mxu0 %v7213_v44 }
  0x97   :  { %2622 = vmatmul.bf16.gmra.mxu3 %v6043_v54  ;;  %536 = vst [vmem:[#allocation3 + $0x1b8] sm:$0xf] %v477_v31  ;;  %v7113_v45 = vld [vmem:[#allocation3 + $0x134] sm:$0xf]  ;;  %v749_v33 = vld [vmem:[#allocation2 + $0x38] sm:$0xf]  ;;  %v676_v52 = vor.u32 %v674_v32, %v673_v40  ;;  %v685_v56 = vor.u32 %v683_v37, %v8117_v41  ;;  %v6075_v0 = vor.u32 %v7116_v27, %v6074_v20 }
  0x98   :  { %v750_v47 = vld [vmem:[#allocation2 + $0x3c] sm:$0xf]  ;;  %v6084_v46 = vld [vmem:[#allocation3 + $0x154] sm:$0xf0]  ;;  %v487_v48 = vsel %vm7847_vm5, %v482_v38, %v8112_v26  ;;  %v678_v54 = vrot.slane %v673_v40, 4  ;;  %v912_v1 = vrot.slane %v910_v51, 4  ;;  %v6083_v3 = vor.u32 %v7117_v43, %v6082_v42 }
  0x99   :  { %2720 = vmatmul.bf16.gmra.mxu1 %v6051_v61  ;;  %2671 = vmatmul.bf16.gmra.mxu0 %v6047_v5  ;;  %v782_v49 = vld [vmem:[#allocation2 + $0x3c] sm:$0xf]  ;;  %765 = vst [vmem:[#allocation3 + $0x1c0] sm:$0xf] %v749_v33  ;;  %v677_v61 = vsel %vm7617_vm2, %v669_v55, %v676_v52  ;;  %v8131_v53 = vld [vmem:[#allocation2 + $0x40] sm:$0xf]  ;;  %v6087_v5 = vor.u32 %v7113_v45, %v6084_v46 }
  0x9a   :  { %537 = vst [vmem:[#allocation3 + $0x1dc] sm:$0xf] %v487_v48  ;;  %v916_v58 = vshll.u32 %v782_v49, 16  ;;  %v920_v50 = vshrl.u32 %v782_v49, 16  ;;  %v686_v62 = vsel %vm7617_vm2, %v678_v54, %v685_v56  ;;  %v926_v7 = vshll.u32 %v8131_v53, 16  ;;  %v7196_v6 = vld [vmem:[%s9266_s1 + $0x188] sm:$0xff] }
  0x9b   :  { %766 = vst [vmem:[#allocation3 + $0x1e4] sm:$0xf] %v750_v47  ;;  %v339_v9 = vld [vmem:[#allocation2 + $0x40] sm:$0xf]  ;;  %v913_v16 = vor.u32 %v912_v1, %v8095_v15  ;;  %v488_v18 = vshrl.u32 %v8100_v11, 16  ;;  %2752 = vmatpush.bf16.msra.mxu2 %v7196_v6  ;;  %v7204_v29 = vld [vmem:[%s9266_s1 + $0x1c8] sm:$0xff] }
  0x9c   :  { %733 = vst [vmem:[#allocation3 + $0x1bc] sm:$0xf] %v677_v61  ;;  %v918_v2 = vrot.slane %v916_v58, 5  ;;  %v922_v63 = vrot.slane %v920_v50, 4  ;;  %v8137_v12 = vld [vmem:[%s9267_s2] ss:$0 sm:$0xff]  ;;  %2801 = vmatpush.bf16.msra.mxu3 %v7204_v29 }
  0x9d   :  { %734 = vst [vmem:[#allocation3 + $0x1e0] sm:$0xf] %v686_v62  ;;  %v494_v19 = vshll.u32 %v339_v9, 16  ;;  %v498_v10 = vshrl.u32 %v339_v9, 16  ;;  %v8141_v60 = vrot.slane %v926_v7, 5  ;;  %v914_v17 = vrot.slane %v913_v16, 4 }
  0x9e   :  { %v923_v8 = vor.u32 %v922_v63, %v918_v2  ;;  %v340_v22 = vld [vmem:[#allocation2 + $0x44] sm:$0x1]  ;;  %v490_v59 = vrot.slane %v488_v18, 4  ;;  %v555_v35 = vld [vmem:[#allocation2 + $0x40] sm:$0xf]  ;;  %v687_v51 = vrot.slane %v8117_v41, 4 }
  0x9f   :  { %v496_v11 = vrot.slane %v494_v19, 5  ;;  %v500_v39 = vrot.slane %v498_v10, 4  ;;  %v919_v30 = vsel %vm7847_vm5, %v914_v17, %v918_v2  ;;  %v504_v32 = vshll.u32 %v340_v22, 16  ;;  %v556_v20 = vld [vmem:[#allocation2 + $0x44] sm:$0xf]  ;;  %v7212_v41 = vld [vmem:[%s9266_s1 + $0x208] sm:$0xff] }
  0xa0   :  { %v924_v15 = vrot.slane %v923_v8, 4  ;;  %978 = vst [vmem:[#allocation3 + $0x1c4] sm:$0xf] %v919_v30  ;;  %v491_v31 = vor.u32 %v490_v59, %v8112_v26  ;;  %v689_v42 = vshrl.u32 %v555_v35, 16  ;;  %v7121_v33 = vld [vmem:[#allocation3 + $0x174] sm:$0xf]  ;;  %2850 = vmatpush.bf16.msra.mxu0 %v7212_v41 }
  0xa1   :  { %v501_v37 = vor.u32 %v500_v39, %v496_v11  ;;  %v506_v38 = vrot.slane %v504_v32, 5  ;;  %v6112_v47 = vld [vmem:[#allocation3 + $0x194] sm:$0xf0]  ;;  %v692_v49 = vshll.u32 %v555_v35, 16  ;;  %v698_v46 = vshrl.u32 %v556_v20, 16 }
  0xa2   :  { %v929_v28 = vsel %vm7847_vm5, %v924_v15, %v8141_v60  ;;  %v492_v55 = vrot.slane %v491_v31, 4  ;;  %v701_v48 = vshll.u32 %v556_v20, 16  ;;  %v6110_v52 = vld [vmem:[#allocation3 + $0x170] sm:$0xf]  ;;  %v7125_v54 = vld [vmem:[#allocation3 + $0x190] sm:$0xf0]  ;;  %v6115_v19 = vor.u32 %v7121_v33, %v6112_v47 }
  0xa3   :  { %979 = vst [vmem:[#allocation3 + $0x1e8] sm:$0xf] %v929_v28  ;;  %v502_v40 = vrot.slane %v501_v37, 4  ;;  %v691_v58 = vrot.slane %v689_v42, 7  ;;  %v751_v50 = vld [vmem:[#allocation2 + $0x40] sm:$0xf]  ;;  %v6111_v6 = vor.u32 %v7125_v54, %v6110_v52 }
  0xa4   :  { %v497_v56 = vsel %vm7847_vm5, %v492_v55, %v496_v11  ;;  %v7122_v61 = vld [vmem:[#allocation3 + $0x17c] sm:$0xf]  ;;  %v700_v62 = vrot.slane %v698_v46, 7  ;;  %v6118_v1 = vld [vmem:[#allocation3 + $0x178] sm:$0xf]  ;;  %v2909_v55 = vld [vmem:[%s9270_s5] sm:$0xff] }
  0xa5   :  { %v507_v44 = vsel %vm7847_vm5, %v502_v40, %v506_v38  ;;  %538 = vst [vmem:[#allocation3 + $0x200] sm:$0xf] %v497_v56  ;;  %v694_v2 = vor.u32 %v692_v49, %v691_v58  ;;  %v6120_v9 = vld [vmem:[#allocation3 + $0x19c] sm:$0xf0]  ;;  %v7126_v10 = vld [vmem:[#allocation3 + $0x198] sm:$0xf0]  ;;  %2927 = vperm.xlu0 %7479, %v2909_v55  }
  0xa6   :  { %v2510_v14 = vpop.f32.mrf.mxu1  ;;  %v2461_v13 = vpop.f32.mrf.mxu0  ;;  %2578 = vmatmul.bf16.gmra.mxu2 %v6075_v0  ;;  %v784_v0 = vld [vmem:[#allocation2 + $0x44] sm:$0xf]  ;;  %539 = vst [vmem:[#allocation3 + $0x224] sm:$0xf] %v507_v44  ;;  %v785_v22 = vld [vmem:[#allocation2 + $0x48] sm:$0x1]  ;;  %v6123_v59 = vor.u32 %v7122_v61, %v6120_v9  ;;  %v6119_v30 = vor.u32 %v7126_v10, %v6118_v1 }
  0xa7   :  { %2627 = vmatmul.bf16.gmra.mxu3 %v6079_v57  ;;  %v2462_v4 = vadd.f32 %v8137_v12, %v2461_v13  ;;  %v752_v57 = vld [vmem:[#allocation2 + $0x44] sm:$0xf]  ;;  %v936_v63 = vshll.u32 %v784_v0, 16  ;;  %767 = vst [vmem:[#allocation3 + $0x208] sm:$0xf] %v751_v50  ;;  %v940_v16 = vshrl.u32 %v784_v0, 16  ;;  %v695_v13 = vsel %vm7617_vm2, %v687_v51, %v694_v2 }
  0xa8   :  { %768 = vst [vmem:[#allocation3 + $0x22c] sm:$0xf] %v752_v57  ;;  %v946_v39 = vshll.u32 %v785_v22, 16  ;;  %v983_v35 = vld [vmem:[#allocation2 + $0xc] sm:$0xf]  ;;  %v7203_v54 = vld [vmem:[%s9266_s1 + $0x1c0] sm:$0xff] }
  0xa9   :  { %2725 = vmatmul.bf16.gmra.mxu1 %v6087_v5  ;;  %v8147_v24 = vadd.f32 %v2510_v14, %v2462_v4  ;;  %2676 = vmatmul.bf16.gmra.mxu0 %v6083_v3  ;;  %v2481_v23 = vpop.f32.mrf.mxu2  ;;  %v696_v3 = vrot.slane %v691_v58, 4  ;;  %v930_v5 = vshrl.u32 %v8131_v53, 16  ;;  %v703_v14 = vor.u32 %v701_v48, %v700_v62  ;;  %735 = vst [vmem:[#allocation3 + $0x204] sm:$0xf] %v695_v13  ;;  %v1211_v42 = vld [vmem:[#allocation2 + $0xc] sm:$0xf] }
  0xaa   :  { %v2530_v25 = vpop.f32.mrf.mxu3  ;;  %v2482_v27 = vadd.f32 %v8137_v12, %v2481_v23  ;;  %v938_v4 = vrot.slane %v936_v63, 5  ;;  %v942_v15 = vrot.slane %v940_v16, 4  ;;  %v984_v23 = vld [vmem:[#allocation2 + $0x10] sm:$0xf]  ;;  %v948_v37 = vrot.slane %v946_v39, 5  ;;  %2802 = vmatpush.bf16.msra.mxu3 %v7203_v54 }
  0xab   :  { %v932_v8 = vrot.slane %v930_v5, 4  ;;  %v704_v17 = vsel %vm7617_vm2, %v696_v3, %v703_v14  ;;  %v1005_v20 = vshrl.u32 %v983_v35, 16  ;;  %v982_v47 = vld [vmem:[#allocation2 + $0x8] sm:$0x8]  ;;  %v1008_v46 = vshll.u32 %v983_v35, 16 }
  0xac   :  { %v8159_v43 = vadd.f32 %v2530_v25, %v2482_v27  ;;  %736 = vst [vmem:[#allocation3 + $0x228] sm:$0xf] %v704_v17  ;;  %v943_v32 = vor.u32 %v942_v15, %v938_v4  ;;  %v1014_v27 = vshrl.u32 %v984_v23, 16  ;;  %v1000_v44 = vshrl.u32 %v982_v47, 16  ;;  %v1212_v2 = vld [vmem:[#allocation2 + $0x10] sm:$0xf] }
  0xad   :  { %v933_v11 = vor.u32 %v932_v8, %v8141_v60  ;;  %v7195_v60 = vld [vmem:[%s9266_s1 + $0x180] sm:$0xff]  ;;  %v1007_v49 = vrot.slane %v1005_v20, 7  ;;  %v1229_v57 = vshrl.u32 %v1211_v42, 16  ;;  %v1017_v1 = vshll.u32 %v984_v23, 16  ;;  %v1179_v3 = vld [vmem:[#allocation2 + $0xc] sm:$0xf] }
  0xae   :  { %v8161_v45 = vpop.f32.mrf.mxu1  ;;  %v8163_v26 = vpop.f32.mrf.mxu0  ;;  %v944_v40 = vrot.slane %v943_v32, 4  ;;  %2753 = vmatpush.bf16.msra.mxu2 %v7195_v60  ;;  %v8198_v50 = vrot.slane %v1014_v27, 7  ;;  %v5919_v62 = vrot.slane %v1000_v44, 11  ;;  %v1180_v5 = vld [vmem:[#allocation2 + $0x10] sm:$0xf]  ;;  %v1232_v13 = vshll.u32 %v1211_v42, 16 }
  0xaf   :  { %v934_v31 = vrot.slane %v933_v11, 4  ;;  %v1010_v58 = vor.u32 %v1008_v46, %v1007_v49  ;;  %v1012_v0 = vrot.slane %v1007_v49, 4  ;;  %v8201_v63 = vld [vmem:[#allocation2 + $0x14] sm:$0xf]  ;;  %v7130_v41 = vld [vmem:[#allocation3 + $0x1bc] sm:$0xf] }
  0xb0   :  { %v949_v56 = vsel %vm7847_vm5, %v944_v40, %v948_v37  ;;  %v1019_v16 = vor.u32 %v1017_v1, %v8198_v50  ;;  %1195 = vst [vmem:[#allocation3 + $0x1c] sm:$0xf] %v1179_v3  ;;  %v1231_v10 = vrot.slane %v1229_v57, 4  ;;  %v1238_v8 = vshll.u32 %v1212_v2, 16  ;;  %v7134_v15 = vld [vmem:[#allocation3 + $0x1d8] sm:$0xf0] }
  0xb1   :  { %v2483_v18 = vpop.f32.mrf.mxu2  ;;  %v939_v33 = vsel %vm7847_vm5, %v934_v31, %v938_v4  ;;  %981 = vst [vmem:[#allocation3 + $0x230] sm:$0xf] %v949_v56  ;;  %v1011_v14 = vsel %vm7617_vm2, %v5919_v62, %v1010_v58  ;;  %v1242_v4 = vshrl.u32 %v1212_v2, 16  ;;  %v1248_v22 = vshll.u32 %v8201_v63, 16  ;;  %v7211_v32 = vld [vmem:[%s9266_s1 + $0x200] sm:$0xff] }
  0xb2   :  { %v2532_v7 = vpop.f32.mrf.mxu3  ;;  %v2484_v53 = vadd.f32 %v8137_v12, %v2483_v18  ;;  %980 = vst [vmem:[#allocation3 + $0x20c] sm:$0xf] %v939_v33  ;;  %v1020_v17 = vsel %vm7617_vm2, %v1012_v0, %v1019_v16  ;;  %v1240_v11 = vrot.slane %v1238_v8, 5  ;;  %v6154_v31 = vld [vmem:[#allocation3 + $0x1c0] sm:$0xf]  ;;  %2851 = vmatpush.bf16.msra.mxu0 %v7211_v32  ;;  %v1252_v58 = vshrl.u32 %v8201_v63, 16 }
  0xb3   :  { %1163 = vst [vmem:[#allocation3 + $0x18] sm:$0xf] %v1011_v14  ;;  %v1244_v35 = vrot.slane %v1242_v4, 4  ;;  %v7135_v37 = vld [vmem:[#allocation3 + $0x1e0] sm:$0xf0]  ;;  %v1250_v55 = vrot.slane %v1248_v22, 5 }
  0xb4   :  { %v8180_v25 = vadd.f32 %v2532_v7, %v2484_v53  ;;  %v6148_v53 = vld [vmem:[#allocation3 + $0x1dc] sm:$0xf0]  ;;  %1196 = vst [vmem:[#allocation3 + $0x40] sm:$0xf] %v1180_v5  ;;  %v6155_v49 = vor.u32 %v7135_v37, %v6154_v31  ;;  %v986_v44 = vld [vmem:[#allocation2 + $0x18] sm:$0xf] }
  0xb5   :  { %1164 = vst [vmem:[#allocation3 + $0x3c] sm:$0xf] %v1020_v17  ;;  %v1245_v60 = vor.u32 %v1244_v35, %v1240_v11  ;;  %v1032_v0 = vshrl.u32 %v986_v44, 16  ;;  %v1035_v3 = vshll.u32 %v986_v44, 16  ;;  %v1214_v14 = vld [vmem:[#allocation2 + $0x18] sm:$0xf] }
  0xb6   :  { %v2515_v29 = vpop.f32.mrf.mxu1  ;;  %v2466_v28 = vpop.f32.mrf.mxu0  ;;  %2583 = vmatmul.bf16.gmra.mxu2 %v6111_v6  ;;  %v2910_v6 = vld [vmem:[%s9270_s5 + $0x8] sm:$0xff]  ;;  %v8237_v16 = vld [vmem:[#allocation2 + $0x1c] sm:$0xf]  ;;  %v1182_v32 = vld [vmem:[#allocation2 + $0x18] sm:$0xf] }
  0xb7   :  { %2632 = vmatmul.bf16.gmra.mxu3 %v6115_v19  ;;  %v2467_v38 = vadd.f32 %v8137_v12, %v2466_v28  ;;  %v6146_v19 = vld [vmem:[#allocation3 + $0x1b8] sm:$0xf]  ;;  %2932 = vperm.xlu0 %7479, %v2910_v6   ;;  %v6151_v28 = vor.u32 %v7130_v41, %v6148_v53  ;;  %v1246_v46 = vrot.slane %v1245_v60, 4  ;;  %v8235_v41 = vrot.slane %v1032_v0, 7  ;;  %v6182_v37 = vld [vmem:[#allocation3 + $0x200] sm:$0xf] }
  0xb8   :  { %v1258_v53 = vshll.u32 %v1214_v14, 16  ;;  %v6184_v60 = vld [vmem:[#allocation3 + $0x224] sm:$0xf0]  ;;  %1198 = vst [vmem:[#allocation3 + $0x88] sm:$0xf] %v1182_v32 }
  0xb9   :  { %2730 = vmatmul.bf16.gmra.mxu1 %v6123_v59  ;;  %v8191_v48 = vadd.f32 %v2515_v29, %v2467_v38  ;;  %2681 = vmatmul.bf16.gmra.mxu0 %v6119_v30  ;;  %v2486_v51 = vpop.f32.mrf.mxu2  ;;  %v1234_v59 = vrot.slane %v1232_v13, 5  ;;  %v7131_v29 = vld [vmem:[#allocation3 + $0x1c4] sm:$0xf]  ;;  %v6156_v30 = vld [vmem:[#allocation3 + $0x1e4] sm:$0xf0]  ;;  %v6147_v38 = vor.u32 %v7134_v15, %v6146_v19  ;;  %v1251_v62 = vsel %vm7847_vm5, %v1246_v46, %v1250_v55 }
  0xba   :  { %v2535_v52 = vpop.f32.mrf.mxu3  ;;  %v2487_v61 = vadd.f32 %v8137_v12, %v2486_v51  ;;  %v6159_v40 = vor.u32 %v7131_v29, %v6156_v30  ;;  %1409 = vst [vmem:[#allocation3 + $0x44] sm:$0xf] %v1251_v62  ;;  %v1254_v19 = vrot.slane %v1252_v58, 4  ;;  %v1021_v13 = vrot.slane %v8198_v50, 4  ;;  %v7144_v58 = vld [vmem:[#allocation3 + $0x228] sm:$0xf0] }
  0xbb   :  { %v1235_v20 = vor.u32 %v1234_v59, %v1231_v10  ;;  %v1037_v17 = vor.u32 %v1035_v3, %v8235_v41  ;;  %v1262_v15 = vshrl.u32 %v1214_v14, 16  ;;  %v1268_v29 = vshll.u32 %v8237_v16, 16  ;;  %v987_v3 = vld [vmem:[#allocation2 + $0x1c] sm:$0xf]  ;;  %v8281_v32 = vld [vmem:[#allocation2 + $0x24] sm:$0xf] }
  0xbc   :  { %v8203_v7 = vadd.f32 %v2535_v52, %v2487_v61  ;;  %v985_v52 = vld [vmem:[#allocation2 + $0x14] sm:$0xf]  ;;  %v1255_v22 = vor.u32 %v1254_v19, %v1250_v55  ;;  %v1041_v19 = vshrl.u32 %v987_v3, 16 }
  0xbd   :  { %v1236_v42 = vrot.slane %v1235_v20, 4  ;;  %v1023_v51 = vshrl.u32 %v985_v52, 16  ;;  %v2915_v61 = vld [vmem:[%s9270_s5 + $0x30] sm:$0xff]  ;;  %v1026_v2 = vshll.u32 %v985_v52, 16  ;;  %v6192_v52 = vld [vmem:[#allocation3 + $0x22c] sm:$0xf0] }
  0xbe   :  { %v8205_v9 = vpop.f32.mrf.mxu1  ;;  %v8210_v18 = vpop.f32.mrf.mxu0  ;;  %v1256_v35 = vrot.slane %v1255_v22, 4  ;;  %v7139_v20 = vld [vmem:[#allocation3 + $0x204] sm:$0xf] }
  0xbf   :  { %v1241_v56 = vsel %vm7847_vm5, %v1236_v42, %v1240_v11  ;;  %2957 = vperm.xlu0 %7479, %v2915_v61   ;;  %v1025_v1 = vrot.slane %v1023_v51, 7  ;;  %v1181_v11 = vld [vmem:[#allocation2 + $0x14] sm:$0xf]  ;;  %v8261_v42 = vrot.slane %v1268_v29, 5  ;;  %v6187_v44 = vor.u32 %v7139_v20, %v6184_v60  ;;  %v6190_v51 = vld [vmem:[#allocation3 + $0x208] sm:$0xf] }
  0xc0   :  { %1408 = vst [vmem:[#allocation3 + $0x20] sm:$0xf] %v1241_v56 }
  0xc1   :  { %v2488_v23 = vpop.f32.mrf.mxu2  ;;  %v1028_v8 = vor.u32 %v1026_v2, %v1025_v1  ;;  %v1030_v4 = vrot.slane %v1025_v1, 4  ;;  %1197 = vst [vmem:[#allocation3 + $0x64] sm:$0xf] %v1181_v11  ;;  %v6191_v2 = vor.u32 %v7144_v58, %v6190_v51 }
  0xc2   :  { %v2537_v39 = vpop.f32.mrf.mxu3  ;;  %v2489_v27 = vadd.f32 %v8137_v12, %v2488_v23  ;;  %v1264_v23 = vrot.slane %v1262_v15, 4  ;;  %v1043_v15 = vrot.slane %v1041_v19, 7 }
  0xc3   :  { %v1029_v59 = vsel %vm7617_vm2, %v1021_v13, %v1028_v8  ;;  %v1038_v50 = vsel %vm7617_vm2, %v1030_v4, %v1037_v17  ;;  %v1216_v13 = vld [vmem:[#allocation2 + $0x20] sm:$0xf]  ;;  %v2912_v4 = vld [vmem:[%s9270_s5 + $0x18] sm:$0xff] }
  0xc4   :  { %v8222_v33 = vadd.f32 %v2537_v39, %v2489_v27  ;;  %v1260_v39 = vrot.slane %v1258_v53, 5  ;;  %1165 = vst [vmem:[#allocation3 + $0x60] sm:$0xf] %v1029_v59  ;;  %v2911_v27 = vld [vmem:[%s9270_s5 + $0x10] sm:$0xff]  ;;  %v2921_v53 = vld [vmem:[%s9270_s5 + $0x60] sm:$0xff]  ;;  %v1278_v17 = vshll.u32 %v1216_v13, 16 }
  0xc5   :  { %1166 = vst [vmem:[#allocation3 + $0x84] sm:$0xf] %v1038_v50  ;;  %2937 = vperm.xlu1 %7480, %v2911_v27   ;;  %v1044_v59 = vshll.u32 %v987_v3, 16  ;;  %v1048_v27 = vrot.slane %v1043_v15, 4 }
  0xc6   :  { %v2520_v47 = vpop.f32.mrf.mxu1  ;;  %v2471_v54 = vpop.f32.mrf.mxu0  ;;  %2588 = vmatmul.bf16.gmra.mxu2 %v6147_v38  ;;  %v2918_v38 = vld [vmem:[%s9270_s5 + $0x48] sm:$0xff]  ;;  %v1261_v55 = vsel %vm7847_vm5, %v1256_v35, %v1260_v39 }
  0xc7   :  { %2637 = vmatmul.bf16.gmra.mxu3 %v6151_v28  ;;  %v2472_v57 = vadd.f32 %v8137_v12, %v2471_v54  ;;  %2972 = vperm.xlu0 %7479, %v2918_v38   ;;  %1410 = vst [vmem:[#allocation3 + $0x68] sm:$0xf] %v1261_v55  ;;  %v1046_v20 = vor.u32 %v1044_v59, %v1043_v15  ;;  %v1282_v38 = vshrl.u32 %v1216_v13, 16  ;;  %v989_v59 = vld [vmem:[#allocation2 + $0x24] sm:$0xf] }
  0xc9   :  { %2735 = vmatmul.bf16.gmra.mxu1 %v6159_v40  ;;  %v8233_v5 = vadd.f32 %v2520_v47, %v2472_v57  ;;  %2686 = vmatmul.bf16.gmra.mxu0 %v6155_v49  ;;  %v2491_v10 = vpop.f32.mrf.mxu2  ;;  %v1265_v40 = vor.u32 %v1264_v23, %v1260_v39  ;;  %v7143_v47 = vld [vmem:[#allocation3 + $0x220] sm:$0xf0]  ;;  %v7140_v49 = vld [vmem:[#allocation3 + $0x20c] sm:$0xf]  ;;  %v1280_v23 = vrot.slane %v1278_v17, 5 }
  0xca   :  { %v2540_v63 = vpop.f32.mrf.mxu3  ;;  %v2492_v6 = vadd.f32 %v8137_v12, %v2491_v10  ;;  %v6183_v61 = vor.u32 %v7143_v47, %v6182_v37  ;;  %v6195_v0 = vor.u32 %v7140_v49, %v6192_v52  ;;  %v1288_v47 = vshll.u32 %v8281_v32, 16 }
  0xcb   :  { %v1266_v54 = vrot.slane %v1265_v40, 4  ;;  %v1284_v52 = vrot.slane %v1282_v38, 4 }
  0xcc   :  { %v8245_v30 = vadd.f32 %v2540_v63, %v2492_v6  ;;  %v988_v63 = vld [vmem:[#allocation2 + $0x20] sm:$0xf]  ;;  %v1272_v6 = vshrl.u32 %v8237_v16, 16  ;;  %v1039_v16 = vrot.slane %v8235_v41, 4 }
  0xcd   :  { %v1271_v62 = vsel %vm7847_vm5, %v1266_v54, %v8261_v42  ;;  %v1050_v10 = vshrl.u32 %v988_v63, 16  ;;  %2942 = vperm.xlu1 %7480, %v2912_v4   ;;  %v1053_v50 = vshll.u32 %v988_v63, 16  ;;  %v7082_v63 = vld [vmem:[#allocation3 + $0x38] sm:$0xf0]  ;;  %v7083_v4 = vld [vmem:[#allocation3 + $0x40] sm:$0xf0] }
  0xce   :  { %v8249_v28 = vpop.f32.mrf.mxu0  ;;  %v8251_v31 = vpop.f32.mrf.mxu1  ;;  %1411 = vst [vmem:[#allocation3 + $0x8c] sm:$0xf] %v1271_v62  ;;  %v1274_v35 = vrot.slane %v1272_v6, 4  ;;  %v1047_v49 = vsel %vm7617_vm2, %v1039_v16, %v1046_v20  ;;  %v1290_v62 = vrot.slane %v1288_v47, 5  ;;  %v2919_v16 = vld [vmem:[%s9270_s5 + $0x50] sm:$0xff]  ;;  %v1292_v20 = vshrl.u32 %v8281_v32, 16 }
  0xcf   :  { %v8277_v11 = vrot.slane %v1050_v10, 7  ;;  %2987 = vperm.xlu0 %7479, %v2921_v53   ;;  %1167 = vst [vmem:[#allocation3 + $0xa8] sm:$0xf] %v1047_v49 }
  0xd0   :  { %v1275_v40 = vor.u32 %v1274_v35, %v8261_v42  ;;  %v2916_v42 = vld [vmem:[%s9270_s5 + $0x38] sm:$0xff]  ;;  %v1059_v35 = vshrl.u32 %v989_v59, 16 }
  0xd1   :  { %v2493_v56 = vpop.f32.mrf.mxu2  ;;  %v1055_v55 = vor.u32 %v1053_v50, %v8277_v11 }
  0xd2   :  { %v2542_v46 = vpop.f32.mrf.mxu3  ;;  %v2494_v57 = vadd.f32 %v8137_v12, %v2493_v56  ;;  %v7078_v56 = vld [vmem:[#allocation3 + $0x1c] sm:$0xf]  ;;  %v1276_v51 = vrot.slane %v1275_v40, 4 }
  0xd3   :  { %v1056_v41 = vsel %vm7617_vm2, %v1048_v27, %v1055_v55  ;;  %v1062_v55 = vshll.u32 %v989_v59, 16  ;;  %v5982_v59 = vld [vmem:[#allocation3 + $0x60] sm:$0xf] }
  0xd4   :  { %v8267_v1 = vadd.f32 %v2542_v46, %v2494_v57  ;;  %v1183_v46 = vld [vmem:[#allocation2 + $0x1c] sm:$0xf]  ;;  %1168 = vst [vmem:[#allocation3 + $0xcc] sm:$0xf] %v1056_v41  ;;  %v1281_v3 = vsel %vm7847_vm5, %v1276_v51, %v1280_v23  ;;  %v1057_v51 = vrot.slane %v8277_v11, 4 }
  0xd5   :  { %v2924_v57 = vld [vmem:[%s9270_s5 + $0x78] sm:$0xff]  ;;  %1199 = vst [vmem:[#allocation3 + $0xac] sm:$0xf] %v1183_v46  ;;  %2962 = vperm.xlu1 %7480, %v2916_v42   ;;  %v8315_v46 = vld [vmem:[#allocation2 + $0x2c] sm:$0xf] }
  0xd6   :  { %v2476_v14 = vpop.f32.mrf.mxu0  ;;  %2593 = vmatmul.bf16.gmra.mxu2 %v6183_v61  ;;  %v2525_v22 = vpop.f32.mrf.mxu1  ;;  %v1285_v61 = vor.u32 %v1284_v52, %v1280_v23  ;;  %1412 = vst [vmem:[#allocation3 + $0xb0] sm:$0xf] %v1281_v3  ;;  %v1294_v52 = vrot.slane %v1292_v20, 4  ;;  %v5990_v20 = vld [vmem:[#allocation3 + $0x68] sm:$0xf] }
  0xd7   :  { %2642 = vmatmul.bf16.gmra.mxu3 %v6187_v44  ;;  %v2477_v8 = vadd.f32 %v8137_v12, %v2476_v14  ;;  %v1184_v44 = vld [vmem:[#allocation2 + $0x20] sm:$0xf]  ;;  %3002 = vperm.xlu0 %7479, %v2924_v57   ;;  %v1308_v57 = vshll.u32 %v8315_v46, 16 }
  0xd8   :  { %1200 = vst [vmem:[#allocation3 + $0xd0] sm:$0xf] %v1184_v44  ;;  %v1286_v14 = vrot.slane %v1285_v61, 4 }
  0xd9   :  { %2740 = vmatmul.bf16.gmra.mxu1 %v6195_v0  ;;  %v8279_v39 = vadd.f32 %v2525_v22, %v2477_v8  ;;  %2691 = vmatmul.bf16.gmra.mxu0 %v6191_v2  ;;  %v2496_v37 = vpop.f32.mrf.mxu2  ;;  %v5946_v0 = vld [vmem:[#allocation3 + $0x18] sm:$0xf]  ;;  %v5948_v2 = vld [vmem:[#allocation3 + $0x3c] sm:$0xf0] }
  0xda   :  { %v2545_v29 = vpop.f32.mrf.mxu3  ;;  %v2497_v60 = vadd.f32 %v8137_v12, %v2496_v37  ;;  %v5951_v13 = vor.u32 %v7078_v56, %v5948_v2  ;;  %v5954_v8 = vld [vmem:[#allocation3 + $0x20] sm:$0xf]  ;;  %v1291_v53 = vsel %vm7847_vm5, %v1286_v14, %v1290_v62  ;;  %v5947_v17 = vor.u32 %v7082_v63, %v5946_v0  ;;  %v1218_v37 = vld [vmem:[#allocation2 + $0x28] sm:$0xf]  ;;  %v1185_v63 = vld [vmem:[#allocation2 + $0x24] sm:$0xf] }
  0xdb   :  { %1413 = vst [vmem:[#allocation3 + $0xd4] sm:$0xf] %v1291_v53  ;;  %v5955_v15 = vor.u32 %v7083_v4, %v5954_v8  ;;  %v1298_v27 = vshll.u32 %v1218_v37, 16  ;;  %v1302_v38 = vshrl.u32 %v1218_v37, 16  ;;  %v1295_v2 = vor.u32 %v1294_v52, %v1290_v62  ;;  %v1186_v8 = vld [vmem:[#allocation2 + $0x28] sm:$0xf] }
  0xdc   :  { %v8290_v54 = vadd.f32 %v2545_v29, %v2497_v60  ;;  %v990_v29 = vld [vmem:[#allocation2 + $0x28] sm:$0xf]  ;;  %v1061_v60 = vrot.slane %v1059_v35, 7  ;;  %1201 = vst [vmem:[#allocation3 + $0xf4] sm:$0xf] %v1185_v63 }
  0xdd   :  { %v1068_v23 = vshrl.u32 %v990_v29, 16  ;;  %2977 = vperm.xlu1 %7480, %v2919_v16   ;;  %v1071_v49 = vshll.u32 %v990_v29, 16  ;;  %v1300_v56 = vrot.slane %v1298_v27, 5  ;;  %v1304_v41 = vrot.slane %v1302_v38, 4  ;;  %v2922_v62 = vld [vmem:[%s9270_s5 + $0x68] sm:$0xff] }
  0xde   :  { %v8294_v58 = vpop.f32.mrf.mxu0  ;;  %v1064_v42 = vor.u32 %v1062_v55, %v1061_v60  ;;  %v1066_v32 = vrot.slane %v1061_v60, 4  ;;  %v7091_v29 = vld [vmem:[#allocation3 + $0x80] sm:$0xf0]  ;;  %1202 = vst [vmem:[#allocation3 + $0x118] sm:$0xf] %v1186_v8 }
  0xdf   :  { %v8313_v40 = vrot.slane %v1068_v23, 7  ;;  %v1305_v14 = vor.u32 %v1304_v41, %v1300_v56  ;;  %v7092_v27 = vld [vmem:[#allocation3 + $0x88] sm:$0xf0]  ;;  %v5983_v60 = vor.u32 %v7091_v29, %v5982_v59  ;;  %v992_v52 = vld [vmem:[#allocation2 + $0x30] sm:$0xf] }
  0xe0   :  { %v1065_v3 = vsel %vm7617_vm2, %v1057_v51, %v1064_v42  ;;  %v1220_v51 = vld [vmem:[#allocation2 + $0x30] sm:$0xf]  ;;  %v2913_v42 = vld [vmem:[%s9270_s5 + $0x20] sm:$0xff] }
  0xe1   :  { %v2498_v10 = vpop.f32.mrf.mxu2  ;;  %v1073_v0 = vor.u32 %v1071_v49, %v8313_v40  ;;  %1169 = vst [vmem:[#allocation3 + $0xf0] sm:$0xf] %v1065_v3  ;;  %v1306_v53 = vrot.slane %v1305_v14, 4  ;;  %v991_v49 = vld [vmem:[#allocation2 + $0x2c] sm:$0xf]  ;;  %2947 = vperm.xlu2 %7481, %v2913_v42   ;;  %v1322_v3 = vshrl.u32 %v1220_v51, 16 }
  0xe2   :  { %v2547_v19 = vpop.f32.mrf.mxu3  ;;  %v2499_v6 = vadd.f32 %v8137_v12, %v2498_v10  ;;  %v2464_v10 = vadd.f32 %v8137_v12, %v8163_v26  ;;  %v1077_v41 = vshrl.u32 %v991_v49, 16  ;;  %v7298_v14 = vld [vmem:[#allocation4 + $0x38] sm:$0xff]  ;;  %v1075_v8 = vrot.slane %v8313_v40, 4 }
  0xe3   :  { %5407 = vmatpush.bf16.msra.mxu1 %v7298_v14  ;;  %v1324_v59 = vrot.slane %v1322_v3, 4  ;;  %v993_v14 = vld [vmem:[#allocation2 + $0x34] sm:$0xf] }
  0xe4   :  { %v8307_v22 = vadd.f32 %v2547_v19, %v2499_v6  ;;  %v8323_v19 = vrot.slane %v1308_v57, 5  ;;  %v2513_v23 = vadd.f32 %v8161_v45, %v2464_v10  ;;  %v1318_v57 = vshll.u32 %v1220_v51, 16 }
  0xe5   :  { %2992 = vperm.xlu1 %7480, %v2922_v62   ;;  %v1089_v10 = vshll.u32 %v992_v52, 16 }
  0xe6   :  { %v2657_v50 = vpop.f32.mrf.mxu0  ;;  %2754 = vmatmul.bf16.vlgmr.msra.gmra.mxu2 %v5947_v17  ;;  %v7087_v17 = vld [vmem:[#allocation3 + $0x64] sm:$0xf]  ;;  %v1311_v35 = vsel %vm7847_vm5, %v1306_v53, %v8323_v19 }
  0xe7   :  { %2803 = vmatmul.bf16.vlgmr.msra.gmra.mxu3 %v5951_v13  ;;  %v1074_v13 = vsel %vm7617_vm2, %v1066_v32, %v1073_v0  ;;  %1415 = vst [vmem:[#allocation3 + $0x11c] sm:$0xf] %v1311_v35  ;;  %v1312_v32 = vshrl.u32 %v8315_v46, 16  ;;  %v1080_v0 = vshll.u32 %v991_v49, 16  ;;  %v2469_v35 = vadd.f32 %v8137_v12, %v8210_v18  ;;  %v7100_v49 = vld [vmem:[#allocation3 + $0xc8] sm:$0xf0] }
  0xe8   :  { %1170 = vst [vmem:[#allocation3 + $0x114] sm:$0xf] %v1074_v13 }
  0xe9   :  { %2852 = vmatmul.bf16.vlgmr.msra.gmra.mxu0 %v5955_v15  ;;  %v2559_v44 = vpop.f32.mrf.mxu2  ;;  %v5984_v15 = vld [vmem:[#allocation3 + $0x84] sm:$0xf0]  ;;  %v1314_v53 = vrot.slane %v1312_v32, 4  ;;  %v6026_v32 = vld [vmem:[#allocation3 + $0xb0] sm:$0xf] }
  0xea   :  { %v2608_v47 = vpop.f32.mrf.mxu3  ;;  %v2560_v61 = vadd.f32 %v2559_v44, %v8147_v24  ;;  %v1296_v24 = vrot.slane %v1295_v2, 4  ;;  %v5987_v16 = vor.u32 %v7087_v17, %v5984_v15  ;;  %v1086_v44 = vshrl.u32 %v992_v52, 16 }
  0xeb   :  { %v1320_v17 = vrot.slane %v1318_v57, 5  ;;  %v2518_v52 = vadd.f32 %v8205_v9, %v2469_v35  ;;  %v7101_v57 = vld [vmem:[#allocation3 + $0xd0] sm:$0xf0]  ;;  %v994_v9 = vld [vmem:[#allocation2 + $0x38] sm:$0xf] }
  0xec   :  { %v2609_v11 = vadd.f32 %v2608_v47, %v2560_v61  ;;  %v1301_v26 = vsel %vm7847_vm5, %v1296_v24, %v1300_v56  ;;  %v5991_v47 = vor.u32 %v7092_v27, %v5990_v20  ;;  %v1079_v61 = vrot.slane %v1077_v41, 7  ;;  %v7096_v20 = vld [vmem:[#allocation3 + $0xac] sm:$0xf]  ;;  %v2914_v27 = vld [vmem:[%s9270_s5 + $0x28] sm:$0xff]  ;;  %v7297_v35 = vld [vmem:[#allocation4 + $0x30] sm:$0xff] }
  0xed   :  { %1414 = vst [vmem:[#allocation3 + $0xf8] sm:$0xf] %v1301_v26  ;;  %v8346_v2 = vrot.slane %v1086_v44, 7  ;;  %v1187_v26 = vld [vmem:[#allocation2 + $0x2c] sm:$0xf]  ;;  %2952 = vperm.xlu2 %7481, %v2914_v27   ;;  %5408 = vmatpush.bf16.msra.mxu1 %v7297_v35 }
  0xee   :  { %v2659_v4 = vpop.f32.mrf.mxu0  ;;  %v8332_v6 = vadd.f32 %v2657_v50, %v2609_v11  ;;  %v8348_v11 = vld [vmem:[#allocation2 + $0x34] sm:$0xf]  ;;  %v1082_v24 = vor.u32 %v1080_v0, %v1079_v61  ;;  %1203 = vst [vmem:[#allocation3 + $0x13c] sm:$0xf] %v1187_v26 }
  0xef   :  { %v1091_v62 = vor.u32 %v1089_v10, %v8346_v2  ;;  %v1328_v29 = vshll.u32 %v8348_v11, 16 }
  0xf0   :  { %v1083_v15 = vsel %vm7617_vm2, %v1075_v8, %v1082_v24  ;;  %v1104_v8 = vshrl.u32 %v994_v9, 16  ;;  %v1222_v24 = vld [vmem:[#allocation2 + $0x38] sm:$0xf] }
  0xf1   :  { %v2561_v50 = vpop.f32.mrf.mxu2  ;;  %1171 = vst [vmem:[#allocation3 + $0x138] sm:$0xf] %v1083_v15  ;;  %v1098_v15 = vshll.u32 %v993_v14, 16 }
  0xf2   :  { %v2610_v37 = vpop.f32.mrf.mxu3  ;;  %v2562_v38 = vadd.f32 %v2561_v50, %v2513_v23  ;;  %v8380_v26 = vrot.slane %v1104_v8, 7 }
  0xf4   :  { %v2611_v55 = vadd.f32 %v2610_v37, %v2562_v38  ;;  %v1315_v37 = vor.u32 %v1314_v53, %v8323_v19  ;;  %v1325_v38 = vor.u32 %v1324_v59, %v1320_v17  ;;  %v1338_v53 = vshll.u32 %v1222_v24, 16 }
  0xf5   :  { %v1342_v59 = vshrl.u32 %v1222_v24, 16  ;;  %v6062_v24 = vld [vmem:[#allocation3 + $0xf8] sm:$0xf] }
  0xf6   :  { %v2662_v56 = vpop.f32.mrf.mxu0  ;;  %2759 = vmatmul.bf16.gmra.mxu2 %v5983_v60  ;;  %v8340_v45 = vadd.f32 %v2659_v4, %v2611_v55  ;;  %v1084_v4 = vrot.slane %v1079_v61, 4  ;;  %v8364_v60 = vrot.slane %v1328_v29, 5  ;;  %v6020_v55 = vld [vmem:[#allocation3 + $0xcc] sm:$0xf0]  ;;  %v1326_v19 = vrot.slane %v1325_v38, 4 }
  0xf7   :  { %2808 = vmatmul.bf16.gmra.mxu3 %v5987_v16  ;;  %v6018_v16 = vld [vmem:[#allocation3 + $0xa8] sm:$0xf]  ;;  %v6023_v42 = vor.u32 %v7096_v20, %v6020_v55  ;;  %v1340_v38 = vrot.slane %v1338_v53, 5 }
  0xf8   :  { %v1092_v23 = vsel %vm7617_vm2, %v1084_v4, %v1091_v62  ;;  %v6019_v0 = vor.u32 %v7100_v49, %v6018_v16  ;;  %v1332_v62 = vshrl.u32 %v8348_v11, 16 }
  0xf9   :  { %2857 = vmatmul.bf16.gmra.mxu0 %v5991_v47  ;;  %v2564_v13 = vpop.f32.mrf.mxu2  ;;  %1172 = vst [vmem:[#allocation3 + $0x15c] sm:$0xf] %v1092_v23  ;;  %v1316_v47 = vrot.slane %v1315_v37, 4  ;;  %v8382_v23 = vld [vmem:[#allocation2 + $0x3c] sm:$0xf]  ;;  %v1093_v37 = vrot.slane %v8346_v2, 4  ;;  %v2474_v2 = vadd.f32 %v8137_v12, %v8249_v28 }
  0xfa   :  { %v2613_v63 = vpop.f32.mrf.mxu3  ;;  %v2565_v46 = vadd.f32 %v2564_v13, %v8191_v48  ;;  %v1188_v48 = vld [vmem:[#allocation2 + $0x30] sm:$0xf]  ;;  %v1095_v13 = vshrl.u32 %v993_v14, 16  ;;  %v1334_v20 = vrot.slane %v1332_v62, 4  ;;  %v7105_v12 = vld [vmem:[#allocation3 + $0xf4] sm:$0xf] }
  0xfb   :  { %1204 = vst [vmem:[#allocation3 + $0x160] sm:$0xf] %v1188_v48  ;;  %v1321_v44 = vsel %vm7847_vm5, %v1316_v47, %v1320_v17  ;;  %v1189_v47 = vld [vmem:[#allocation2 + $0x34] sm:$0xf]  ;;  %v6056_v28 = vld [vmem:[#allocation3 + $0x114] sm:$0xf0]  ;;  %v2523_v14 = vadd.f32 %v8251_v31, %v2474_v2 }
  0xfc   :  { %v2614_v40 = vadd.f32 %v2613_v63, %v2565_v46  ;;  %1416 = vst [vmem:[#allocation3 + $0x140] sm:$0xf] %v1321_v44  ;;  %v6027_v63 = vor.u32 %v7101_v57, %v6026_v32  ;;  %v2917_v46 = vld [vmem:[%s9270_s5 + $0x40] sm:$0xff]  ;;  %v1097_v17 = vrot.slane %v1095_v13, 7  ;;  %v1335_v49 = vor.u32 %v1334_v20, %v8364_v60  ;;  %v1190_v44 = vld [vmem:[#allocation2 + $0x38] sm:$0xf] }
  0xfd   :  { %2967 = vperm.xlu2 %7481, %v2917_v46   ;;  %v2920_v32 = vld [vmem:[%s9270_s5 + $0x58] sm:$0xff]  ;;  %1205 = vst [vmem:[#allocation3 + $0x184] sm:$0xf] %v1189_v47  ;;  %v6059_v8 = vor.u32 %v7105_v12, %v6056_v28  ;;  %v7110_v46 = vld [vmem:[#allocation3 + $0x118] sm:$0xf0] }
  0xfe   :  { %v2664_v50 = vpop.f32.mrf.mxu0  ;;  %v8366_v18 = vadd.f32 %v2662_v56, %v2614_v40  ;;  %v1331_v56 = vsel %vm7847_vm5, %v1326_v19, %v8364_v60  ;;  %v1107_v40 = vshll.u32 %v994_v9, 16  ;;  %v1102_v16 = vrot.slane %v1097_v17, 4  ;;  %1206 = vst [vmem:[#allocation3 + $0x1a8] sm:$0xf] %v1190_v44  ;;  %v1191_v28 = vld [vmem:[#allocation2 + $0x3c] sm:$0xf] }
  0xff   :  { %1417 = vst [vmem:[#allocation3 + $0x164] sm:$0xf] %v1331_v56  ;;  %v1344_v19 = vrot.slane %v1342_v59, 4  ;;  %v1336_v60 = vrot.slane %v1335_v49, 4  ;;  %v995_v59 = vld [vmem:[#allocation2 + $0x3c] sm:$0xf] }
 0x100   :  { %v1109_v27 = vor.u32 %v1107_v40, %v8380_v26  ;;  %v1113_v31 = vshrl.u32 %v995_v59, 16  ;;  %v7296_v49 = vld [vmem:[#allocation4 + $0x28] sm:$0xff]  ;;  %v1111_v44 = vrot.slane %v8380_v26, 4  ;;  %v7484_v26 = vld [vmem:[%s9267_s2] ss:$0 sm:$0xff] }
 0x101   :  { %v2566_v51 = vpop.f32.mrf.mxu2  ;;  %v1345_v57 = vor.u32 %v1344_v19, %v1340_v38  ;;  %5409 = vmatpush.bf16.msra.mxu1 %v7296_v49  ;;  %1207 = vst [vmem:[#allocation3 + $0x1cc] sm:$0xf] %v1191_v28 }
 0x102   :  { %v2615_v41 = vpop.f32.mrf.mxu3  ;;  %v2567_v61 = vadd.f32 %v2566_v51, %v2518_v52  ;;  %v1348_v52 = vshll.u32 %v8382_v23, 16 }
 0x104   :  { %v2616_v3 = vadd.f32 %v2615_v41, %v2567_v61  ;;  %v8398_v56 = vrot.slane %v1348_v52, 5  ;;  %v8416_v52 = vld [vmem:[#allocation2 + $0x44] sm:$0xf] }
 0x105   :  { %2982 = vperm.xlu2 %7481, %v2920_v32  }
 0x106   :  { %v2667_v10 = vpop.f32.mrf.mxu0  ;;  %2764 = vmatmul.bf16.gmra.mxu2 %v6019_v0  ;;  %v8374_v4 = vadd.f32 %v2664_v50, %v2616_v3  ;;  %v1100_v50 = vor.u32 %v1098_v15, %v1097_v17  ;;  %v7109_v0 = vld [vmem:[#allocation3 + $0x110] sm:$0xf0]  ;;  %v1341_v3 = vsel %vm7847_vm5, %v1336_v60, %v1340_v38  ;;  %v6063_v15 = vor.u32 %v7110_v46, %v6062_v24 }
 0x107   :  { %2813 = vmatmul.bf16.gmra.mxu3 %v6023_v42  ;;  %v6054_v42 = vld [vmem:[#allocation3 + $0xf0] sm:$0xf]  ;;  %1418 = vst [vmem:[#allocation3 + $0x188] sm:$0xf] %v1341_v3  ;;  %v1116_v38 = vshll.u32 %v995_v59, 16  ;;  %v1368_v3 = vshll.u32 %v8416_v52, 16 }
 0x108   :  { %v1101_v55 = vsel %vm7617_vm2, %v1093_v37, %v1100_v50  ;;  %v6055_v53 = vor.u32 %v7109_v0, %v6054_v42  ;;  %v2923_v50 = vld [vmem:[%s9270_s5 + $0x70] sm:$0xff] }
 0x109   :  { %2862 = vmatmul.bf16.gmra.mxu0 %v6027_v63  ;;  %v2569_v48 = vpop.f32.mrf.mxu2  ;;  %1173 = vst [vmem:[#allocation3 + $0x180] sm:$0xf] %v1101_v55  ;;  %v1346_v63 = vrot.slane %v1345_v57, 4  ;;  %v8431_v46 = vrot.slane %v1368_v3, 5 }
 0x10a   :  { %v2618_v29 = vpop.f32.mrf.mxu3  ;;  %v2570_v11 = vadd.f32 %v2569_v48, %v8233_v5  ;;  %v1110_v5 = vsel %vm7617_vm2, %v1102_v16, %v1109_v27  ;;  %v1224_v48 = vld [vmem:[#allocation2 + $0x40] sm:$0xf]  ;;  %v1352_v16 = vshrl.u32 %v8382_v23, 16  ;;  %v1115_v27 = vrot.slane %v1113_v31, 7 }
 0x10b   :  { %1174 = vst [vmem:[#allocation3 + $0x1a4] sm:$0xf] %v1110_v5  ;;  %v1358_v20 = vshll.u32 %v1224_v48, 16 }
 0x10c   :  { %v2619_v41 = vadd.f32 %v2618_v29, %v2570_v11  ;;  %v996_v29 = vld [vmem:[#allocation2 + $0x40] sm:$0xf]  ;;  %v1362_v11 = vshrl.u32 %v1224_v48, 16  ;;  %v1354_v2 = vrot.slane %v1352_v16, 4  ;;  %v1120_v23 = vrot.slane %v1115_v27, 4 }
 0x10d   :  { %v1122_v40 = vshrl.u32 %v996_v29, 16  ;;  %2997 = vperm.xlu2 %7481, %v2923_v50   ;;  %v1125_v19 = vshll.u32 %v996_v29, 16  ;;  %v7119_v50 = vld [vmem:[#allocation3 + $0x160] sm:$0xf0] }
 0x10e   :  { %v2669_v51 = vpop.f32.mrf.mxu0  ;;  %v8400_v61 = vadd.f32 %v2667_v10, %v2619_v41  ;;  %v1351_v10 = vsel %vm7847_vm5, %v1346_v63, %v8398_v56  ;;  %v1360_v41 = vrot.slane %v1358_v20, 5  ;;  %v1364_v42 = vrot.slane %v1362_v11, 4 }
 0x10f   :  { %1419 = vst [vmem:[#allocation3 + $0x1ac] sm:$0xf] %v1351_v10  ;;  %v8414_v55 = vrot.slane %v1122_v40, 7  ;;  %v1355_v57 = vor.u32 %v1354_v2, %v8398_v56  ;;  %v2479_v63 = vadd.f32 %v7484_v26, %v8294_v58 }
 0x110   :  { %v1365_v0 = vor.u32 %v1364_v42, %v1360_v41 }
 0x111   :  { %v2571_v13 = vpop.f32.mrf.mxu2  ;;  %v1127_v60 = vor.u32 %v1125_v19, %v8414_v55  ;;  %v1356_v56 = vrot.slane %v1355_v57, 4  ;;  %v1129_v26 = vrot.slane %v8414_v55, 4  ;;  %v1194_v55 = vld [vmem:[#allocation2 + $0x48] sm:$0xf] }
 0x112   :  { %v2620_v9 = vpop.f32.mrf.mxu3  ;;  %v2572_v62 = vadd.f32 %v2571_v13, %v2523_v14  ;;  %v2527_v13 = vpop.f32.mrf.mxu1  ;;  %v1366_v24 = vrot.slane %v1365_v0, 4  ;;  %v1227_v0 = vld [vmem:[#allocation2 + $0x4c] sm:$0x1]  ;;  %1210 = vst [vmem:[#allocation3 + $0x238] sm:$0xf] %v1194_v55 }
 0x113   :  { %v1361_v58 = vsel %vm7847_vm5, %v1356_v56, %v1360_v41  ;;  %v2528_v29 = vadd.f32 %v2527_v13, %v2479_v63  ;;  %v1226_v41 = vld [vmem:[#allocation2 + $0x48] sm:$0xf] }
 0x114   :  { %v2621_v17 = vadd.f32 %v2620_v9, %v2572_v62  ;;  %v1192_v9 = vld [vmem:[#allocation2 + $0x40] sm:$0xf]  ;;  %v7114_v62 = vld [vmem:[#allocation3 + $0x13c] sm:$0xf]  ;;  %v1371_v59 = vsel %vm7847_vm5, %v1366_v24, %v8431_v46  ;;  %1420 = vst [vmem:[#allocation3 + $0x1d0] sm:$0xf] %v1361_v58 }
 0x115   :  { %1208 = vst [vmem:[#allocation3 + $0x1f0] sm:$0xf] %v1192_v9 }
 0x116   :  { %v2672_v35 = vpop.f32.mrf.mxu0  ;;  %2769 = vmatmul.bf16.gmra.mxu2 %v6055_v53  ;;  %v8408_v37 = vadd.f32 %v2669_v51, %v2621_v17  ;;  %v1118_v51 = vor.u32 %v1116_v38, %v1115_v27  ;;  %v6092_v53 = vld [vmem:[#allocation3 + $0x15c] sm:$0xf0]  ;;  %v6090_v17 = vld [vmem:[#allocation3 + $0x138] sm:$0xf]  ;;  %1421 = vst [vmem:[#allocation3 + $0x1f4] sm:$0xf] %v1371_v59 }
 0x117   :  { %2818 = vmatmul.bf16.gmra.mxu3 %v6059_v8  ;;  %v6095_v48 = vor.u32 %v7114_v62, %v6092_v53  ;;  %v997_v38 = vld [vmem:[#allocation2 + $0x44] sm:$0xf]  ;;  %v1388_v62 = vshll.u32 %v1227_v0, 16  ;;  %v7123_v59 = vld [vmem:[#allocation3 + $0x184] sm:$0xf] }
 0x118   :  { %v1119_v12 = vsel %vm7617_vm2, %v1111_v44, %v1118_v51  ;;  %v1131_v19 = vshrl.u32 %v997_v38, 16  ;;  %v1372_v44 = vshrl.u32 %v8416_v52, 16  ;;  %v1378_v51 = vshll.u32 %v1226_v41, 16 }
 0x119   :  { %2867 = vmatmul.bf16.gmra.mxu0 %v6063_v15  ;;  %v2574_v5 = vpop.f32.mrf.mxu2  ;;  %1175 = vst [vmem:[#allocation3 + $0x1c8] sm:$0xf] %v1119_v12  ;;  %v7118_v15 = vld [vmem:[#allocation3 + $0x158] sm:$0xf0]  ;;  %v1134_v42 = vshll.u32 %v997_v38, 16  ;;  %v7295_v12 = vld [vmem:[#allocation4 + $0x20] sm:$0xff] }
 0x11a   :  { %v2623_v47 = vpop.f32.mrf.mxu3  ;;  %v2575_v32 = vadd.f32 %v2574_v5, %v8279_v39  ;;  %v1128_v39 = vsel %vm7617_vm2, %v1120_v23, %v1127_v60  ;;  %v6091_v20 = vor.u32 %v7118_v15, %v6090_v17  ;;  %v1133_v23 = vrot.slane %v1131_v19, 7  ;;  %5410 = vmatpush.bf16.msra.mxu1 %v7295_v12  ;;  %v6134_v38 = vld [vmem:[#allocation3 + $0x188] sm:$0xf] }
 0x11b   :  { %1176 = vst [vmem:[#allocation3 + $0x1ec] sm:$0xf] %v1128_v39  ;;  %v1382_v60 = vshrl.u32 %v1226_v41, 16  ;;  %v1374_v52 = vrot.slane %v1372_v44, 4  ;;  %v1380_v56 = vrot.slane %v1378_v51, 5 }
 0x11c   :  { %v2624_v14 = vadd.f32 %v2623_v47, %v2575_v32  ;;  %v998_v47 = vld [vmem:[#allocation2 + $0x48] sm:$0xf]  ;;  %v1136_v63 = vor.u32 %v1134_v42, %v1133_v23 }
 0x11d   :  { %v1140_v2 = vshrl.u32 %v998_v47, 16  ;;  %v1143_v28 = vshll.u32 %v998_v47, 16  ;;  %v1384_v24 = vrot.slane %v1382_v60, 4  ;;  %v1375_v17 = vor.u32 %v1374_v52, %v8431_v46  ;;  %v7128_v47 = vld [vmem:[#allocation3 + $0x1a8] sm:$0xf0]  ;;  %v7294_v42 = vld [vmem:[#allocation4 + $0x18] sm:$0xff] }
 0x11e   :  { %v2674_v8 = vpop.f32.mrf.mxu0  ;;  %v8433_v10 = vadd.f32 %v2672_v35, %v2624_v14  ;;  %v6098_v35 = vld [vmem:[#allocation3 + $0x140] sm:$0xf]  ;;  %v1138_v14 = vrot.slane %v1133_v23, 4  ;;  %v1137_v13 = vsel %vm7617_vm2, %v1129_v26, %v1136_v63  ;;  %v8462_v44 = vld [vmem:[#allocation3 + $0x234] sm:$0xf0]  ;;  %5411 = vmatpush.bf16.msra.mxu1 %v7294_v42 }
 0x11f   :  { %v6099_v27 = vor.u32 %v7119_v50, %v6098_v35  ;;  %v1142_v32 = vrot.slane %v1140_v2, 7  ;;  %1177 = vst [vmem:[#allocation3 + $0x210] sm:$0xf] %v1137_v13  ;;  %v1376_v35 = vrot.slane %v1375_v17, 4  ;;  %v7127_v50 = vld [vmem:[#allocation3 + $0x1a0] sm:$0xf0]  ;;  %v6135_v2 = vor.u32 %v7128_v47, %v6134_v38 }
 0x120   :  { %v4149_v51 = vld [vmem:[#allocation2 + $0x48] sm:$0xf] }
 0x121   :  { %v2576_v40 = vpop.f32.mrf.mxu2  ;;  %v1145_v9 = vor.u32 %v1143_v28, %v1142_v32  ;;  %v1381_v46 = vsel %vm7847_vm5, %v1376_v35, %v1380_v56  ;;  %4165 = vst [vmem:[#allocation3 + $0x238] sm:$0xf] %v4149_v51  ;;  %v4181_v32 = vld [vmem:[#allocation2 + $0x48] sm:$0xf] }
 0x122   :  { %v2625_v31 = vpop.f32.mrf.mxu3  ;;  %v2577_v16 = vadd.f32 %v2576_v40, %v2528_v29  ;;  %v1385_v29 = vor.u32 %v1384_v24, %v1380_v56  ;;  %1422 = vst [vmem:[#allocation3 + $0x218] sm:$0xf] %v1381_v46  ;;  %v4333_v12 = vshll.u32 %v4181_v32, 16  ;;  %v4337_v28 = vshrl.u32 %v4181_v32, 16  ;;  %v8470_v56 = vpop.f32.mrf.mxu1  ;;  %v6164_v24 = vld [vmem:[#allocation3 + $0x1ec] sm:$0xf0] }
 0x123   :  { %v1146_v58 = vsel %vm7617_vm2, %v1138_v14, %v1145_v9  ;;  %v7306_v42 = vld [vmem:[#allocation4 + $0x78] sm:$0xff] }
 0x124   :  { %v2626_v11 = vadd.f32 %v2625_v31, %v2577_v16  ;;  %1178 = vst [vmem:[#allocation3 + $0x234] sm:$0xf] %v1146_v58  ;;  %v1390_v31 = vrot.slane %v1388_v62, 5  ;;  %v1386_v16 = vrot.slane %v1385_v29, 4  ;;  %v8465_v26 = vrot.slane %v4333_v12, 5  ;;  %5456 = vmatpush.bf16.msrb.mxu2 %v7306_v42 }
 0x125   :  { %v4339_v63 = vrot.slane %v4337_v28, 4  ;;  %v6162_v62 = vld [vmem:[#allocation3 + $0x1c8] sm:$0xf]  ;;  %v2707_v42 = vadd.f32 %v8470_v56, %v8332_v6 }
 0x126   :  { %v2677_v49 = vpop.f32.mrf.mxu0  ;;  %2774 = vmatmul.bf16.gmra.mxu2 %v6091_v20  ;;  %v8440_v5 = vadd.f32 %v2674_v8, %v2626_v11  ;;  %v1193_v8 = vld [vmem:[#allocation2 + $0x44] sm:$0xf]  ;;  %9277 = vst [vmem:[#allocation7_spill] sm:$0xff] %v8465_v26  ;;  %v6198_v51 = vld [vmem:[#allocation3 + $0x210] sm:$0xf] }
 0x127   :  { %2823 = vmatmul.bf16.gmra.mxu3 %v6095_v48  ;;  %v6128_v48 = vld [vmem:[#allocation3 + $0x1a4] sm:$0xf0]  ;;  %1209 = vst [vmem:[#allocation3 + $0x214] sm:$0xf] %v1193_v8  ;;  %v4340_v9 = vor.u32 %v4339_v63, %v8465_v26  ;;  %v7132_v8 = vld [vmem:[#allocation3 + $0x1cc] sm:$0xf] }
 0x128   :  { %v6167_v17 = vor.u32 %v7132_v8, %v6164_v24  ;;  %v7314_v8 = vld [vmem:[#allocation4 + $0xb8] sm:$0xff] }
 0x129   :  { %2872 = vmatmul.bf16.gmra.mxu0 %v6099_v27  ;;  %v2579_v3 = vpop.f32.mrf.mxu2  ;;  %v6131_v27 = vor.u32 %v7123_v59, %v6128_v48  ;;  %v7137_v59 = vld [vmem:[#allocation3 + $0x1f0] sm:$0xf0]  ;;  %v6206_v12 = vld [vmem:[#allocation3 + $0x218] sm:$0xf]  ;;  %5505 = vmatpush.bf16.msrb.mxu3 %v7314_v8  ;;  %v7291_v8 = vld [vmem:[#allocation4] sm:$0xff] }
 0x12a   :  { %v2628_v57 = vpop.f32.mrf.mxu3  ;;  %v2580_v39 = vadd.f32 %v2579_v3, %v8159_v43  ;;  %v6126_v43 = vld [vmem:[#allocation3 + $0x180] sm:$0xf] }
 0x12b   :  { %v6127_v19 = vor.u32 %v7127_v50, %v6126_v43  ;;  %v6170_v43 = vld [vmem:[#allocation3 + $0x1d0] sm:$0xf] }
 0x12c   :  { %v2629_v53 = vadd.f32 %v2628_v57, %v2580_v39  ;;  %v4182_v57 = vld [vmem:[#allocation2 + $0x4c] sm:$0x1]  ;;  %v6171_v35 = vor.u32 %v7137_v59, %v6170_v43  ;;  %v7313_v43 = vld [vmem:[#allocation4 + $0xb0] sm:$0xff] }
 0x12d   :  { %v4343_v3 = vshll.u32 %v4182_v57, 16  ;;  %5506 = vmatpush.bf16.msrb.mxu3 %v7313_v43 }
 0x12e   :  { %v8450_v15 = vpop.f32.mrf.mxu0  ;;  %v8452_v40 = vadd.f32 %v2677_v49, %v2629_v53  ;;  %v1391_v49 = vsel %vm7847_vm5, %v1386_v16, %v1390_v31  ;;  %v7136_v53 = vld [vmem:[#allocation3 + $0x1e8] sm:$0xf0]  ;;  %v8480_v16 = vpop.f32.mrf.mxu1 }
 0x12f   :  { %1423 = vst [vmem:[#allocation3 + $0x23c] sm:$0xf] %v1391_v49  ;;  %v4345_v52 = vrot.slane %v4343_v3, 5  ;;  %v6163_v48 = vor.u32 %v7136_v53, %v6162_v62  ;;  %v7321_v62 = vld [vmem:[#allocation4 + $0xf0] sm:$0xff]  ;;  %v7303_v53 = vld [vmem:[#allocation4 + $0x60] sm:$0xff]  ;;  %v2709_v6 = vadd.f32 %v8480_v16, %v8340_v45 }
 0x131   :  { %v8458_v11 = vpop.f32.mrf.mxu2 }
 0x132   :  { %v8454_v20 = vpop.f32.mrf.mxu3 }
 0x136   :  { %v2682_v41 = vpop.f32.mrf.mxu0  ;;  %2779 = vmatmul.bf16.gmra.mxu2 %v6127_v19  ;;  %v7146_v29 = vld [vmem:[#allocation3 + $0x238] sm:$0xf0]  ;;  %v8492_v28 = vpop.f32.mrf.mxu1 }
 0x137   :  { %2828 = vmatmul.bf16.gmra.mxu3 %v6131_v27  ;;  %v7293_v27 = vld [vmem:[#allocation4 + $0x10] sm:$0xff]  ;;  %v6207_v3 = vor.u32 %v7146_v29, %v6206_v12  ;;  %v7310_v12 = vld [vmem:[#allocation4 + $0x98] sm:$0xff]  ;;  %v2712_v45 = vadd.f32 %v8492_v28, %v8366_v18  ;;  %v2938_v28 = vpop.permute.xlu1 %2937 }
 0x138   :  { %5412 = vmatpush.bf16.msra.mxu1 %v7293_v27  ;;  %v7319_v27 = vld [vmem:[#allocation4 + $0xe0] sm:$0xff]  ;;  %v7330_v18 = vld [vmem:[#allocation4 + $0x138] sm:$0xff] }
 0x139   :  { %2877 = vmatmul.bf16.gmra.mxu0 %v6135_v2  ;;  %v2584_v60 = vpop.f32.mrf.mxu2 }
 0x13a   :  { %v2633_v23 = vpop.f32.mrf.mxu3  ;;  %v2585_v0 = vadd.f32 %v2584_v60, %v8203_v7  ;;  %v4341_v7 = vrot.slane %v4340_v9, 4  ;;  %v7304_v9 = vld [vmem:[#allocation4 + $0x68] sm:$0xff] }
 0x13c   :  { %v2634_v14 = vadd.f32 %v2633_v23, %v2585_v0  ;;  %v4346_v31 = vsel %vm7847_vm5, %v4341_v7, %v4345_v52  ;;  %v7145_v23 = vld [vmem:[#allocation3 + $0x230] sm:$0xf0] }
 0x13d   :  { %4378 = vst [vmem:[#allocation3 + $0x23c] sm:$0xf] %v4346_v31  ;;  %v7305_v0 = vld [vmem:[#allocation4 + $0x70] sm:$0xff]  ;;  %v7292_v31 = vld [vmem:[#allocation4 + $0x8] sm:$0xff] }
 0x13e   :  { %v8467_v39 = vpop.f32.mrf.mxu0  ;;  %v8472_v13 = vadd.f32 %v2682_v41, %v2634_v14  ;;  %v7141_v41 = vld [vmem:[#allocation3 + $0x214] sm:$0xf]  ;;  %5457 = vmatpush.bf16.msrb.mxu2 %v7305_v0  ;;  %v7322_v14 = vld [vmem:[#allocation4 + $0xf8] sm:$0xff]  ;;  %v8495_v7 = vpop.f32.mrf.mxu1  ;;  %5413 = vmatpush.bf16.msra.mxu1 %v7292_v31 }
 0x13f   :  { %v6203_v57 = vor.u32 %v7141_v41, %v8462_v44  ;;  %5554 = vmatpush.bf16.msrb.mxu0 %v7322_v14  ;;  %v7309_v14 = vld [vmem:[#allocation4 + $0x90] sm:$0xff] }
 0x141   :  { %v8476_v55 = vpop.f32.mrf.mxu2 }
 0x142   :  { %v8474_v58 = vpop.f32.mrf.mxu3  ;;  %5458 = vmatpush.bf16.msrb.mxu2 %v7304_v9  ;;  %5414 = vmatpush.bf16.msra.mxu1 %v7291_v8 }
 0x143   :  { %5555 = vmatpush.bf16.msrb.mxu0 %v7321_v62 }
 0x146   :  { %v2687_v50 = vpop.f32.mrf.mxu0  ;;  %2784 = vmatmul.bf16.gmra.mxu2 %v6163_v48  ;;  %v7320_v48 = vld [vmem:[#allocation4 + $0xe8] sm:$0xff]  ;;  %v8505_v41 = vpop.f32.mrf.mxu1  ;;  %5603 = vmatpush.bf16.msrb.mxu1 %v7330_v18 }
 0x147   :  { %2833 = vmatmul.bf16.gmra.mxu3 %v6167_v17  ;;  %5459 = vmatpush.bf16.msrb.mxu2 %v7303_v53  ;;  %v7308_v53 = vld [vmem:[#allocation4 + $0x88] sm:$0xff]  ;;  %v2943_v18 = vpop.permute.xlu1 %2942 }
 0x148   :  { %5556 = vmatpush.bf16.msrb.mxu0 %v7320_v48  ;;  %v7315_v48 = vld [vmem:[#allocation4 + $0xc0] sm:$0xff] }
 0x149   :  { %2882 = vmatmul.bf16.gmra.mxu0 %v6171_v35  ;;  %v2589_v38 = vpop.f32.mrf.mxu2  ;;  %v7302_v35 = vld [vmem:[#allocation4 + $0x58] sm:$0xff] }
 0x14a   :  { %v2638_v46 = vpop.f32.mrf.mxu3  ;;  %v2590_v47 = vadd.f32 %v2589_v38, %v8245_v30  ;;  %v6199_v30 = vor.u32 %v7145_v23, %v6198_v51  ;;  %v7301_v38 = vld [vmem:[#allocation4 + $0x50] sm:$0xff]  ;;  %v7318_v51 = vld [vmem:[#allocation4 + $0xd8] sm:$0xff]  ;;  %v7300_v23 = vld [vmem:[#allocation4 + $0x48] sm:$0xff] }
 0x14b   :  { %5460 = vmatpush.bf16.msrb.mxu2 %v7302_v35 }
 0x14c   :  { %v2639_v49 = vadd.f32 %v2638_v46, %v2590_v47  ;;  %v7311_v47 = vld [vmem:[#allocation4 + $0xa0] sm:$0xff]  ;;  %5557 = vmatpush.bf16.msrb.mxu0 %v7319_v27 }
 0x14e   :  { %v8483_v19 = vpop.f32.mrf.mxu0  ;;  %v8485_v2 = vadd.f32 %v2687_v50, %v2639_v49  ;;  %v8511_v56 = vpop.f32.mrf.mxu1 }
 0x14f   :  { %5461 = vmatpush.bf16.msrb.mxu2 %v7301_v38  ;;  %v3282_v38 = vld [vmem:[#allocation2 + $0x4] sm:$0xf] }
 0x150   :  { %5558 = vmatpush.bf16.msrb.mxu0 %v7318_v51 }
 0x151   :  { %v8489_v60 = vpop.f32.mrf.mxu2 }
 0x152   :  { %v8487_v32 = vpop.f32.mrf.mxu3 }
 0x153   :  { %5462 = vmatpush.bf16.msrb.mxu2 %v7300_v23 }
 0x156   :  { %v2692_v63 = vpop.f32.mrf.mxu0  ;;  %2789 = vmatmul.bf16.gmra.mxu2 %v6199_v30 }
 0x157   :  { %2838 = vmatmul.bf16.gmra.mxu3 %v6203_v57 }
 0x159   :  { %2887 = vmatmul.bf16.gmra.mxu0 %v6207_v3  ;;  %v2594_v24 = vpop.f32.mrf.mxu2  ;;  %v7317_v3 = vld [vmem:[#allocation4 + $0xd0] sm:$0xff] }
 0x15a   :  { %v2643_v52 = vpop.f32.mrf.mxu3  ;;  %v2595_v44 = vadd.f32 %v2594_v24, %v8290_v54  ;;  %v7312_v54 = vld [vmem:[#allocation4 + $0xa8] sm:$0xff]  ;;  %5559 = vmatpush.bf16.msrb.mxu0 %v7317_v3 }
 0x15b   :  { %5507 = vmatpush.bf16.msrb.mxu3 %v7312_v54  ;;  %v7316_v24 = vld [vmem:[#allocation4 + $0xc8] sm:$0xff]  ;;  %v7307_v54 = vld [vmem:[#allocation4 + $0x80] sm:$0xff] }
 0x15c   :  { %v2644_v17 = vadd.f32 %v2643_v52, %v2595_v44  ;;  %v2928_v44 = vpop.permute.xlu0 %2927 }
 0x15e   :  { %v8497_v59 = vpop.f32.mrf.mxu0  ;;  %v8499_v29 = vadd.f32 %v2692_v63, %v2644_v17  ;;  %v7299_v63 = vld [vmem:[#allocation4 + $0x40] sm:$0xff]  ;;  %5560 = vmatpush.bf16.msrb.mxu0 %v7316_v24 }
 0x15f   :  { %5508 = vmatpush.bf16.msrb.mxu3 %v7311_v47  ;;  %5463 = vmatpush.bf16.msrb.mxu2 %v7299_v63 }
 0x161   :  { %v8503_v46 = vpop.f32.mrf.mxu2 }
 0x162   :  { %v8501_v50 = vpop.f32.mrf.mxu3  ;;  %5561 = vmatpush.bf16.msrb.mxu0 %v7315_v48 }
 0x163   :  { %5509 = vmatpush.bf16.msrb.mxu3 %v7310_v12 }
 0x164   :  { %v2933_v12 = vpop.permute.xlu0 %2932 }
 0x166   :  { %v2853_v49 = vpop.f32.mrf.mxu0 }
 0x167   :  { %5510 = vmatpush.bf16.msrb.mxu3 %v7309_v14 }
 0x169   :  { %v2755_v30 = vpop.f32.mrf.mxu2 }
 0x16a   :  { %v2804_v57 = vpop.f32.mrf.mxu3  ;;  %v2756_v0 = vadd.f32 %v2755_v30, %v2707_v42  ;;  %v3300_v42 = vshrl.u32 %v3282_v38, 16  ;;  %v8515_v30 = vpop.f32.mrf.mxu1 }
 0x16b   :  { %5511 = vmatpush.bf16.msrb.mxu3 %v7308_v53  ;;  %v2714_v53 = vadd.f32 %v8495_v7, %v8374_v4 }
 0x16c   :  { %v2805_v52 = vadd.f32 %v2804_v57, %v2756_v0  ;;  %v3303_v57 = vshll.u32 %v3282_v38, 16  ;;  %v3302_v8 = vrot.slane %v3300_v42, 4 }
 0x16e   :  { %v2855_v9 = vpop.f32.mrf.mxu0  ;;  %v2854_v43 = vadd.f32 %v2853_v49, %v2805_v52  ;;  %v3305_v24 = vrot.slane %v3303_v57, 5 }
 0x16f   :  { %5512 = vmatpush.bf16.msrb.mxu3 %v7307_v54  ;;  %v3083_v54 = vrot.slane %v7621_v36, 4 }
 0x170   :  { %v2893_v47 = vmax.f32 %v2854_v43, 0.0 }
 0x171   :  { %v2757_v17 = vpop.f32.mrf.mxu2 }
 0x172   :  { %v2806_v62 = vpop.f32.mrf.mxu3  ;;  %v2758_v31 = vadd.f32 %v2757_v17, %v2709_v6  ;;  %v3005_v0 = vmul.f32 %v2928_v44, %v2893_v47  ;;  %v3495_v6 = vld [vmem:[#allocation2 + $0x4] sm:$0x8]  ;;  %v8520_v38 = vpop.f32.mrf.mxu1 }
 0x173   :  { %v3513_v43 = vshrl.u32 %v3495_v6, 16 }
 0x174   :  { %v2807_v35 = vadd.f32 %v2806_v62, %v2758_v31  ;;  %v3306_v31 = vor.u32 %v3305_v24, %v3302_v8 }
 0x176   :  { %v2858_v27 = vpop.f32.mrf.mxu0  ;;  %v2856_v51 = vadd.f32 %v2855_v9, %v2807_v35 }
 0x178   :  { %v2894_v16 = vmax.f32 %v2856_v51, 0.0  ;;  %v8522_v51 = vrot.slane %v3513_v43, 11 }
 0x179   :  { %v2760_v49 = vpop.f32.mrf.mxu2 }
 0x17a   :  { %v2809_v23 = vpop.f32.mrf.mxu3  ;;  %v3006_v3 = vmul.f32 %v2933_v12, %v2894_v16  ;;  %v2761_v63 = vadd.f32 %v2760_v49, %v2712_v45  ;;  %v2717_v45 = vadd.f32 %v8505_v41, %v8400_v61 }
 0x17c   :  { %v7406_v14 = vpack.c.bf16 %v3006_v3, %v3005_v0  ;;  %v2810_v52 = vadd.f32 %v2809_v23, %v2761_v63 }
 0x17e   :  { %v2860_v9 = vpop.f32.mrf.mxu0  ;;  %7451 = vst [vmem:[#allocation2 + $0x8] sm:$0xff] %v7406_v14   ;;  %v2859_v62 = vadd.f32 %v2858_v27, %v2810_v52  ;;  %v8524_v27 = vrot.slane %v3306_v31, 4 }
 0x180   :  { %v2895_v48 = vmax.f32 %v2859_v62, 0.0 }
 0x181   :  { %v2762_v44 = vpop.f32.mrf.mxu2 }
 0x182   :  { %v2811_v17 = vpop.f32.mrf.mxu3  ;;  %v2763_v35 = vadd.f32 %v2762_v44, %v2714_v53  ;;  %v3007_v42 = vmul.f32 %v2938_v28, %v2895_v48 }
 0x184   :  { %v2812_v47 = vadd.f32 %v2811_v17, %v2763_v35 }
 0x185   :  { %v3251_v7 = vld [vmem:[#allocation2 + $0x8] sm:$0xf]  ;;  %v3497_v36 = vld [vmem:[#allocation2 + $0xc] sm:$0xf] }
 0x186   :  { %v2863_v4 = vpop.f32.mrf.mxu0  ;;  %v3055_v16 = vld [vmem:[#allocation2 + $0x8] sm:$0xf]  ;;  %v2861_v57 = vadd.f32 %v2860_v9, %v2812_v47  ;;  %3267 = vst [vmem:[#allocation3 + $0x28] sm:$0xf] %v3251_v7  ;;  %v3527_v63 = vshrl.u32 %v3497_v36, 16  ;;  %v3530_v14 = vshll.u32 %v3497_v36, 16 }
 0x187   :  { %v3496_v23 = vld [vmem:[#allocation2 + $0x8] sm:$0xf]  ;;  %v3085_v12 = vshrl.u32 %v3055_v16, 16  ;;  %v3088_v49 = vshll.u32 %v3055_v16, 16  ;;  %v3284_v61 = vld [vmem:[#allocation2 + $0xc] sm:$0xf] }
 0x188   :  { %v3518_v0 = vshrl.u32 %v3496_v23, 16  ;;  %v3521_v3 = vshll.u32 %v3496_v23, 16  ;;  %v3283_v52 = vld [vmem:[#allocation2 + $0x8] sm:$0xf]  ;;  %v2896_v8 = vmax.f32 %v2861_v57, 0.0  ;;  %v8530_v9 = vrot.slane %v3527_v63, 7 }
 0x189   :  { %v8528_v6 = vrot.slane %v3085_v12, 7  ;;  %v3309_v41 = vshll.u32 %v3283_v52, 16  ;;  %v3313_v62 = vshrl.u32 %v3283_v52, 16  ;;  %v2765_v53 = vpop.f32.mrf.mxu2  ;;  %v3319_v17 = vshll.u32 %v3284_v61, 16  ;;  %v3252_v43 = vld [vmem:[#allocation2 + $0xc] sm:$0xf] }
 0x18a   :  { %v2814_v24 = vpop.f32.mrf.mxu3  ;;  %v3520_v28 = vrot.slane %v3518_v0, 7  ;;  %v3323_v31 = vshrl.u32 %v3284_v61, 16  ;;  %v3008_v44 = vmul.f32 %v2943_v18, %v2896_v8  ;;  %v2766_v48 = vadd.f32 %v2765_v53, %v2717_v45  ;;  %3268 = vst [vmem:[#allocation3 + $0x4c] sm:$0xf] %v3252_v43  ;;  %v7219_v7 = vld [vmem:[#allocation3 + $0x4] sm:$0xf] }
 0x18b   :  { %v3090_v35 = vor.u32 %v3088_v49, %v8528_v6  ;;  %v3311_v47 = vrot.slane %v3309_v41, 5  ;;  %v3532_v57 = vor.u32 %v3530_v14, %v8530_v9  ;;  %v3315_v12 = vrot.slane %v3313_v62, 4  ;;  %v3056_v36 = vld [vmem:[#allocation2 + $0xc] sm:$0xf]  ;;  %v3724_v26 = vld [vmem:[#allocation2 + $0x8] sm:$0xf]  ;;  %v8541_v41 = vpop.f32.mrf.mxu1 }
 0x18c   :  { %v3523_v16 = vor.u32 %v3521_v3, %v3520_v28  ;;  %v3525_v23 = vrot.slane %v3520_v28, 4  ;;  %v7411_v52 = vpack.c.bf16 %v3008_v44, %v3007_v42  ;;  %v2815_v0 = vadd.f32 %v2814_v24, %v2766_v48  ;;  %v7329_v18 = vld [vmem:[#allocation4 + $0x130] sm:$0xff]  ;;  %v8546_v53 = vld [vmem:[#allocation2 + $0xc] sm:$0xf]  ;;  %v2948_v28 = vpop.permute.xlu2 %2947 }
 0x18d   :  { %v3091_v63 = vsel %vm7617_vm2, %v3083_v54, %v3090_v35  ;;  %v6503_v8 = vld [vmem:[#allocation3 + $0x24] sm:$0xf0]  ;;  %v3316_v3 = vor.u32 %v3315_v12, %v3311_v47  ;;  %v3321_v14 = vrot.slane %v3319_v17, 5  ;;  %v3312_v54 = vsel %vm7847_vm5, %v8524_v27, %v3311_v47  ;;  %5604 = vmatpush.bf16.msrb.mxu1 %v7329_v18 }
 0x18e   :  { %v2865_v61 = vpop.f32.mrf.mxu0  ;;  %3235 = vst [vmem:[#allocation3 + $0x24] sm:$0xf] %v3091_v63  ;;  %v3524_v45 = vsel %vm7617_vm2, %v8522_v51, %v3523_v16  ;;  %v3533_v49 = vsel %vm7617_vm2, %v3525_v23, %v3532_v57  ;;  %v2864_v42 = vadd.f32 %v2863_v4, %v2815_v0  ;;  %v6506_v24 = vor.u32 %v7219_v7, %v6503_v8  ;;  %v6501_v23 = vld [vmem:[#allocation3] sm:$0xf] }
 0x18f   :  { %7452 = vst [vmem:[#allocation2 + $0x10] sm:$0xff] %v7411_v52   ;;  %v3094_v62 = vshrl.u32 %v3056_v36, 16  ;;  %v2719_v51 = vadd.f32 %v8511_v56, %v8408_v37  ;;  %v3317_v43 = vrot.slane %v3316_v3, 4  ;;  %v3092_v17 = vrot.slane %v8528_v6, 4 }
 0x190   :  { %3676 = vst [vmem:[#allocation3 + $0xc] sm:$0xf] %v3524_v45  ;;  %v3325_v44 = vrot.slane %v3323_v31, 4  ;;  %5464 = vmatmul.bf16.vlgmr.msrb.gmra.mxu2 %v6506_v24  ;;  %v3097_v35 = vshll.u32 %v3056_v36, 16  ;;  %v3742_v27 = vshrl.u32 %v3724_v26, 16  ;;  %v3745_v47 = vshll.u32 %v3724_v26, 16 }
 0x191   :  { %3677 = vst [vmem:[#allocation3 + $0x30] sm:$0xf] %v3533_v49  ;;  %v8551_v48 = vrot.slane %v3094_v62, 7  ;;  %v2582_v7 = vadd.f32 %v8458_v11, %v8180_v25  ;;  %v2767_v16 = vpop.f32.mrf.mxu2  ;;  %v3322_v37 = vsel %vm7847_vm5, %v3317_v43, %v3321_v14  ;;  %v2897_v6 = vmax.f32 %v2864_v42, 0.0 }
 0x192   :  { %v2816_v4 = vpop.f32.mrf.mxu3  ;;  %3479 = vst [vmem:[#allocation3 + $0x8] sm:$0xf] %v3312_v54  ;;  %v3326_v56 = vor.u32 %v3325_v44, %v3321_v14  ;;  %v2768_v31 = vadd.f32 %v2767_v16, %v2719_v51  ;;  %v3534_v12 = vrot.slane %v8530_v9, 4  ;;  %v3744_v36 = vrot.slane %v3742_v27, 4 }
 0x193   :  { %3480 = vst [vmem:[#allocation3 + $0x2c] sm:$0xf] %v3322_v37  ;;  %v3099_v57 = vor.u32 %v3097_v35, %v8551_v48  ;;  %v3747_v52 = vrot.slane %v3745_v47, 5  ;;  %v3751_v26 = vshll.u32 %v8546_v53, 16  ;;  %v3755_v25 = vshrl.u32 %v8546_v53, 16  ;;  %v8571_v27 = vpop.f32.mrf.mxu1 }
 0x194   :  { %v2817_v11 = vadd.f32 %v2816_v4, %v2768_v31  ;;  %v3101_v8 = vrot.slane %v8551_v48, 4  ;;  %v8564_v45 = vrot.slane %v3326_v56, 4  ;;  %v2722_v43 = vadd.f32 %v8515_v30, %v8433_v10 }
 0x195   :  { %v7223_v0 = vld [vmem:[#allocation3 + $0x20] sm:$0xf0]  ;;  %v3100_v63 = vsel %vm7617_vm2, %v3092_v17, %v3099_v57  ;;  %v3748_v24 = vor.u32 %v3747_v52, %v3744_v36  ;;  %v8569_v17 = vadd.f32 %v8454_v20, %v2582_v7  ;;  %v3009_v44 = vmul.f32 %v2948_v28, %v2897_v6 }
 0x196   :  { %v2868_v49 = vpop.f32.mrf.mxu0  ;;  %v6502_v3 = vor.u32 %v7223_v0, %v6501_v23  ;;  %v3253_v14 = vld [vmem:[#allocation2 + $0x10] sm:$0xf]  ;;  %3236 = vst [vmem:[#allocation3 + $0x48] sm:$0xf] %v3100_v63  ;;  %v2866_v54 = vadd.f32 %v2865_v61, %v2817_v11  ;;  %v3499_v35 = vld [vmem:[#allocation2 + $0x14] sm:$0xf]  ;;  %v2953_v23 = vpop.permute.xlu2 %2952  ;;  %v8630_v53 = vadd.f32 %v8476_v55, %v8222_v33 }
 0x197   :  { %v3057_v42 = vld [vmem:[#allocation2 + $0x10] sm:$0xf]  ;;  %v7220_v62 = vld [vmem:[#allocation3 + $0xc] sm:$0xf]  ;;  %3269 = vst [vmem:[#allocation3 + $0x70] sm:$0xf] %v3253_v14 }
 0x198   :  { %v3103_v18 = vshrl.u32 %v3057_v42, 16  ;;  %v3106_v51 = vshll.u32 %v3057_v42, 16  ;;  %5415 = vmatmul.bf16.vlgmr.msra.gmra.mxu1 %v6502_v3  ;;  %v6511_v4 = vld [vmem:[#allocation3 + $0x2c] sm:$0xf0]  ;;  %v3498_v48 = vld [vmem:[#allocation2 + $0x10] sm:$0xf] }
 0x199   :  { %v2898_v47 = vmax.f32 %v2866_v54, 0.0  ;;  %v6514_v16 = vor.u32 %v7220_v62, %v6511_v4  ;;  %v6509_v37 = vld [vmem:[#allocation3 + $0x8] sm:$0xf]  ;;  %v3536_v31 = vshrl.u32 %v3498_v48, 16  ;;  %v2770_v57 = vpop.f32.mrf.mxu2  ;;  %v3539_v30 = vshll.u32 %v3498_v48, 16 }
 0x19a   :  { %v2819_v61 = vpop.f32.mrf.mxu3  ;;  %v8573_v56 = vrot.slane %v3103_v18, 7  ;;  %v7224_v10 = vld [vmem:[#allocation3 + $0x28] sm:$0xf0]  ;;  %v3545_v20 = vshrl.u32 %v3499_v35, 16  ;;  %v3548_v7 = vshll.u32 %v3499_v35, 16  ;;  %v8575_v28 = vrot.slane %v3748_v24, 4 }
 0x19b   :  { %v3010_v6 = vmul.f32 %v2953_v23, %v2898_v47  ;;  %5562 = vmatmul.bf16.vlgmr.msrb.gmra.mxu0 %v6514_v16  ;;  %v2771_v36 = vadd.f32 %v2770_v57, %v2722_v43  ;;  %v6510_v52 = vor.u32 %v7224_v10, %v6509_v37  ;;  %v3285_v0 = vld [vmem:[#allocation2 + $0x10] sm:$0xf]  ;;  %v3286_v63 = vld [vmem:[#allocation2 + $0x14] sm:$0xf]  ;;  %v3538_v14 = vrot.slane %v3536_v31, 7 }
 0x19c   :  { %v3108_v11 = vor.u32 %v3106_v51, %v8573_v56  ;;  %v3254_v3 = vld [vmem:[#allocation2 + $0x14] sm:$0xf]  ;;  %v8578_v42 = vrot.slane %v3545_v20, 7  ;;  %v3329_v54 = vshll.u32 %v3285_v0, 16  ;;  %v3333_v62 = vshrl.u32 %v3285_v0, 16 }
 0x19d   :  { %3270 = vst [vmem:[#allocation3 + $0x94] sm:$0xf] %v3254_v3  ;;  %v7416_v18 = vpack.c.bf16 %v3010_v6, %v3009_v44  ;;  %v2820_v4 = vadd.f32 %v2819_v61, %v2771_v36  ;;  %5513 = vmatmul.bf16.vlgmr.msrb.gmra.mxu3 %v6510_v52  ;;  %v7228_v24 = vld [vmem:[#allocation3 + $0x4c] sm:$0xf]  ;;  %v3339_v43 = vshll.u32 %v3286_v63, 16  ;;  %v3541_v16 = vor.u32 %v3539_v30, %v3538_v14 }
 0x19e   :  { %v3109_v48 = vsel %vm7617_vm2, %v3101_v8, %v3108_v11  ;;  %v3058_v35 = vld [vmem:[#allocation2 + $0x14] sm:$0xf]  ;;  %v2870_v47 = vpop.f32.mrf.mxu0  ;;  %v6539_v51 = vld [vmem:[#allocation3 + $0x6c] sm:$0xf0]  ;;  %v3543_v37 = vrot.slane %v3538_v14, 4  ;;  %v3550_v31 = vor.u32 %v3548_v7, %v8578_v42  ;;  %v3331_v23 = vrot.slane %v3329_v54, 5 }
 0x19f   :  { %3237 = vst [vmem:[#allocation3 + $0x6c] sm:$0xf] %v3109_v48  ;;  %v2869_v57 = vadd.f32 %v2868_v49, %v2820_v4  ;;  %v6542_v10 = vor.u32 %v7228_v24, %v6539_v51  ;;  %v3335_v44 = vrot.slane %v3333_v62, 4  ;;  %v7328_v61 = vld [vmem:[#allocation4 + $0x128] sm:$0xff]  ;;  %v8585_v20 = vrot.slane %v3751_v26, 5 }
 0x1a0   :  { %7453 = vst [vmem:[#allocation2 + $0x18] sm:$0xff] %v7416_v18   ;;  %v3542_v8 = vsel %vm7617_vm2, %v3534_v12, %v3541_v16  ;;  %v3551_v30 = vsel %vm7617_vm2, %v3543_v37, %v3550_v31  ;;  %v3332_v7 = vsel %vm7847_vm5, %v8564_v45, %v3331_v23  ;;  %v3343_v49 = vshrl.u32 %v3286_v63, 16  ;;  %5605 = vmatpush.bf16.msrb.mxu1 %v7328_v61  ;;  %v8598_v9 = vld [vmem:[#allocation2 + $0x10] sm:$0xf]  ;;  %v6537_v3 = vld [vmem:[#allocation3 + $0x48] sm:$0xf] }
 0x1a1   :  { %v2724_v6 = vadd.f32 %v8520_v38, %v8440_v5  ;;  %5469 = vmatmul.bf16.gmra.mxu2 %v6542_v10  ;;  %3678 = vst [vmem:[#allocation3 + $0x54] sm:$0xf] %v3542_v8  ;;  %v3336_v26 = vor.u32 %v3335_v44, %v3331_v23  ;;  %v3112_v52 = vshrl.u32 %v3058_v35, 16  ;;  %v2680_v12 = vadd.f32 %v8450_v15, %v8569_v17  ;;  %v2772_v11 = vpop.f32.mrf.mxu2  ;;  %v3692_v38 = vld [vmem:[#allocation2 + $0x8] sm:$0xf]  ;;  %v8611_v15 = vpop.f32.mrf.mxu1 }
 0x1a2   :  { %v2821_v36 = vpop.f32.mrf.mxu3  ;;  %3679 = vst [vmem:[#allocation3 + $0x78] sm:$0xf] %v3551_v30  ;;  %v8602_v0 = vrot.slane %v3339_v43, 5  ;;  %v3110_v45 = vrot.slane %v8573_v56, 4  ;;  %v3754_v5 = vsel %vm7847_vm5, %v8575_v28, %v8585_v20  ;;  %v3115_v62 = vshll.u32 %v3058_v35, 16 }
 0x1a3   :  { %v2773_v63 = vadd.f32 %v2772_v11, %v2724_v6  ;;  %v3337_v14 = vrot.slane %v3336_v26, 4  ;;  %3481 = vst [vmem:[#allocation3 + $0x50] sm:$0xf] %v3332_v7  ;;  %v8609_v54 = vrot.slane %v3112_v52, 7  ;;  %v2899_v17 = vmax.f32 %v2869_v57, 0.0  ;;  %v2958_v57 = vpop.permute.xlu0 %2957  ;;  %v2963_v52 = vpop.permute.xlu1 %2962 }
 0x1a4   :  { %v3552_v18 = vrot.slane %v8578_v42, 4  ;;  %v3345_v4 = vrot.slane %v3343_v49, 4  ;;  %v8616_v56 = vrot.slane %v3755_v25, 4  ;;  %3921 = vst [vmem:[#allocation3 + $0x14] sm:$0xf] %v3754_v5  ;;  %v3761_v35 = vshll.u32 %v8598_v9, 16 }
 0x1a5   :  { %v2822_v28 = vadd.f32 %v2821_v36, %v2773_v63  ;;  %v3342_v48 = vsel %vm7847_vm5, %v3337_v14, %v8602_v0  ;;  %v3117_v43 = vor.u32 %v3115_v62, %v8609_v54  ;;  %3708 = vst [vmem:[#allocation3 + $0x10] sm:$0xf] %v3692_v38  ;;  %v2727_v51 = vadd.f32 %v8541_v41, %v8452_v40 }
 0x1a6   :  { %v7232_v24 = vld [vmem:[#allocation3 + $0x68] sm:$0xf0]  ;;  %v8626_v16 = vadd.f32 %v8571_v27, %v2680_v12  ;;  %v2873_v25 = vpop.f32.mrf.mxu0  ;;  %3482 = vst [vmem:[#allocation3 + $0x74] sm:$0xf] %v3342_v48  ;;  %v3119_v40 = vrot.slane %v8609_v54, 4  ;;  %v3011_v61 = vmul.f32 %v2958_v57, %v2899_v17  ;;  %v3346_v55 = vor.u32 %v3345_v4, %v8602_v0 }
 0x1a7   :  { %v6538_v37 = vor.u32 %v7232_v24, %v6537_v3  ;;  %v3255_v31 = vld [vmem:[#allocation2 + $0x18] sm:$0xf]  ;;  %v2871_v10 = vadd.f32 %v2870_v47, %v2822_v28  ;;  %v3118_v44 = vsel %vm7617_vm2, %v3110_v45, %v3117_v43  ;;  %v3501_v33 = vld [vmem:[#allocation2 + $0x1c] sm:$0xf]  ;;  %v3758_v30 = vor.u32 %v8616_v56, %v8585_v20  ;;  %v7237_v4 = vld [vmem:[#allocation3 + $0x94] sm:$0xf] }
 0x1a8   :  { %v3059_v23 = vld [vmem:[#allocation2 + $0x18] sm:$0xf]  ;;  %3271 = vst [vmem:[#allocation3 + $0xb8] sm:$0xf] %v3255_v31  ;;  %v7229_v8 = vld [vmem:[#allocation3 + $0x54] sm:$0xf] }
 0x1a9   :  { %v3121_v41 = vshrl.u32 %v3059_v23, 16  ;;  %v3500_v27 = vld [vmem:[#allocation2 + $0x18] sm:$0xf]  ;;  %5420 = vmatmul.bf16.gmra.mxu1 %v6538_v37  ;;  %3238 = vst [vmem:[#allocation3 + $0x90] sm:$0xf] %v3118_v44  ;;  %v2900_v7 = vmax.f32 %v2871_v10, 0.0  ;;  %v2775_v11 = vpop.f32.mrf.mxu2 }
 0x1aa   :  { %v6547_v47 = vld [vmem:[#allocation3 + $0x74] sm:$0xf0]  ;;  %v2824_v49 = vpop.f32.mrf.mxu3  ;;  %v3124_v36 = vshll.u32 %v3059_v23, 16  ;;  %v3554_v26 = vshrl.u32 %v3500_v27, 16  ;;  %v3557_v45 = vshll.u32 %v3500_v27, 16  ;;  %v3563_v5 = vshrl.u32 %v3501_v33, 16 }
 0x1ab   :  { %v8638_v6 = vrot.slane %v3121_v41, 7  ;;  %v6550_v12 = vor.u32 %v7229_v8, %v6547_v47  ;;  %v3566_v38 = vshll.u32 %v3501_v33, 16  ;;  %v3287_v63 = vld [vmem:[#allocation2 + $0x18] sm:$0xf]  ;;  %v3012_v3 = vmul.f32 %v2963_v52, %v2900_v7  ;;  %v6545_v0 = vld [vmem:[#allocation3 + $0x50] sm:$0xf]  ;;  %v8645_v41 = vpop.f32.mrf.mxu1 }
 0x1ac   :  { %v2776_v14 = vadd.f32 %v2775_v11, %v2727_v51  ;;  %v3556_v62 = vrot.slane %v3554_v26, 7  ;;  %v3256_v17 = vld [vmem:[#allocation2 + $0x1c] sm:$0xf]  ;;  %v8641_v28 = vrot.slane %v3563_v5, 7  ;;  %v3347_v24 = vrot.slane %v3346_v55, 4  ;;  %v7327_v26 = vld [vmem:[#allocation4 + $0x120] sm:$0xff] }
 0x1ad   :  { %v3126_v54 = vor.u32 %v3124_v36, %v8638_v6  ;;  %5567 = vmatmul.bf16.gmra.mxu0 %v6550_v12  ;;  %v3349_v48 = vshll.u32 %v3287_v63, 16  ;;  %v3353_v43 = vshrl.u32 %v3287_v63, 16  ;;  %3272 = vst [vmem:[#allocation3 + $0xdc] sm:$0xf] %v3256_v17  ;;  %v7421_v37 = vpack.c.bf16 %v3012_v3, %v3011_v61  ;;  %v7233_v23 = vld [vmem:[#allocation3 + $0x70] sm:$0xf0]  ;;  %5606 = vmatpush.bf16.msrb.mxu1 %v7327_v26 }
 0x1ae   :  { %v2825_v31 = vadd.f32 %v2824_v49, %v2776_v14  ;;  %v3559_v51 = vor.u32 %v3557_v45, %v3556_v62  ;;  %v3288_v10 = vld [vmem:[#allocation2 + $0x1c] sm:$0xf]  ;;  %v6546_v27 = vor.u32 %v7233_v23, %v6545_v0  ;;  %v2875_v8 = vpop.f32.mrf.mxu0  ;;  %v3561_v7 = vrot.slane %v3556_v62, 4  ;;  %v3693_v5 = vld [vmem:[#allocation2 + $0xc] sm:$0xf] }
 0x1af   :  { %v3127_v57 = vsel %vm7617_vm2, %v3119_v40, %v3126_v54  ;;  %v3060_v44 = vld [vmem:[#allocation2 + $0x1c] sm:$0xf]  ;;  %v6575_v33 = vld [vmem:[#allocation3 + $0xb4] sm:$0xf0]  ;;  %v3568_v55 = vor.u32 %v3566_v38, %v8641_v28  ;;  %v3351_v47 = vrot.slane %v3349_v48, 5  ;;  %7454 = vst [vmem:[#allocation2 + $0x20] sm:$0xff] %v7421_v37  }
 0x1b0   :  { %3239 = vst [vmem:[#allocation3 + $0xb4] sm:$0xf] %v3127_v57  ;;  %v2874_v61 = vadd.f32 %v2873_v25, %v2825_v31  ;;  %v6578_v49 = vor.u32 %v7237_v4, %v6575_v33  ;;  %v3560_v40 = vsel %vm7617_vm2, %v3552_v18, %v3559_v51  ;;  %v3355_v36 = vrot.slane %v3353_v43, 4  ;;  %5518 = vmatmul.bf16.gmra.mxu3 %v6546_v27  ;;  %v4134_v63 = vld [vmem:[#allocation2 + $0xc] sm:$0xf] }
 0x1b1   :  { %v3569_v52 = vsel %vm7617_vm2, %v3561_v7, %v3568_v55  ;;  %3680 = vst [vmem:[#allocation3 + $0x9c] sm:$0xf] %v3560_v40  ;;  %v3352_v12 = vsel %vm7847_vm5, %v3347_v24, %v3351_v47  ;;  %v3359_v11 = vshll.u32 %v3288_v10, 16  ;;  %v3363_v45 = vshrl.u32 %v3288_v10, 16  ;;  %v2777_v3 = vpop.f32.mrf.mxu2 }
 0x1b2   :  { %v2636_v25 = vadd.f32 %v8474_v58, %v8630_v53  ;;  %5474 = vmatmul.bf16.gmra.mxu2 %v6578_v49  ;;  %v2826_v42 = vpop.f32.mrf.mxu3  ;;  %3681 = vst [vmem:[#allocation3 + $0xc0] sm:$0xf] %v3569_v52  ;;  %v3356_v18 = vor.u32 %v3355_v36, %v3351_v47  ;;  %v3130_v38 = vshrl.u32 %v3060_v44, 16  ;;  %v3128_v0 = vrot.slane %v8638_v6, 4  ;;  %v6573_v53 = vld [vmem:[#allocation3 + $0x90] sm:$0xf] }
 0x1b3   :  { %v3361_v14 = vrot.slane %v3359_v11, 5  ;;  %3483 = vst [vmem:[#allocation3 + $0x98] sm:$0xf] %v3352_v12  ;;  %v3365_v54 = vrot.slane %v3363_v45, 4  ;;  %v8662_v62 = vrot.slane %v3758_v30, 4  ;;  %v2778_v58 = vadd.f32 %v2777_v3, %v8626_v16  ;;  %v2973_v45 = vpop.permute.xlu0 %2972 }
 0x1b4   :  { %v3357_v17 = vrot.slane %v3356_v18, 4  ;;  %v8665_v4 = vrot.slane %v3130_v38, 7  ;;  %v3133_v24 = vshll.u32 %v3060_v44, 16  ;;  %3709 = vst [vmem:[#allocation3 + $0x34] sm:$0xf] %v3693_v5  ;;  %v2901_v48 = vmax.f32 %v2874_v61, 0.0  ;;  %v2968_v44 = vpop.permute.xlu2 %2967 }
 0x1b5   :  { %v8669_v43 = vrot.slane %v3761_v35, 5  ;;  %v4135_v6 = vld [vmem:[#allocation2 + $0x10] sm:$0xf]  ;;  %4150 = vst [vmem:[#allocation3 + $0x1c] sm:$0xf] %v4134_v63  ;;  %v2827_v37 = vadd.f32 %v2826_v42, %v2778_v58  ;;  %v3570_v16 = vrot.slane %v8641_v28, 4  ;;  %v2732_v30 = vadd.f32 %v8611_v15, %v8472_v13  ;;  %v8685_v15 = vpop.f32.mrf.mxu1 }
 0x1b6   :  { %v3362_v20 = vsel %vm7847_vm5, %v3357_v17, %v3361_v14  ;;  %v3135_v56 = vor.u32 %v3133_v24, %v8665_v4  ;;  %4151 = vst [vmem:[#allocation3 + $0x40] sm:$0xf] %v4135_v6  ;;  %v8678_v23 = vadd.f32 %v8467_v39, %v2636_v25  ;;  %v8680_v9 = vpop.f32.mrf.mxu0  ;;  %v3257_v57 = vld [vmem:[#allocation2 + $0x20] sm:$0xf]  ;;  %v3366_v10 = vor.u32 %v3365_v54, %v3361_v14  ;;  %v3503_v11 = vld [vmem:[#allocation2 + $0x24] sm:$0xf] }
 0x1b7   :  { %v7241_v31 = vld [vmem:[#allocation3 + $0xb0] sm:$0xf0]  ;;  %3484 = vst [vmem:[#allocation3 + $0xbc] sm:$0xf] %v3362_v20  ;;  %v3061_v51 = vld [vmem:[#allocation2 + $0x20] sm:$0xf]  ;;  %v2876_v27 = vadd.f32 %v2875_v8, %v2827_v37  ;;  %v2592_v39 = vadd.f32 %v8489_v60, %v8267_v1  ;;  %v3013_v47 = vmul.f32 %v2968_v44, %v2901_v48  ;;  %v3764_v8 = vsel %vm7847_vm5, %v8662_v62, %v8669_v43 }
 0x1b8   :  { %v6574_v35 = vor.u32 %v7241_v31, %v6573_v53  ;;  %v7238_v33 = vld [vmem:[#allocation3 + $0x9c] sm:$0xf]  ;;  %3273 = vst [vmem:[#allocation3 + $0x100] sm:$0xf] %v3257_v57  ;;  %v3136_v7 = vsel %vm7617_vm2, %v3128_v0, %v3135_v56  ;;  %v3137_v55 = vrot.slane %v8665_v4, 4  ;;  %v3139_v13 = vshrl.u32 %v3061_v51, 16 }
 0x1b9   :  { %v6583_v61 = vld [vmem:[#allocation3 + $0xbc] sm:$0xf0]  ;;  %3240 = vst [vmem:[#allocation3 + $0xd8] sm:$0xf] %v3136_v7  ;;  %v3502_v49 = vld [vmem:[#allocation2 + $0x20] sm:$0xf]  ;;  %v2780_v5 = vpop.f32.mrf.mxu2  ;;  %v2641_v44 = vadd.f32 %v8487_v32, %v2592_v39 }
 0x1ba   :  { %5425 = vmatmul.bf16.gmra.mxu1 %v6574_v35  ;;  %v2902_v40 = vmax.f32 %v2876_v27, 0.0  ;;  %v6586_v36 = vor.u32 %v7238_v33, %v6583_v61  ;;  %v2829_v26 = vpop.f32.mrf.mxu3  ;;  %v8693_v52 = vrot.slane %v3139_v13, 7  ;;  %v3142_v12 = vshll.u32 %v3061_v51, 16  ;;  %v3289_v18 = vld [vmem:[#allocation2 + $0x20] sm:$0xf] }
 0x1bb   :  { %v3572_v1 = vshrl.u32 %v3502_v49, 16  ;;  %v3575_v60 = vshll.u32 %v3502_v49, 16  ;;  %v3581_v25 = vshrl.u32 %v3503_v11, 16  ;;  %v3584_v42 = vshll.u32 %v3503_v11, 16  ;;  %v3290_v14 = vld [vmem:[#allocation2 + $0x24] sm:$0xf] }
 0x1bc   :  { %v3014_v38 = vmul.f32 %v2973_v45, %v2902_v40  ;;  %v2781_v63 = vadd.f32 %v2780_v5, %v2732_v30  ;;  %v3144_v3 = vor.u32 %v3142_v12, %v8693_v52  ;;  %v3367_v0 = vrot.slane %v3366_v10, 4  ;;  %v3258_v54 = vld [vmem:[#allocation2 + $0x24] sm:$0xf]  ;;  %v7246_v62 = vld [vmem:[#allocation3 + $0xdc] sm:$0xf] }
 0x1bd   :  { %5572 = vmatmul.bf16.gmra.mxu0 %v6586_v36  ;;  %v3574_v58 = vrot.slane %v3572_v1, 7  ;;  %v8696_v53 = vrot.slane %v3581_v25, 7  ;;  %v3369_v17 = vshll.u32 %v3289_v18, 16  ;;  %v3373_v4 = vshrl.u32 %v3289_v18, 16  ;;  %3274 = vst [vmem:[#allocation3 + $0x124] sm:$0xf] %v3258_v54 }
 0x1be   :  { %v7426_v24 = vpack.c.bf16 %v3014_v38, %v3013_v47  ;;  %v2830_v48 = vadd.f32 %v2829_v26, %v2781_v63  ;;  %v6581_v6 = vld [vmem:[#allocation3 + $0x98] sm:$0xf]  ;;  %v7242_v37 = vld [vmem:[#allocation3 + $0xb8] sm:$0xf0]  ;;  %v3145_v31 = vsel %vm7617_vm2, %v3137_v55, %v3144_v3  ;;  %v3379_v20 = vshll.u32 %v3290_v14, 16  ;;  %v2880_v30 = vpop.f32.mrf.mxu0 }
 0x1bf   :  { %v6582_v56 = vor.u32 %v7242_v37, %v6581_v6  ;;  %v6611_v35 = vld [vmem:[#allocation3 + $0xfc] sm:$0xf0]  ;;  %3241 = vst [vmem:[#allocation3 + $0xfc] sm:$0xf] %v3145_v31  ;;  %v3577_v57 = vor.u32 %v3575_v60, %v3574_v58  ;;  %v3579_v51 = vrot.slane %v3574_v58, 4  ;;  %v3586_v10 = vor.u32 %v3584_v42, %v8696_v53  ;;  %v7326_v47 = vld [vmem:[#allocation4 + $0x118] sm:$0xff] }
 0x1c0   :  { %7455 = vst [vmem:[#allocation2 + $0x28] sm:$0xff] %v7426_v24   ;;  %v6614_v27 = vor.u32 %v7246_v62, %v6611_v35  ;;  %v3371_v33 = vrot.slane %v3369_v17, 5  ;;  %v3375_v7 = vrot.slane %v3373_v4, 4  ;;  %v3062_v13 = vld [vmem:[#allocation2 + $0x24] sm:$0xf]  ;;  %v2734_v55 = vadd.f32 %v8645_v41, %v8678_v23  ;;  %5607 = vmatpush.bf16.msrb.mxu1 %v7326_v47  ;;  %v2738_v23 = vpop.f32.mrf.mxu1  ;;  %v2978_v24 = vpop.permute.xlu1 %2977 }
 0x1c1   :  { %5523 = vmatmul.bf16.gmra.mxu3 %v6582_v56  ;;  %v3578_v61 = vsel %vm7617_vm2, %v3570_v16, %v3577_v57  ;;  %v3587_v49 = vsel %vm7617_vm2, %v3579_v51, %v3586_v10  ;;  %v3383_v40 = vshrl.u32 %v3290_v14, 16  ;;  %3922 = vst [vmem:[#allocation3 + $0x38] sm:$0xf] %v3764_v8  ;;  %v2879_v32 = vadd.f32 %v8680_v9, %v2830_v48  ;;  %v2782_v28 = vpop.f32.mrf.mxu2  ;;  %v6609_v42 = vld [vmem:[#allocation3 + $0xd8] sm:$0xf] }
 0x1c2   :  { %5479 = vmatmul.bf16.gmra.mxu2 %v6614_v27  ;;  %v2831_v39 = vpop.f32.mrf.mxu3  ;;  %3682 = vst [vmem:[#allocation3 + $0xe4] sm:$0xf] %v3578_v61  ;;  %v3372_v36 = vsel %vm7847_vm5, %v3367_v0, %v3371_v33  ;;  %v3376_v41 = vor.u32 %v3375_v7, %v3371_v33  ;;  %v3148_v26 = vshrl.u32 %v3062_v13, 16  ;;  %v2690_v16 = vadd.f32 %v8483_v19, %v2641_v44 }
 0x1c3   :  { %3683 = vst [vmem:[#allocation3 + $0x108] sm:$0xf] %v3587_v49  ;;  %v2783_v12 = vadd.f32 %v2782_v28, %v2734_v55  ;;  %v3381_v45 = vrot.slane %v3379_v20, 5  ;;  %v3146_v9 = vrot.slane %v8693_v52, 4  ;;  %v3151_v5 = vshll.u32 %v3062_v13, 16 }
 0x1c4   :  { %v3377_v11 = vrot.slane %v3376_v41, 4  ;;  %3485 = vst [vmem:[#allocation3 + $0xe0] sm:$0xf] %v3372_v36  ;;  %v3150_v8 = vrot.slane %v3148_v26, 7  ;;  %v3385_v1 = vrot.slane %v3383_v40, 4  ;;  %v2903_v60 = vmax.f32 %v2879_v32, 0.0 }
 0x1c5   :  { %v2832_v25 = vadd.f32 %v2831_v39, %v2783_v12  ;;  %v3588_v63 = vrot.slane %v8696_v53, 4  ;;  %v2737_v17 = vadd.f32 %v8685_v15, %v8485_v2  ;;  %v8720_v4 = vadd.f32 %v2738_v23, %v2690_v16  ;;  %v2983_v15 = vpop.permute.xlu2 %2982  ;;  %v7255_v39 = vld [vmem:[#allocation3 + $0x124] sm:$0xf] }
 0x1c6   :  { %v7250_v18 = vld [vmem:[#allocation3 + $0xf8] sm:$0xf0]  ;;  %v3382_v38 = vsel %vm7847_vm5, %v3377_v11, %v3381_v45  ;;  %v3153_v0 = vor.u32 %v3151_v5, %v3150_v8  ;;  %v3155_v52 = vrot.slane %v3150_v8, 4  ;;  %v2883_v48 = vpop.f32.mrf.mxu0  ;;  %v3386_v56 = vor.u32 %v3385_v1, %v3381_v45 }
 0x1c7   :  { %v6610_v3 = vor.u32 %v7250_v18, %v6609_v42  ;;  %3486 = vst [vmem:[#allocation3 + $0x104] sm:$0xf] %v3382_v38  ;;  %v3259_v19 = vld [vmem:[#allocation2 + $0x28] sm:$0xf]  ;;  %v2881_v54 = vadd.f32 %v2880_v30, %v2832_v25  ;;  %v3505_v20 = vld [vmem:[#allocation2 + $0x2c] sm:$0xf]  ;;  %v2597_v30 = vadd.f32 %v8503_v46, %v8307_v22  ;;  %v3015_v35 = vmul.f32 %v2978_v24, %v2903_v60 }
 0x1c8   :  { %v3063_v14 = vld [vmem:[#allocation2 + $0x28] sm:$0xf]  ;;  %3275 = vst [vmem:[#allocation3 + $0x148] sm:$0xf] %v3259_v19  ;;  %v3154_v37 = vsel %vm7617_vm2, %v3146_v9, %v3153_v0  ;;  %v3599_v13 = vshrl.u32 %v3505_v20, 16  ;;  %v3602_v40 = vshll.u32 %v3505_v20, 16  ;;  %v8729_v32 = vpop.f32.mrf.mxu1 }
 0x1c9   :  { %v3157_v62 = vshrl.u32 %v3063_v14, 16  ;;  %v3160_v58 = vshll.u32 %v3063_v14, 16  ;;  %v7247_v6 = vld [vmem:[#allocation3 + $0xe4] sm:$0xf]  ;;  %v3504_v31 = vld [vmem:[#allocation2 + $0x28] sm:$0xf]  ;;  %v2785_v27 = vpop.f32.mrf.mxu2  ;;  %v2646_v42 = vadd.f32 %v8501_v50, %v2597_v30 }
 0x1ca   :  { %5430 = vmatmul.bf16.gmra.mxu1 %v6610_v3  ;;  %v2904_v57 = vmax.f32 %v2881_v54, 0.0  ;;  %v6619_v51 = vld [vmem:[#allocation3 + $0x104] sm:$0xf0]  ;;  %v2834_v10 = vpop.f32.mrf.mxu3  ;;  %3242 = vst [vmem:[#allocation3 + $0x120] sm:$0xf] %v3154_v37  ;;  %v3590_v33 = vshrl.u32 %v3504_v31, 16  ;;  %v2786_v55 = vadd.f32 %v2785_v27, %v2737_v17 }
 0x1cb   :  { %v8726_v2 = vrot.slane %v3157_v62, 7  ;;  %v6622_v44 = vor.u32 %v7247_v6, %v6619_v51  ;;  %v3593_v7 = vshll.u32 %v3504_v31, 16  ;;  %v6617_v61 = vld [vmem:[#allocation3 + $0xe0] sm:$0xf]  ;;  %v3291_v22 = vld [vmem:[#allocation2 + $0x28] sm:$0xf] }
 0x1cc   :  { %v3016_v47 = vmul.f32 %v2983_v15, %v2904_v57  ;;  %v3292_v46 = vld [vmem:[#allocation2 + $0x2c] sm:$0xf]  ;;  %v3592_v36 = vrot.slane %v3590_v33, 7  ;;  %v8731_v41 = vrot.slane %v3599_v13, 7  ;;  %v3387_v23 = vrot.slane %v3386_v56, 4  ;;  %v7325_v14 = vld [vmem:[#allocation4 + $0x110] sm:$0xff] }
 0x1cd   :  { %v3162_v49 = vor.u32 %v3160_v58, %v8726_v2  ;;  %5577 = vmatmul.bf16.gmra.mxu0 %v6622_v44  ;;  %v3389_v28 = vshll.u32 %v3291_v22, 16  ;;  %v3260_v26 = vld [vmem:[#allocation2 + $0x2c] sm:$0xf]  ;;  %v2835_v12 = vadd.f32 %v2834_v10, %v2786_v55  ;;  %v3393_v9 = vshrl.u32 %v3291_v22, 16  ;;  %5608 = vmatpush.bf16.msrb.mxu1 %v7325_v14 }
 0x1ce   :  { %v7431_v16 = vpack.c.bf16 %v3016_v47, %v3015_v35  ;;  %v7251_v11 = vld [vmem:[#allocation3 + $0x100] sm:$0xf0]  ;;  %3276 = vst [vmem:[#allocation3 + $0x16c] sm:$0xf] %v3260_v26  ;;  %v3595_v1 = vor.u32 %v3593_v7, %v3592_v36  ;;  %v3597_v60 = vrot.slane %v3592_v36, 4  ;;  %v3604_v25 = vor.u32 %v3602_v40, %v8731_v41  ;;  %v7338_v6 = vld [vmem:[#allocation4 + $0x178] sm:$0xff]  ;;  %v2885_v37 = vpop.f32.mrf.mxu0 }
 0x1cf   :  { %v3163_v45 = vsel %vm7617_vm2, %v3155_v52, %v3162_v49  ;;  %v6618_v8 = vor.u32 %v7251_v11, %v6617_v61  ;;  %v6647_v5 = vld [vmem:[#allocation3 + $0x144] sm:$0xf0]  ;;  %v3391_v38 = vrot.slane %v3389_v28, 5  ;;  %v3395_v3 = vrot.slane %v3393_v9, 4  ;;  %v3064_v19 = vld [vmem:[#allocation2 + $0x2c] sm:$0xf]  ;;  %5652 = vmatpush.bf16.msra.mxu2 %v7338_v6  ;;  %v2993_v11 = vpop.permute.xlu1 %2992 }
 0x1d0   :  { %3243 = vst [vmem:[#allocation3 + $0x144] sm:$0xf] %v3163_v45  ;;  %v6650_v18 = vor.u32 %v7255_v39, %v6647_v5  ;;  %v3596_v0 = vsel %vm7617_vm2, %v3588_v63, %v3595_v1  ;;  %v3605_v54 = vsel %vm7617_vm2, %v3597_v60, %v3604_v25  ;;  %v3399_v52 = vshll.u32 %v3292_v46, 16  ;;  %v2743_v7 = vpop.f32.mrf.mxu1  ;;  %v2988_v39 = vpop.permute.xlu0 %2987 }
 0x1d1   :  { %7456 = vst [vmem:[#allocation2 + $0x30] sm:$0xff] %v7431_v16   ;;  %5528 = vmatmul.bf16.gmra.mxu3 %v6618_v8  ;;  %v3403_v62 = vshrl.u32 %v3292_v46, 16  ;;  %v2884_v58 = vadd.f32 %v2883_v48, %v2835_v12  ;;  %v3392_v17 = vsel %vm7847_vm5, %v3387_v23, %v3391_v38  ;;  %v3396_v24 = vor.u32 %v3395_v3, %v3391_v38  ;;  %v2787_v53 = vpop.f32.mrf.mxu2  ;;  %v7337_v48 = vld [vmem:[#allocation4 + $0x170] sm:$0xff]  ;;  %v6645_v27 = vld [vmem:[#allocation3 + $0x120] sm:$0xf] }
 0x1d2   :  { %5484 = vmatmul.bf16.gmra.mxu2 %v6650_v18  ;;  %v2836_v50 = vpop.f32.mrf.mxu3  ;;  %3684 = vst [vmem:[#allocation3 + $0x12c] sm:$0xf] %v3596_v0  ;;  %v3166_v31 = vshrl.u32 %v3064_v19, 16  ;;  %v2695_v63 = vadd.f32 %v8497_v59, %v2646_v42  ;;  %v2788_v20 = vadd.f32 %v2787_v53, %v8720_v4  ;;  %v3401_v30 = vrot.slane %v3399_v52, 5  ;;  %v8770_v53 = vld [vmem:[#allocation2 + $0xc] sm:$0xf] }
 0x1d3   :  { %3685 = vst [vmem:[#allocation3 + $0x150] sm:$0xf] %v3605_v54  ;;  %v3397_v56 = vrot.slane %v3396_v24, 4  ;;  %v3164_v35 = vrot.slane %v8726_v2, 4  ;;  %v3169_v51 = vshll.u32 %v3064_v19, 16  ;;  %v3405_v10 = vrot.slane %v3403_v62, 4  ;;  %5653 = vmatpush.bf16.msra.mxu2 %v7337_v48 }
 0x1d4   :  { %3487 = vst [vmem:[#allocation3 + $0x128] sm:$0xf] %v3392_v17  ;;  %v8748_v57 = vrot.slane %v3166_v31, 7  ;;  %v2905_v15 = vmax.f32 %v2884_v58, 0.0  ;;  %v2837_v44 = vadd.f32 %v2836_v50, %v2788_v20  ;;  %v3606_v4 = vrot.slane %v8731_v41, 4  ;;  %v7324_v48 = vld [vmem:[#allocation4 + $0x108] sm:$0xff] }
 0x1d5   :  { %v3402_v59 = vsel %vm7847_vm5, %v3397_v56, %v3401_v30  ;;  %v2742_v46 = vadd.f32 %v8729_v32, %v8499_v29  ;;  %v3406_v16 = vor.u32 %v3405_v10, %v3401_v30  ;;  %v8759_v12 = vadd.f32 %v2743_v7, %v2695_v63  ;;  %v7264_v62 = vld [vmem:[#allocation3 + $0x16c] sm:$0xf]  ;;  %5609 = vmatpush.bf16.msrb.mxu1 %v7324_v48  ;;  %v7353_v41 = vld [vmem:[#allocation4 + $0x1f0] sm:$0xff] }
 0x1d6   :  { %3488 = vst [vmem:[#allocation3 + $0x14c] sm:$0xf] %v3402_v59  ;;  %v3171_v2 = vor.u32 %v3169_v51, %v8748_v57  ;;  %v2886_v61 = vadd.f32 %v2885_v37, %v2837_v44  ;;  %v3173_v49 = vrot.slane %v8748_v57, 4  ;;  %v3017_v45 = vmul.f32 %v2988_v39, %v2905_v15  ;;  %v2888_v52 = vpop.f32.mrf.mxu0  ;;  %v8768_v37 = vld [vmem:[#allocation2 + $0x8] sm:$0x8] }
 0x1d7   :  { %v7259_v33 = vld [vmem:[#allocation3 + $0x140] sm:$0xf0]  ;;  %v3407_v17 = vrot.slane %v3406_v16, 4  ;;  %v7354_v44 = vld [vmem:[#allocation4 + $0x1f8] sm:$0xff]  ;;  %v3955_v39 = vshrl.u32 %v8768_v37, 16  ;;  %v3963_v16 = vshll.u32 %v8770_v53, 16 }
 0x1d8   :  { %v6646_v13 = vor.u32 %v7259_v33, %v6645_v27  ;;  %v3261_v47 = vld [vmem:[#allocation2 + $0x30] sm:$0xf]  ;;  %v3172_v23 = vsel %vm7617_vm2, %v3164_v35, %v3171_v2  ;;  %v3507_v26 = vld [vmem:[#allocation2 + $0x34] sm:$0xf]  ;;  %v2906_v9 = vmax.f32 %v2886_v61, 0.0  ;;  %5750 = vmatpush.bf16.msra.mxu0 %v7354_v44 }
 0x1d9   :  { %v3065_v55 = vld [vmem:[#allocation2 + $0x30] sm:$0xf]  ;;  %3277 = vst [vmem:[#allocation3 + $0x190] sm:$0xf] %v3261_v47  ;;  %v7256_v36 = vld [vmem:[#allocation3 + $0x12c] sm:$0xf]  ;;  %v2790_v29 = vpop.f32.mrf.mxu2 }
 0x1da   :  { %v3175_v40 = vshrl.u32 %v3065_v55, 16  ;;  %v3178_v22 = vshll.u32 %v3065_v55, 16  ;;  %5435 = vmatmul.bf16.gmra.mxu1 %v6646_v13  ;;  %v3506_v28 = vld [vmem:[#allocation2 + $0x30] sm:$0xf]  ;;  %v6655_v8 = vld [vmem:[#allocation3 + $0x14c] sm:$0xf0]  ;;  %v2839_v32 = vpop.f32.mrf.mxu3  ;;  %v3018_v18 = vmul.f32 %v2993_v11, %v2906_v9  ;;  %v2791_v38 = vadd.f32 %v2790_v29, %v2742_v46 }
 0x1db   :  { %3244 = vst [vmem:[#allocation3 + $0x168] sm:$0xf] %v3172_v23  ;;  %v6658_v1 = vor.u32 %v7256_v36, %v6655_v8  ;;  %v3608_v60 = vshrl.u32 %v3506_v28, 16  ;;  %v3611_v25 = vshll.u32 %v3506_v28, 16  ;;  %v3617_v42 = vshrl.u32 %v3507_v26, 16  ;;  %v7345_v29 = vld [vmem:[#allocation4 + $0x1b0] sm:$0xff] }
 0x1dc   :  { %v8761_v5 = vrot.slane %v3175_v40, 7  ;;  %v6653_v3 = vld [vmem:[#allocation3 + $0x128] sm:$0xf]  ;;  %v3620_v14 = vshll.u32 %v3507_v26, 16  ;;  %v3293_v0 = vld [vmem:[#allocation2 + $0x30] sm:$0xf]  ;;  %v7436_v31 = vpack.c.bf16 %v3018_v18, %v3017_v45  ;;  %v2840_v63 = vadd.f32 %v2839_v32, %v2791_v38  ;;  %5751 = vmatpush.bf16.msra.mxu0 %v7353_v41 }
 0x1dd   :  { %v8764_v54 = vld [vmem:[#allocation2 + $0x34] sm:$0xf]  ;;  %5582 = vmatmul.bf16.gmra.mxu0 %v6658_v1  ;;  %v3610_v58 = vrot.slane %v3608_v60, 7  ;;  %v8766_v50 = vrot.slane %v3617_v42, 7  ;;  %v3409_v24 = vshll.u32 %v3293_v0, 16  ;;  %v3413_v30 = vshrl.u32 %v3293_v0, 16 }
 0x1de   :  { %v3180_v19 = vor.u32 %v3178_v22, %v8761_v5  ;;  %v3262_v6 = vld [vmem:[#allocation2 + $0x34] sm:$0xf]  ;;  %v7260_v20 = vld [vmem:[#allocation3 + $0x148] sm:$0xf0]  ;;  %7457 = vst [vmem:[#allocation2 + $0x38] sm:$0xff] %v7436_v31   ;;  %v8775_v27 = vadd.f32 %v2888_v52, %v2840_v63  ;;  %v3419_v2 = vshll.u32 %v8764_v54, 16  ;;  %v2890_v52 = vpop.f32.mrf.mxu0 }
 0x1df   :  { %3278 = vst [vmem:[#allocation3 + $0x1b4] sm:$0xf] %v3262_v6  ;;  %v6654_v35 = vor.u32 %v7260_v20, %v6653_v3  ;;  %v3613_v51 = vor.u32 %v3611_v25, %v3610_v58  ;;  %v3615_v10 = vrot.slane %v3610_v58, 4  ;;  %v3622_v15 = vor.u32 %v3620_v14, %v8766_v50  ;;  %v3066_v13 = vld [vmem:[#allocation2 + $0x34] sm:$0xf]  ;;  %v7346_v40 = vld [vmem:[#allocation4 + $0x1b8] sm:$0xff]  ;;  %v2998_v20 = vpop.permute.xlu2 %2997 }
 0x1e0   :  { %v3181_v56 = vsel %vm7617_vm2, %v3173_v49, %v3180_v19  ;;  %v6683_v57 = vld [vmem:[#allocation3 + $0x18c] sm:$0xf0]  ;;  %v3411_v59 = vrot.slane %v3409_v24, 5  ;;  %v3415_v7 = vrot.slane %v3413_v30, 4  ;;  %v3423_v61 = vshrl.u32 %v8764_v54, 16  ;;  %v7336_v49 = vld [vmem:[#allocation4 + $0x168] sm:$0xff]  ;;  %5701 = vmatpush.bf16.msra.mxu3 %v7346_v40 }
 0x1e1   :  { %3245 = vst [vmem:[#allocation3 + $0x18c] sm:$0xf] %v3181_v56  ;;  %v6686_v33 = vor.u32 %v7264_v62, %v6683_v57  ;;  %5533 = vmatmul.bf16.gmra.mxu3 %v6654_v35  ;;  %v3614_v47 = vsel %vm7617_vm2, %v3606_v4, %v3613_v51  ;;  %v3623_v55 = vsel %vm7617_vm2, %v3615_v10, %v3622_v15  ;;  %v3960_v4 = vshrl.u32 %v8770_v53, 16  ;;  %v2792_v23 = vpop.f32.mrf.mxu2  ;;  %v7335_v26 = vld [vmem:[#allocation4 + $0x160] sm:$0xff]  ;;  %v7352_v38 = vld [vmem:[#allocation4 + $0x1e8] sm:$0xff]  ;;  %v7334_v14 = vld [vmem:[#allocation4 + $0x158] sm:$0xff] }
 0x1e2   :  { %3686 = vst [vmem:[#allocation3 + $0x174] sm:$0xf] %v3614_v47  ;;  %v3412_v22 = vsel %vm7847_vm5, %v3407_v17, %v3411_v59  ;;  %v3416_v46 = vor.u32 %v3415_v7, %v3411_v59  ;;  %v2907_v36 = vmax.f32 %v8775_v27, 0.0  ;;  %v3184_v28 = vshrl.u32 %v3066_v13, 16  ;;  %5654 = vmatpush.bf16.msra.mxu2 %v7336_v49  ;;  %v6681_v45 = vld [vmem:[#allocation3 + $0x168] sm:$0xf]  ;;  %v2841_v32 = vpop.f32.mrf.mxu3  ;;  %5752 = vmatpush.bf16.msra.mxu0 %v7352_v38  ;;  %v3003_v27 = vpop.permute.xlu0 %3002 }
 0x1e3   :  { %5489 = vmatmul.bf16.gmra.mxu2 %v6686_v33  ;;  %3687 = vst [vmem:[#allocation3 + $0x198] sm:$0xf] %v3623_v55  ;;  %v2793_v11 = vadd.f32 %v2792_v23, %v8759_v12  ;;  %v8792_v8 = vrot.slane %v3419_v2, 5  ;;  %v3182_v1 = vrot.slane %v8761_v5, 4  ;;  %v3187_v25 = vshll.u32 %v3066_v13, 16  ;;  %v7344_v0 = vld [vmem:[#allocation4 + $0x1a8] sm:$0xff] }
 0x1e4   :  { %v3417_v9 = vrot.slane %v3416_v46, 4  ;;  %3489 = vst [vmem:[#allocation3 + $0x170] sm:$0xf] %v3412_v22  ;;  %v8795_v60 = vrot.slane %v3184_v28, 7  ;;  %v3624_v42 = vrot.slane %v8766_v50, 4  ;;  %v8798_v18 = vrot.slane %v3423_v61, 4  ;;  %5702 = vmatpush.bf16.msra.mxu3 %v7345_v29 }
 0x1e5   :  { %v2842_v3 = vadd.f32 %v2841_v32, %v2793_v11  ;;  %v8803_v5 = vrot.slane %v3955_v39, 11  ;;  %v8805_v54 = vrot.slane %v3960_v4, 7  ;;  %v3263_v58 = vld [vmem:[#allocation2 + $0x38] sm:$0xf]  ;;  %v7351_v63 = vld [vmem:[#allocation4 + $0x1e0] sm:$0xff]  ;;  %v3019_v57 = vmul.f32 %v2998_v20, %v2907_v36  ;;  %v7333_v13 = vld [vmem:[#allocation4 + $0x150] sm:$0xff] }
 0x1e6   :  { %v3422_v19 = vsel %vm7847_vm5, %v3417_v9, %v8792_v8  ;;  %v3067_v17 = vld [vmem:[#allocation2 + $0x38] sm:$0xf]  ;;  %v3189_v24 = vor.u32 %v3187_v25, %v8795_v60  ;;  %5655 = vmatpush.bf16.msra.mxu2 %v7335_v26  ;;  %3279 = vst [vmem:[#allocation3 + $0x1d8] sm:$0xf] %v3263_v58  ;;  %v3191_v37 = vrot.slane %v8795_v60, 4  ;;  %v3426_v44 = vor.u32 %v8798_v18, %v8792_v8  ;;  %v7343_v47 = vld [vmem:[#allocation4 + $0x1a0] sm:$0xff] }
 0x1e7   :  { %3490 = vst [vmem:[#allocation3 + $0x194] sm:$0xf] %v3422_v19  ;;  %v2891_v6 = vadd.f32 %v2890_v52, %v2842_v3  ;;  %v3193_v53 = vshrl.u32 %v3067_v17, 16  ;;  %v3196_v31 = vshll.u32 %v3067_v17, 16  ;;  %v3508_v48 = vld [vmem:[#allocation2 + $0x38] sm:$0xf]  ;;  %v8816_v55 = vor.u32 %v3963_v16, %v8805_v54  ;;  %5753 = vmatpush.bf16.msra.mxu0 %v7351_v63 }
 0x1e8   :  { %v7268_v12 = vld [vmem:[#allocation3 + $0x188] sm:$0xf0]  ;;  %v3190_v30 = vsel %vm7617_vm2, %v3182_v1, %v3189_v24  ;;  %v3626_v59 = vshrl.u32 %v3508_v48, 16  ;;  %5703 = vmatpush.bf16.msra.mxu3 %v7344_v0  ;;  %v3629_v40 = vshll.u32 %v3508_v48, 16  ;;  %v3295_v46 = vld [vmem:[#allocation2 + $0x38] sm:$0xf] }
 0x1e9   :  { %v6682_v62 = vor.u32 %v7268_v12, %v6681_v45  ;;  %v7265_v56 = vld [vmem:[#allocation3 + $0x174] sm:$0xf]  ;;  %v3509_v35 = vld [vmem:[#allocation2 + $0x3c] sm:$0xf]  ;;  %v2908_v51 = vmax.f32 %v2891_v6, 0.0  ;;  %v8811_v15 = vrot.slane %v3193_v53, 7  ;;  %v3966_v48 = vsel %vm7617_vm2, %v8803_v5, %v8816_v55 }
 0x1ea   :  { %v6691_v10 = vld [vmem:[#allocation3 + $0x194] sm:$0xf0]  ;;  %3246 = vst [vmem:[#allocation3 + $0x1b0] sm:$0xf] %v3190_v30  ;;  %v3635_v7 = vshrl.u32 %v3509_v35, 16  ;;  %5656 = vmatpush.bf16.msra.mxu2 %v7334_v14  ;;  %v3638_v22 = vshll.u32 %v3509_v35, 16 }
 0x1eb   :  { %5440 = vmatmul.bf16.gmra.mxu1 %v6682_v62  ;;  %v6694_v33 = vor.u32 %v7265_v56, %v6691_v10  ;;  %v3020_v2 = vmul.f32 %v3003_v27, %v2908_v51  ;;  %v6689_v61 = vld [vmem:[#allocation3 + $0x170] sm:$0xf]  ;;  %v3198_v49 = vor.u32 %v3196_v31, %v8811_v15  ;;  %v3296_v41 = vld [vmem:[#allocation2 + $0x3c] sm:$0xf]  ;;  %v7273_v39 = vld [vmem:[#allocation3 + $0x1b4] sm:$0xf] }
 0x1ec   :  { %v3628_v4 = vrot.slane %v3626_v59, 7  ;;  %v8819_v36 = vrot.slane %v3635_v7, 7  ;;  %v3429_v23 = vshll.u32 %v3295_v46, 16  ;;  %v3433_v28 = vshrl.u32 %v3295_v46, 16  ;;  %v3264_v26 = vld [vmem:[#allocation2 + $0x3c] sm:$0xf]  ;;  %5704 = vmatpush.bf16.msra.mxu3 %v7343_v47 }
 0x1ed   :  { %5587 = vmatmul.bf16.gmra.mxu0 %v6694_v33  ;;  %v7441_v11 = vpack.c.bf16 %v3020_v2, %v3019_v57  ;;  %v3199_v16 = vsel %vm7617_vm2, %v3191_v37, %v3198_v49  ;;  %v3439_v9 = vshll.u32 %v3296_v41, 16  ;;  %v3443_v8 = vshrl.u32 %v3296_v41, 16  ;;  %3280 = vst [vmem:[#allocation3 + $0x1fc] sm:$0xf] %v3264_v26  ;;  %v6719_v29 = vld [vmem:[#allocation3 + $0x1d4] sm:$0xf0] }
 0x1ee   :  { %v7269_v45 = vld [vmem:[#allocation3 + $0x190] sm:$0xf0]  ;;  %3247 = vst [vmem:[#allocation3 + $0x1d4] sm:$0xf] %v3199_v16  ;;  %v3631_v32 = vor.u32 %v3629_v40, %v3628_v4  ;;  %v3633_v60 = vrot.slane %v3628_v4, 4  ;;  %v3640_v25 = vor.u32 %v3638_v22, %v8819_v36  ;;  %5657 = vmatpush.bf16.msra.mxu2 %v7333_v13  ;;  %v7323_v18 = vld [vmem:[#allocation4 + $0x100] sm:$0xff]  ;;  %v6722_v38 = vor.u32 %v7273_v39, %v6719_v29 }
 0x1ef   :  { %v6690_v1 = vor.u32 %v7269_v45, %v6689_v61  ;;  %7458 = vst [vmem:[#allocation2 + $0x40] sm:$0xff] %v7441_v11   ;;  %v3427_v3 = vrot.slane %v3426_v44, 4  ;;  %v3431_v12 = vrot.slane %v3429_v23, 5  ;;  %v3435_v19 = vrot.slane %v3433_v28, 4  ;;  %v3068_v14 = vld [vmem:[#allocation2 + $0x3c] sm:$0xf]  ;;  %5610 = vmatpush.bf16.msrb.mxu1 %v7323_v18 }
 0x1f0   :  { %v3632_v0 = vsel %vm7617_vm2, %v3624_v42, %v3631_v32  ;;  %v3641_v52 = vsel %vm7617_vm2, %v3633_v60, %v3640_v25  ;;  %v8830_v62 = vrot.slane %v3439_v9, 5  ;;  %v3202_v58 = vshrl.u32 %v3068_v14, 16  ;;  %v7350_v17 = vld [vmem:[#allocation4 + $0x1d8] sm:$0xff]  ;;  %v7332_v24 = vld [vmem:[#allocation4 + $0x148] sm:$0xff]  ;;  %v8832_v6 = vld [vmem:[#allocation2 + $0x10] sm:$0xf] }
 0x1f1   :  { %5538 = vmatmul.bf16.gmra.mxu3 %v6690_v1  ;;  %3688 = vst [vmem:[#allocation3 + $0x1bc] sm:$0xf] %v3632_v0  ;;  %v3432_v37 = vsel %vm7847_vm5, %v3427_v3, %v3431_v12  ;;  %v3436_v50 = vor.u32 %v3435_v19, %v3431_v12  ;;  %v3200_v53 = vrot.slane %v8811_v15, 4  ;;  %v3205_v42 = vshll.u32 %v3068_v14, 16  ;;  %v7342_v31 = vld [vmem:[#allocation4 + $0x198] sm:$0xff]  ;;  %5754 = vmatpush.bf16.msra.mxu0 %v7350_v17  ;;  %v7349_v56 = vld [vmem:[#allocation4 + $0x1d0] sm:$0xff] }
 0x1f2   :  { %3689 = vst [vmem:[#allocation3 + $0x1e0] sm:$0xf] %v3641_v52  ;;  %v8837_v63 = vrot.slane %v3202_v58, 7  ;;  %v3445_v20 = vrot.slane %v3443_v8, 4  ;;  %5658 = vmatpush.bf16.msra.mxu2 %v7332_v24  ;;  %v7331_v30 = vld [vmem:[#allocation4 + $0x140] sm:$0xff]  ;;  %5705 = vmatpush.bf16.msra.mxu3 %v7342_v31  ;;  %v7341_v57 = vld [vmem:[#allocation4 + $0x190] sm:$0xff] }
 0x1f3   :  { %5494 = vmatmul.bf16.gmra.mxu2 %v6722_v38  ;;  %v3437_v35 = vrot.slane %v3436_v50, 4  ;;  %3491 = vst [vmem:[#allocation3 + $0x1b8] sm:$0xf] %v3432_v37  ;;  %v6717_v51 = vld [vmem:[#allocation3 + $0x1b0] sm:$0xf]  ;;  %v3642_v44 = vrot.slane %v8819_v36, 4 }
 0x1f4   :  { %v3207_v10 = vor.u32 %v3205_v42, %v8837_v63  ;;  %v3209_v15 = vrot.slane %v8837_v63, 4  ;;  %v7348_v27 = vld [vmem:[#allocation4 + $0x1c8] sm:$0xff]  ;;  %v3967_v33 = vrot.slane %v8805_v54, 4  ;;  %v3969_v13 = vshrl.u32 %v8832_v6, 16  ;;  %4118 = vst [vmem:[#allocation3 + $0x18] sm:$0xf] %v3966_v48 }
 0x1f5   :  { %v7277_v59 = vld [vmem:[#allocation3 + $0x1d0] sm:$0xf0]  ;;  %v3442_v7 = vsel %vm7847_vm5, %v3437_v35, %v8830_v62  ;;  %v7340_v5 = vld [vmem:[#allocation4 + $0x188] sm:$0xff]  ;;  %v3972_v47 = vshll.u32 %v8832_v6, 16  ;;  %v3446_v40 = vor.u32 %v3445_v20, %v8830_v62  ;;  %5755 = vmatpush.bf16.msra.mxu0 %v7349_v56  ;;  %v7485_v41 = vld [vmem:[#allocation2 + $0x10] sm:$0xf] }
 0x1f6   :  { %v6718_v55 = vor.u32 %v7277_v59, %v6717_v51  ;;  %3492 = vst [vmem:[#allocation3 + $0x1dc] sm:$0xf] %v3442_v7  ;;  %v3265_v2 = vld [vmem:[#allocation2 + $0x40] sm:$0xf]  ;;  %v3208_v49 = vsel %vm7617_vm2, %v3200_v53, %v3207_v10  ;;  %5659 = vmatpush.bf16.msra.mxu2 %v7331_v30  ;;  %5706 = vmatpush.bf16.msra.mxu3 %v7341_v57  ;;  %v3765_v39 = vshrl.u32 %v7485_v41, 16  ;;  %v7347_v12 = vld [vmem:[#allocation4 + $0x1c0] sm:$0xff] }
 0x1f7   :  { %v3069_v61 = vld [vmem:[#allocation2 + $0x40] sm:$0xf]  ;;  %3281 = vst [vmem:[#allocation3 + $0x220] sm:$0xf] %v3265_v2  ;;  %v3511_v23 = vld [vmem:[#allocation2 + $0x44] sm:$0xf] }
 0x1f8   :  { %v3211_v22 = vshrl.u32 %v3069_v61, 16  ;;  %v3510_v46 = vld [vmem:[#allocation2 + $0x40] sm:$0xf]  ;;  %v7274_v4 = vld [vmem:[#allocation3 + $0x1bc] sm:$0xf]  ;;  %v3214_v11 = vshll.u32 %v3069_v61, 16 }
 0x1f9   :  { %3248 = vst [vmem:[#allocation3 + $0x1f8] sm:$0xf] %v3208_v49  ;;  %v6727_v28 = vld [vmem:[#allocation3 + $0x1dc] sm:$0xf0]  ;;  %v3644_v45 = vshrl.u32 %v3510_v46, 16  ;;  %v3653_v16 = vshrl.u32 %v3511_v23, 16  ;;  %5756 = vmatpush.bf16.msra.mxu0 %v7348_v27 }
 0x1fa   :  { %v3213_v26 = vrot.slane %v3211_v22, 7  ;;  %v6730_v9 = vor.u32 %v7274_v4, %v6727_v28  ;;  %v3647_v8 = vshll.u32 %v3510_v46, 16  ;;  %v3656_v1 = vshll.u32 %v3511_v23, 16  ;;  %v3297_v29 = vld [vmem:[#allocation2 + $0x40] sm:$0xf]  ;;  %5707 = vmatpush.bf16.msra.mxu3 %v7340_v5  ;;  %v7339_v52 = vld [vmem:[#allocation4 + $0x180] sm:$0xff] }
 0x1fb   :  { %5445 = vmatmul.bf16.gmra.mxu1 %v6718_v55  ;;  %v3447_v32 = vrot.slane %v3446_v40, 4  ;;  %v3646_v25 = vrot.slane %v3644_v45, 7  ;;  %v3655_v18 = vrot.slane %v3653_v16, 7  ;;  %v3298_v38 = vld [vmem:[#allocation2 + $0x44] sm:$0x1]  ;;  %v3449_v3 = vshll.u32 %v3297_v29, 16 }
 0x1fc   :  { %v3216_v60 = vor.u32 %v3214_v11, %v3213_v26  ;;  %v7282_v19 = vld [vmem:[#allocation3 + $0x1fc] sm:$0xf]  ;;  %v3453_v14 = vshrl.u32 %v3297_v29, 16  ;;  %v3459_v0 = vshll.u32 %v3298_v38, 16  ;;  %v8855_v58 = vrot.slane %v3969_v13, 7 }
 0x1fd   :  { %5592 = vmatmul.bf16.gmra.mxu0 %v6730_v9  ;;  %v7362_v62 = vld [vmem:[#allocation4 + $0x238] sm:$0xff]  ;;  %v3767_v17 = vrot.slane %v3765_v39, 4  ;;  %v3649_v50 = vor.u32 %v3647_v8, %v3646_v25  ;;  %v3651_v53 = vrot.slane %v3646_v25, 4  ;;  %v3658_v42 = vor.u32 %v3656_v1, %v3655_v18  ;;  %v3727_v51 = vld [vmem:[#allocation2 + $0x14] sm:$0xf] }
 0x1fe   :  { %v6725_v24 = vld [vmem:[#allocation3 + $0x1b8] sm:$0xf]  ;;  %v7278_v6 = vld [vmem:[#allocation3 + $0x1d8] sm:$0xf0]  ;;  %v3217_v37 = vsel %vm7617_vm2, %v3209_v15, %v3216_v60  ;;  %v6755_v63 = vld [vmem:[#allocation3 + $0x21c] sm:$0xf0]  ;;  %5757 = vmatpush.bf16.msra.mxu0 %v7347_v12  ;;  %5799 = vmatpush.bf16.msra.mxu1 %v7362_v62  ;;  %v3974_v30 = vor.u32 %v3972_v47, %v8855_v58 }
 0x1ff   :  { %v6726_v31 = vor.u32 %v7278_v6, %v6725_v24  ;;  %3249 = vst [vmem:[#allocation3 + $0x21c] sm:$0xf] %v3217_v37  ;;  %v3451_v20 = vrot.slane %v3449_v3, 5  ;;  %v3455_v56 = vrot.slane %v3453_v14, 4  ;;  %v6758_v48 = vor.u32 %v7282_v19, %v6755_v63  ;;  %5708 = vmatpush.bf16.msra.mxu3 %v7339_v52  ;;  %v3728_v36 = vld [vmem:[#allocation2 + $0x18] sm:$0xf] }
 0x200   :  { %v3650_v35 = vsel %vm7617_vm2, %v3642_v44, %v3649_v50  ;;  %v3659_v57 = vsel %vm7617_vm2, %v3651_v53, %v3658_v42  ;;  %v3975_v27 = vsel %vm7617_vm2, %v3967_v33, %v3974_v30  ;;  %v3771_v59 = vshll.u32 %v3727_v51, 16  ;;  %v3694_v2 = vld [vmem:[#allocation2 + $0x10] sm:$0xf]  ;;  %v6753_v61 = vld [vmem:[#allocation3 + $0x1f8] sm:$0xf] }
 0x201   :  { %5543 = vmatmul.bf16.gmra.mxu3 %v6726_v31  ;;  %3690 = vst [vmem:[#allocation3 + $0x204] sm:$0xf] %v3650_v35  ;;  %v3452_v10 = vsel %vm7847_vm5, %v3447_v32, %v3451_v20  ;;  %v3456_v15 = vor.u32 %v3455_v56, %v3451_v20  ;;  %v3461_v44 = vrot.slane %v3459_v0, 5  ;;  %v3768_v7 = vor.u32 %v3767_v17, %v8669_v43  ;;  %v3695_v46 = vld [vmem:[#allocation2 + $0x14] sm:$0xf]  ;;  %v7361_v17 = vld [vmem:[#allocation4 + $0x230] sm:$0xff] }
 0x202   :  { %3691 = vst [vmem:[#allocation3 + $0x228] sm:$0xf] %v3659_v57  ;;  %v3775_v5 = vshrl.u32 %v3727_v51, 16  ;;  %v3781_v13 = vshll.u32 %v3728_v36, 16  ;;  %v3773_v55 = vrot.slane %v3771_v59, 5  ;;  %v3785_v22 = vshrl.u32 %v3728_v36, 16  ;;  %5800 = vmatpush.bf16.msra.mxu1 %v7361_v17 }
 0x203   :  { %5499 = vmatmul.bf16.gmra.mxu2 %v6758_v48  ;;  %v3457_v47 = vrot.slane %v3456_v15, 4  ;;  %3493 = vst [vmem:[#allocation3 + $0x200] sm:$0xf] %v3452_v10  ;;  %v3769_v49 = vrot.slane %v3768_v7, 4  ;;  %v4136_v41 = vld [vmem:[#allocation2 + $0x14] sm:$0xf] }
 0x204   :  { %4119 = vst [vmem:[#allocation3 + $0x3c] sm:$0xf] %v3975_v27  ;;  %v3777_v54 = vrot.slane %v3775_v5, 4  ;;  %v3783_v40 = vrot.slane %v3781_v13, 5  ;;  %v4137_v23 = vld [vmem:[#allocation2 + $0x18] sm:$0xf] }
 0x205   :  { %v3462_v33 = vsel %vm7847_vm5, %v3457_v47, %v3461_v44  ;;  %3710 = vst [vmem:[#allocation3 + $0x58] sm:$0xf] %v3694_v2  ;;  %v3774_v43 = vsel %vm7847_vm5, %v3769_v49, %v3773_v55  ;;  %v3940_v26 = vld [vmem:[#allocation2 + $0x14] sm:$0xf]  ;;  %v3941_v11 = vld [vmem:[#allocation2 + $0x18] sm:$0xf] }
 0x206   :  { %v7286_v39 = vld [vmem:[#allocation3 + $0x218] sm:$0xf0]  ;;  %3494 = vst [vmem:[#allocation3 + $0x224] sm:$0xf] %v3462_v33  ;;  %v3778_v4 = vor.u32 %v3777_v54, %v3773_v55  ;;  %v3978_v9 = vshrl.u32 %v3940_v26, 16  ;;  %v3976_v1 = vrot.slane %v8855_v58, 4 }
 0x207   :  { %v6754_v28 = vor.u32 %v7286_v39, %v6753_v61  ;;  %3923 = vst [vmem:[#allocation3 + $0x5c] sm:$0xf] %v3774_v43  ;;  %v3987_v29 = vshrl.u32 %v3941_v11, 16  ;;  %v3981_v18 = vshll.u32 %v3940_v26, 16  ;;  %v6519_v38 = vld [vmem:[#allocation3 + $0x34] sm:$0xf0] }
 0x208   :  { %v7283_v45 = vld [vmem:[#allocation3 + $0x204] sm:$0xf]  ;;  %v3779_v16 = vrot.slane %v3778_v4, 4  ;;  %3711 = vst [vmem:[#allocation3 + $0x7c] sm:$0xf] %v3695_v46  ;;  %v3980_v25 = vrot.slane %v3978_v9, 7 }
 0x209   :  { %v6763_v8 = vld [vmem:[#allocation3 + $0x224] sm:$0xf0]  ;;  %4152 = vst [vmem:[#allocation3 + $0x64] sm:$0xf] %v4136_v41  ;;  %v8880_v3 = vrot.slane %v3987_v29, 7  ;;  %v3990_v12 = vshll.u32 %v3941_v11, 16 }
 0x20a   :  { %v6766_v32 = vor.u32 %v7283_v45, %v6763_v8  ;;  %v3784_v60 = vsel %vm7847_vm5, %v3779_v16, %v3783_v40  ;;  %4153 = vst [vmem:[#allocation3 + $0x88] sm:$0xf] %v4137_v23  ;;  %v3787_v19 = vrot.slane %v3785_v22, 4  ;;  %v6761_v14 = vld [vmem:[#allocation3 + $0x200] sm:$0xf]  ;;  %v3983_v0 = vor.u32 %v3981_v18, %v3980_v25 }
 0x20b   :  { %5450 = vmatmul.bf16.gmra.mxu1 %v6754_v28  ;;  %3924 = vst [vmem:[#allocation3 + $0x80] sm:$0xf] %v3784_v60  ;;  %v3985_v52 = vrot.slane %v3980_v25, 4  ;;  %v3729_v62 = vld [vmem:[#allocation2 + $0x1c] sm:$0xf]  ;;  %v3992_v24 = vor.u32 %v3990_v12, %v8880_v3  ;;  %v3994_v39 = vrot.slane %v8880_v3, 4 }
 0x20c   :  { %v3730_v6 = vld [vmem:[#allocation2 + $0x20] sm:$0xf]  ;;  %v3788_v37 = vor.u32 %v3787_v19, %v3783_v40  ;;  %v3791_v50 = vshll.u32 %v3729_v62, 16  ;;  %v3984_v42 = vsel %vm7617_vm2, %v3976_v1, %v3983_v0  ;;  %v3795_v31 = vshrl.u32 %v3729_v62, 16  ;;  %v7221_v20 = vld [vmem:[#allocation3 + $0x14] sm:$0xf] }
 0x20d   :  { %5597 = vmatmul.bf16.gmra.mxu0 %v6766_v32  ;;  %v7287_v58 = vld [vmem:[#allocation3 + $0x220] sm:$0xf0]  ;;  %v3801_v63 = vshll.u32 %v3730_v6, 16  ;;  %v3993_v56 = vsel %vm7617_vm2, %v3985_v52, %v3992_v24  ;;  %4120 = vst [vmem:[#allocation3 + $0x60] sm:$0xf] %v3984_v42  ;;  %v6522_v35 = vor.u32 %v7221_v20, %v6519_v38  ;;  %v3805_v59 = vshrl.u32 %v3730_v6, 16 }
 0x20e   :  { %v6762_v53 = vor.u32 %v7287_v58, %v6761_v14  ;;  %v3789_v30 = vrot.slane %v3788_v37, 4  ;;  %v3793_v48 = vrot.slane %v3791_v50, 5  ;;  %v6517_v57 = vld [vmem:[#allocation3 + $0x10] sm:$0xf]  ;;  %v7225_v51 = vld [vmem:[#allocation3 + $0x30] sm:$0xf0] }
 0x20f   :  { %4121 = vst [vmem:[#allocation3 + $0x84] sm:$0xf] %v3993_v56  ;;  %v3797_v10 = vrot.slane %v3795_v31, 4  ;;  %v3696_v15 = vld [vmem:[#allocation2 + $0x18] sm:$0xf]  ;;  %v3803_v5 = vrot.slane %v3801_v63, 5  ;;  %v6518_v40 = vor.u32 %v7225_v51, %v6517_v57 }
 0x210   :  { %v8890_v27 = vld [vmem:[%s9269_s4] ss:$0 sm:$0xff]  ;;  %v3794_v36 = vsel %vm7847_vm5, %v3789_v30, %v3793_v48  ;;  %v3697_v44 = vld [vmem:[#allocation2 + $0x1c] sm:$0xf]  ;;  %3712 = vst [vmem:[#allocation3 + $0xa0] sm:$0xf] %v3696_v15 }
 0x211   :  { %5548 = vmatmul.bf16.gmra.mxu3 %v6762_v53  ;;  %v3798_v7 = vor.u32 %v3797_v10, %v3793_v48  ;;  %3925 = vst [vmem:[#allocation3 + $0xa4] sm:$0xf] %v3794_v36  ;;  %v4138_v13 = vld [vmem:[#allocation2 + $0x1c] sm:$0xf]  ;;  %v4139_v47 = vld [vmem:[#allocation2 + $0x20] sm:$0xf] }
 0x212   :  { %v3942_v55 = vld [vmem:[#allocation2 + $0x1c] sm:$0xf]  ;;  %3713 = vst [vmem:[#allocation3 + $0xc4] sm:$0xf] %v3697_v44  ;;  %v3943_v61 = vld [vmem:[#allocation2 + $0x20] sm:$0xf] }
 0x213   :  { %5660 = vmatmul.bf16.vlgmr.msra.gmra.mxu2 %v6522_v35  ;;  %v3799_v2 = vrot.slane %v3798_v7, 4  ;;  %v3996_v49 = vshrl.u32 %v3942_v55, 16  ;;  %v5465_v54 = vpop.f32.mrf.mxu2  ;;  %4154 = vst [vmem:[#allocation3 + $0xac] sm:$0xf] %v4138_v13  ;;  %v4005_v22 = vshrl.u32 %v3943_v61, 16  ;;  %v3807_v33 = vrot.slane %v3805_v59, 4 }
 0x214   :  { %4155 = vst [vmem:[#allocation3 + $0xd0] sm:$0xf] %v4139_v47  ;;  %v3999_v4 = vshll.u32 %v3942_v55, 16  ;;  %v6527_v28 = vld [vmem:[#allocation3 + $0x3c] sm:$0xf0]  ;;  %v4008_v11 = vshll.u32 %v3943_v61, 16 }
 0x215   :  { %v5416_v46 = vpop.f32.mrf.mxu1  ;;  %v3804_v41 = vsel %vm7847_vm5, %v3799_v2, %v3803_v5  ;;  %v3998_v43 = vrot.slane %v3996_v49, 7  ;;  %v8898_v26 = vrot.slane %v4005_v22, 7  ;;  %v3808_v45 = vor.u32 %v3807_v33, %v3803_v5  ;;  %v3731_v8 = vld [vmem:[#allocation2 + $0x24] sm:$0xf]  ;;  %v3732_v1 = vld [vmem:[#allocation2 + $0x28] sm:$0xf] }
 0x216   :  { %v5417_v23 = vadd.f32 %v8890_v27, %v5416_v46  ;;  %3926 = vst [vmem:[#allocation3 + $0xc8] sm:$0xf] %v3804_v41  ;;  %v3811_v25 = vshll.u32 %v3731_v8, 16  ;;  %v7222_v18 = vld [vmem:[#allocation3 + $0x1c] sm:$0xf]  ;;  %v3815_v3 = vshrl.u32 %v3731_v8, 16 }
 0x217   :  { %v4001_v16 = vor.u32 %v3999_v4, %v3998_v43  ;;  %v4003_v9 = vrot.slane %v3998_v43, 4  ;;  %v4010_v32 = vor.u32 %v4008_v11, %v8898_v26  ;;  %v3809_v60 = vrot.slane %v3808_v45, 4  ;;  %v7226_v0 = vld [vmem:[#allocation3 + $0x38] sm:$0xf0]  ;;  %v6525_v58 = vld [vmem:[#allocation3 + $0x18] sm:$0xf] }
 0x218   :  { %v5466_v29 = vadd.f32 %v5465_v54, %v5417_v23  ;;  %v3821_v12 = vshll.u32 %v3732_v1, 16  ;;  %v3825_v19 = vshrl.u32 %v3732_v1, 16  ;;  %v6530_v14 = vor.u32 %v7222_v18, %v6527_v28  ;;  %v3698_v6 = vld [vmem:[#allocation2 + $0x20] sm:$0xf]  ;;  %v6555_v50 = vld [vmem:[#allocation3 + $0x7c] sm:$0xf0] }
 0x219   :  { %v4002_v38 = vsel %vm7617_vm2, %v3994_v39, %v4001_v16  ;;  %v4011_v52 = vsel %vm7617_vm2, %v4003_v9, %v4010_v32  ;;  %v3813_v62 = vrot.slane %v3811_v25, 5  ;;  %v3817_v17 = vrot.slane %v3815_v3, 4  ;;  %v7360_v53 = vld [vmem:[#allocation4 + $0x228] sm:$0xff]  ;;  %v3699_v31 = vld [vmem:[#allocation2 + $0x24] sm:$0xf] }
 0x21a   :  { %4122 = vst [vmem:[#allocation3 + $0xa8] sm:$0xf] %v4002_v38  ;;  %v3823_v24 = vrot.slane %v3821_v12, 5  ;;  %v3827_v63 = vrot.slane %v3825_v19, 4  ;;  %v7230_v56 = vld [vmem:[#allocation3 + $0x5c] sm:$0xf]  ;;  %v6526_v35 = vor.u32 %v7226_v0, %v6525_v58  ;;  %5801 = vmatpush.bf16.msra.mxu1 %v7360_v53 }
 0x21b   :  { %5611 = vmatmul.bf16.vlgmr.msrb.gmra.mxu1 %v6518_v40  ;;  %4123 = vst [vmem:[#allocation3 + $0xcc] sm:$0xf] %v4011_v52  ;;  %v5467_v37 = vpop.f32.mrf.mxu2  ;;  %v3814_v42 = vsel %vm7847_vm5, %v3809_v60, %v3813_v62  ;;  %v3818_v30 = vor.u32 %v3817_v17, %v3813_v62  ;;  %v4140_v48 = vld [vmem:[#allocation2 + $0x24] sm:$0xf]  ;;  %v4141_v51 = vld [vmem:[#allocation2 + $0x28] sm:$0xf]  ;;  %v6558_v15 = vor.u32 %v7230_v56, %v6555_v50 }
 0x21c   :  { %3927 = vst [vmem:[#allocation3 + $0xec] sm:$0xf] %v3814_v42  ;;  %v3944_v10 = vld [vmem:[#allocation2 + $0x24] sm:$0xf]  ;;  %v3945_v59 = vld [vmem:[#allocation2 + $0x28] sm:$0xf]  ;;  %v3828_v7 = vor.u32 %v3827_v63, %v3823_v24 }
 0x21d   :  { %5758 = vmatmul.bf16.vlgmr.msra.gmra.mxu0 %v6530_v14  ;;  %v5418_v20 = vpop.f32.mrf.mxu1  ;;  %3714 = vst [vmem:[#allocation3 + $0xe8] sm:$0xf] %v3698_v6  ;;  %v3819_v36 = vrot.slane %v3818_v30, 4  ;;  %v4014_v44 = vshrl.u32 %v3944_v10, 16  ;;  %v4012_v47 = vrot.slane %v8898_v26, 4  ;;  %v4023_v55 = vshrl.u32 %v3945_v59, 16 }
 0x21e   :  { %v5419_v57 = vadd.f32 %v8890_v27, %v5418_v20  ;;  %3715 = vst [vmem:[#allocation3 + $0x10c] sm:$0xf] %v3699_v31  ;;  %v6553_v61 = vld [vmem:[#allocation3 + $0x58] sm:$0xf]  ;;  %v4017_v40 = vshll.u32 %v3944_v10, 16  ;;  %v4026_v46 = vshll.u32 %v3945_v59, 16 }
 0x21f   :  { %4156 = vst [vmem:[#allocation3 + $0xf4] sm:$0xf] %v4140_v48  ;;  %v3824_v49 = vsel %vm7847_vm5, %v3819_v36, %v3823_v24  ;;  %v4016_v54 = vrot.slane %v4014_v44, 7  ;;  %v7234_v22 = vld [vmem:[#allocation3 + $0x78] sm:$0xf0]  ;;  %v8913_v33 = vrot.slane %v4023_v55, 7 }
 0x220   :  { %v5514_v5 = vpop.f32.mrf.mxu3  ;;  %v5468_v13 = vadd.f32 %v5467_v37, %v5419_v57  ;;  %4157 = vst [vmem:[#allocation3 + $0x118] sm:$0xf] %v4141_v51  ;;  %v3733_v39 = vld [vmem:[#allocation2 + $0x2c] sm:$0xf]  ;;  %v3829_v43 = vrot.slane %v3828_v7, 4  ;;  %v6554_v9 = vor.u32 %v7234_v22, %v6553_v61  ;;  %v7359_v48 = vld [vmem:[#allocation4 + $0x220] sm:$0xff] }
 0x221   :  { %5709 = vmatmul.bf16.vlgmr.msra.gmra.mxu3 %v6526_v35  ;;  %v8909_v2 = vadd.f32 %v5514_v5, %v5466_v29  ;;  %3928 = vst [vmem:[#allocation3 + $0x110] sm:$0xf] %v3824_v49  ;;  %v4019_v41 = vor.u32 %v4017_v40, %v4016_v54  ;;  %v3700_v4 = vld [vmem:[#allocation2 + $0x28] sm:$0xf]  ;;  %v4021_v28 = vrot.slane %v4016_v54, 4  ;;  %v4028_v26 = vor.u32 %v4026_v46, %v8913_v33 }
 0x222   :  { %v3831_v11 = vshll.u32 %v3733_v39, 16  ;;  %v3835_v45 = vshrl.u32 %v3733_v39, 16  ;;  %v3701_v1 = vld [vmem:[#allocation2 + $0x2c] sm:$0xf]  ;;  %3716 = vst [vmem:[#allocation3 + $0x130] sm:$0xf] %v3700_v4  ;;  %5802 = vmatpush.bf16.msra.mxu1 %v7359_v48 }
 0x223   :  { %5665 = vmatmul.bf16.gmra.mxu2 %v6558_v15  ;;  %v4020_v8 = vsel %vm7617_vm2, %v4012_v47, %v4019_v41  ;;  %v6563_v32 = vld [vmem:[#allocation3 + $0x84] sm:$0xf0]  ;;  %v4029_v60 = vsel %vm7617_vm2, %v4021_v28, %v4028_v26  ;;  %v7231_v38 = vld [vmem:[#allocation3 + $0x64] sm:$0xf]  ;;  %v3734_v3 = vld [vmem:[#allocation2 + $0x30] sm:$0xf] }
 0x224   :  { %v5470_v23 = vpop.f32.mrf.mxu2  ;;  %4124 = vst [vmem:[#allocation3 + $0xf0] sm:$0xf] %v4020_v8  ;;  %v3833_v25 = vrot.slane %v3831_v11, 5  ;;  %v3837_v18 = vrot.slane %v3835_v45, 4  ;;  %v4142_v12 = vld [vmem:[#allocation2 + $0x2c] sm:$0xf]  ;;  %v6566_v37 = vor.u32 %v7231_v38, %v6563_v32 }
 0x225   :  { %4125 = vst [vmem:[#allocation3 + $0x114] sm:$0xf] %v4029_v60  ;;  %v7235_v14 = vld [vmem:[#allocation3 + $0x80] sm:$0xf0]  ;;  %v3841_v58 = vshll.u32 %v3734_v3, 16  ;;  %v3845_v6 = vshrl.u32 %v3734_v3, 16 }
 0x226   :  { %v5421_v16 = vpop.f32.mrf.mxu1  ;;  %v3834_v52 = vsel %vm7847_vm5, %v3829_v43, %v3833_v25  ;;  %v3838_v62 = vor.u32 %v3837_v18, %v3833_v25  ;;  %3717 = vst [vmem:[#allocation3 + $0x154] sm:$0xf] %v3701_v1  ;;  %v6591_v24 = vld [vmem:[#allocation3 + $0xc4] sm:$0xf0]  ;;  %v6561_v50 = vld [vmem:[#allocation3 + $0x60] sm:$0xf] }
 0x227   :  { %v5422_v29 = vadd.f32 %v8890_v27, %v5421_v16  ;;  %3929 = vst [vmem:[#allocation3 + $0x134] sm:$0xf] %v3834_v52  ;;  %v3843_v42 = vrot.slane %v3841_v58, 5  ;;  %v4143_v31 = vld [vmem:[#allocation2 + $0x30] sm:$0xf]  ;;  %v6562_v10 = vor.u32 %v7235_v14, %v6561_v50  ;;  %v4030_v59 = vrot.slane %v8913_v33, 4 }
 0x228   :  { %v5516_v19 = vpop.f32.mrf.mxu3  ;;  %v3839_v53 = vrot.slane %v3838_v62, 4  ;;  %4158 = vst [vmem:[#allocation3 + $0x13c] sm:$0xf] %v4142_v12  ;;  %v3946_v63 = vld [vmem:[#allocation2 + $0x2c] sm:$0xf]  ;;  %v3847_v44 = vrot.slane %v3845_v6, 4 }
 0x229   :  { %v5471_v0 = vadd.f32 %v5470_v23, %v5422_v29  ;;  %v8923_v17 = vadd.f32 %v5516_v19, %v5468_v13  ;;  %4159 = vst [vmem:[#allocation3 + $0x160] sm:$0xf] %v4143_v31  ;;  %v3947_v20 = vld [vmem:[#allocation2 + $0x30] sm:$0xf]  ;;  %v7239_v30 = vld [vmem:[#allocation3 + $0xa4] sm:$0xf] }
 0x22a   :  { %v3844_v35 = vsel %vm7847_vm5, %v3839_v53, %v3843_v42  ;;  %v4032_v57 = vshrl.u32 %v3946_v63, 16  ;;  %v4041_v51 = vshrl.u32 %v3947_v20, 16  ;;  %v6594_v36 = vor.u32 %v7239_v30, %v6591_v24  ;;  %v3735_v55 = vld [vmem:[#allocation2 + $0x34] sm:$0xf]  ;;  %v3702_v22 = vld [vmem:[#allocation2 + $0x30] sm:$0xf] }
 0x22b   :  { %5616 = vmatmul.bf16.gmra.mxu1 %v6554_v9  ;;  %3930 = vst [vmem:[#allocation3 + $0x158] sm:$0xf] %v3844_v35  ;;  %v4035_v13 = vshll.u32 %v3946_v63, 16  ;;  %v4044_v61 = vshll.u32 %v3947_v20, 16  ;;  %v3848_v49 = vor.u32 %v3847_v44, %v3843_v42  ;;  %v3851_v54 = vshll.u32 %v3735_v55, 16 }
 0x22c   :  { %v5472_v56 = vpop.f32.mrf.mxu2  ;;  %v4034_v5 = vrot.slane %v4032_v57, 7  ;;  %v4043_v47 = vrot.slane %v4041_v51, 7  ;;  %v3855_v40 = vshrl.u32 %v3735_v55, 16  ;;  %v6589_v28 = vld [vmem:[#allocation3 + $0xa0] sm:$0xf] }
 0x22d   :  { %5763 = vmatmul.bf16.gmra.mxu0 %v6566_v37  ;;  %v3849_v33 = vrot.slane %v3848_v49, 4  ;;  %v3853_v4 = vrot.slane %v3851_v54, 5  ;;  %v7243_v26 = vld [vmem:[#allocation3 + $0xc0] sm:$0xf0]  ;;  %3718 = vst [vmem:[#allocation3 + $0x178] sm:$0xf] %v3702_v22 }
 0x22e   :  { %v5423_v15 = vpop.f32.mrf.mxu1  ;;  %v4037_v41 = vor.u32 %v4035_v13, %v4034_v5  ;;  %v4039_v39 = vrot.slane %v4034_v5, 4  ;;  %v4046_v43 = vor.u32 %v4044_v61, %v4043_v47  ;;  %v3857_v23 = vrot.slane %v3855_v40, 4  ;;  %v3703_v8 = vld [vmem:[#allocation2 + $0x34] sm:$0xf]  ;;  %v6599_v3 = vld [vmem:[#allocation3 + $0xcc] sm:$0xf0] }
 0x22f   :  { %v5424_v7 = vadd.f32 %v8890_v27, %v5423_v15  ;;  %v3854_v9 = vsel %vm7847_vm5, %v3849_v33, %v3853_v4  ;;  %v3948_v1 = vld [vmem:[#allocation2 + $0x34] sm:$0xf]  ;;  %v6590_v38 = vor.u32 %v7243_v26, %v6589_v28  ;;  %v7240_v14 = vld [vmem:[#allocation3 + $0xac] sm:$0xf]  ;;  %3719 = vst [vmem:[#allocation3 + $0x19c] sm:$0xf] %v3703_v8 }
 0x230   :  { %v4038_v11 = vsel %vm7617_vm2, %v4030_v59, %v4037_v41  ;;  %v4047_v16 = vsel %vm7617_vm2, %v4039_v39, %v4046_v43  ;;  %v4144_v60 = vld [vmem:[#allocation2 + $0x34] sm:$0xf]  ;;  %v4050_v25 = vshrl.u32 %v3948_v1, 16  ;;  %v3858_v12 = vor.u32 %v3857_v23, %v3853_v4  ;;  %3931 = vst [vmem:[#allocation3 + $0x17c] sm:$0xf] %v3854_v9 }
 0x231   :  { %5714 = vmatmul.bf16.gmra.mxu3 %v6562_v10  ;;  %v5473_v46 = vadd.f32 %v5472_v56, %v5424_v7  ;;  %4126 = vst [vmem:[#allocation3 + $0x138] sm:$0xf] %v4038_v11  ;;  %v4048_v52 = vrot.slane %v4043_v47, 4  ;;  %v4053_v58 = vshll.u32 %v3948_v1, 16  ;;  %v3736_v24 = vld [vmem:[#allocation2 + $0x38] sm:$0xf]  ;;  %v6602_v31 = vor.u32 %v7240_v14, %v6599_v3 }
 0x232   :  { %4127 = vst [vmem:[#allocation3 + $0x15c] sm:$0xf] %v4047_v16  ;;  %v4052_v62 = vrot.slane %v4050_v25, 7  ;;  %v4145_v6 = vld [vmem:[#allocation2 + $0x38] sm:$0xf]  ;;  %v3861_v37 = vshll.u32 %v3736_v24, 16 }
 0x233   :  { %5670 = vmatmul.bf16.gmra.mxu2 %v6594_v36  ;;  %v5519_v45 = vpop.f32.mrf.mxu3  ;;  %4160 = vst [vmem:[#allocation3 + $0x184] sm:$0xf] %v4144_v60  ;;  %v3865_v50 = vshrl.u32 %v3736_v24, 16  ;;  %v3949_v53 = vld [vmem:[#allocation2 + $0x38] sm:$0xf]  ;;  %v3859_v30 = vrot.slane %v3858_v12, 4 }
 0x234   :  { %v8935_v29 = vadd.f32 %v5519_v45, %v5471_v0  ;;  %4161 = vst [vmem:[#allocation3 + $0x1a8] sm:$0xf] %v4145_v6  ;;  %v4055_v42 = vor.u32 %v4053_v58, %v4052_v62  ;;  %v7244_v63 = vld [vmem:[#allocation3 + $0xc8] sm:$0xf0]  ;;  %v4059_v20 = vshrl.u32 %v3949_v53, 16  ;;  %v3863_v48 = vrot.slane %v3861_v37, 5 }
 0x235   :  { %v5475_v32 = vpop.f32.mrf.mxu2  ;;  %v4166_v56 = vld [vmem:[#allocation2 + $0xc] sm:$0xf]  ;;  %v3737_v57 = vld [vmem:[#allocation2 + $0x3c] sm:$0xf]  ;;  %v3867_v51 = vrot.slane %v3865_v50, 4  ;;  %v4062_v59 = vshll.u32 %v3949_v53, 16 }
 0x236   :  { %v4056_v35 = vsel %vm7617_vm2, %v4048_v52, %v4055_v42  ;;  %v6597_v15 = vld [vmem:[#allocation3 + $0xa8] sm:$0xf]  ;;  %v8942_v36 = vrot.slane %v4059_v20, 7  ;;  %v3871_v44 = vshll.u32 %v3737_v57, 16  ;;  %v6627_v13 = vld [vmem:[#allocation3 + $0x10c] sm:$0xf0]  ;;  %v3864_v55 = vsel %vm7847_vm5, %v3859_v30, %v3863_v48  ;;  %v8967_v30 = vpop.f32.mrf.mxu0 }
 0x237   :  { %v5426_v18 = vpop.f32.mrf.mxu1  ;;  %4128 = vst [vmem:[#allocation3 + $0x180] sm:$0xf] %v4056_v35  ;;  %v7358_v47 = vld [vmem:[#allocation4 + $0x218] sm:$0xff]  ;;  %v3868_v61 = vor.u32 %v3867_v51, %v3863_v48  ;;  %v3704_v49 = vld [vmem:[#allocation2 + $0x38] sm:$0xf]  ;;  %v4057_v40 = vrot.slane %v4052_v62, 4  ;;  %v6598_v43 = vor.u32 %v7244_v63, %v6597_v15 }
 0x238   :  { %v5427_v19 = vadd.f32 %v8890_v27, %v5426_v18  ;;  %3932 = vst [vmem:[#allocation3 + $0x1a0] sm:$0xf] %v3864_v55  ;;  %v4064_v22 = vor.u32 %v4062_v59, %v8942_v36  ;;  %v3875_v41 = vshrl.u32 %v3737_v57, 16  ;;  %v4184_v39 = vshrl.u32 %v4166_v56, 16  ;;  %v7248_v33 = vld [vmem:[#allocation3 + $0xec] sm:$0xf]  ;;  %5803 = vmatpush.bf16.msra.mxu1 %v7358_v47 }
 0x239   :  { %v3869_v4 = vrot.slane %v3868_v61, 4  ;;  %v3873_v23 = vrot.slane %v3871_v44, 5  ;;  %v4167_v28 = vld [vmem:[#allocation2 + $0x10] sm:$0xf]  ;;  %v6630_v26 = vor.u32 %v7248_v33, %v6627_v13  ;;  %v3705_v16 = vld [vmem:[#allocation2 + $0x3c] sm:$0xf] }
 0x23a   :  { %v8938_v0 = vadd.f32 %v5475_v32, %v5427_v19  ;;  %v4065_v11 = vsel %vm7617_vm2, %v4057_v40, %v4064_v22  ;;  %v3877_v45 = vrot.slane %v3875_v41, 4  ;;  %3720 = vst [vmem:[#allocation3 + $0x1c0] sm:$0xf] %v3704_v49  ;;  %v4187_v9 = vshll.u32 %v4166_v56, 16  ;;  %v4146_v32 = vld [vmem:[#allocation2 + $0x3c] sm:$0xf] }
 0x23b   :  { %5621 = vmatmul.bf16.gmra.mxu1 %v6590_v38  ;;  %v5521_v10 = vpop.f32.mrf.mxu3  ;;  %4129 = vst [vmem:[#allocation3 + $0x1a4] sm:$0xf] %v4065_v11  ;;  %v3874_v1 = vsel %vm7847_vm5, %v3869_v4, %v3873_v23  ;;  %v3950_v60 = vld [vmem:[#allocation2 + $0x3c] sm:$0xf]  ;;  %v6625_v25 = vld [vmem:[#allocation3 + $0xe8] sm:$0xf] }
 0x23c   :  { %v8944_v7 = vadd.f32 %v5521_v10, %v5473_v46  ;;  %v7252_v18 = vld [vmem:[#allocation3 + $0x108] sm:$0xf0]  ;;  %3933 = vst [vmem:[#allocation3 + $0x1c4] sm:$0xf] %v3874_v1  ;;  %v4068_v38 = vshrl.u32 %v3950_v60, 16  ;;  %v4186_v3 = vrot.slane %v4184_v39, 4  ;;  %v3878_v53 = vor.u32 %v3877_v45, %v3873_v23 }
 0x23d   :  { %5768 = vmatmul.bf16.gmra.mxu0 %v6602_v31  ;;  %v5477_v5 = vpop.f32.mrf.mxu2  ;;  %v4189_v12 = vrot.slane %v4187_v9, 5  ;;  %3721 = vst [vmem:[#allocation3 + $0x1e4] sm:$0xf] %v3705_v16  ;;  %v8956_v19 = vld [vmem:[#allocation2 + $0x14] sm:$0xf]  ;;  %v4193_v14 = vshll.u32 %v4167_v28, 16  ;;  %v6626_v35 = vor.u32 %v7252_v18, %v6625_v25 }
 0x23e   :  { %v4197_v52 = vshrl.u32 %v4167_v28, 16  ;;  %4162 = vst [vmem:[#allocation3 + $0x1cc] sm:$0xf] %v4146_v32  ;;  %v4066_v58 = vrot.slane %v8942_v36, 4  ;;  %v8959_v24 = vrot.slane %v4068_v38, 7  ;;  %v4071_v6 = vshll.u32 %v3950_v60, 16 }
 0x23f   :  { %v5428_v54 = vpop.f32.mrf.mxu1  ;;  %v4190_v63 = vor.u32 %v4189_v12, %v4186_v3  ;;  %v8965_v20 = vrot.slane %v4193_v14, 5  ;;  %v7249_v57 = vld [vmem:[#allocation3 + $0xf4] sm:$0xf]  ;;  %v6635_v51 = vld [vmem:[#allocation3 + $0x114] sm:$0xf0]  ;;  %v4203_v10 = vshll.u32 %v8956_v19, 16 }
 0x240   :  { %v5429_v46 = vadd.f32 %v8890_v27, %v5428_v54  ;;  %v4073_v31 = vor.u32 %v4071_v6, %v8959_v24  ;;  %v4199_v56 = vrot.slane %v4197_v52, 4  ;;  %v3738_v15 = vld [vmem:[#allocation2 + $0x40] sm:$0xf]  ;;  %v8977_v47 = vld [vmem:[#allocation3 + $0x150] sm:$0xf0]  ;;  %v3879_v55 = vrot.slane %v3878_v53, 4 }
 0x241   :  { %5719 = vmatmul.bf16.gmra.mxu3 %v6598_v43  ;;  %v4147_v36 = vld [vmem:[#allocation2 + $0x40] sm:$0xf]  ;;  %v3881_v61 = vshll.u32 %v3738_v15, 16  ;;  %v3885_v49 = vshrl.u32 %v3738_v15, 16  ;;  %v6638_v54 = vor.u32 %v7249_v57, %v6635_v51  ;;  %v4075_v22 = vrot.slane %v8959_v24, 4 }
 0x242   :  { %v8952_v8 = vadd.f32 %v5477_v5, %v5429_v46  ;;  %v4074_v59 = vsel %vm7617_vm2, %v4066_v58, %v4073_v31  ;;  %v6633_v44 = vld [vmem:[#allocation3 + $0xf0] sm:$0xf]  ;;  %4163 = vst [vmem:[#allocation3 + $0x1f0] sm:$0xf] %v4147_v36  ;;  %v8980_v41 = vrot.slane %v4190_v63, 4  ;;  %v4200_v39 = vor.u32 %v4199_v56, %v8965_v20 }
 0x243   :  { %5675 = vmatmul.bf16.gmra.mxu2 %v6630_v26  ;;  %v8975_v13 = vld [vmem:[#allocation3 + $0x130] sm:$0xf]  ;;  %4130 = vst [vmem:[#allocation3 + $0x1c8] sm:$0xf] %v4074_v59  ;;  %v6663_v43 = vld [vmem:[#allocation3 + $0x154] sm:$0xf0] }
 0x244   :  { %v5524_v62 = vpop.f32.mrf.mxu3  ;;  %v3951_v40 = vld [vmem:[#allocation2 + $0x40] sm:$0xf]  ;;  %v3883_v46 = vrot.slane %v3881_v61, 5  ;;  %v8983_v4 = vrot.slane %v4203_v10, 5  ;;  %v4207_v23 = vshrl.u32 %v8956_v19, 16  ;;  %v3887_v9 = vrot.slane %v3885_v49, 4 }
 0x245   :  { %v8962_v37 = vadd.f32 %v5524_v62, %v8938_v0  ;;  %v5480_v50 = vpop.f32.mrf.mxu2  ;;  %v7253_v0 = vld [vmem:[#allocation3 + $0x110] sm:$0xf0]  ;;  %v4077_v33 = vshrl.u32 %v3951_v40, 16  ;;  %v4080_v11 = vshll.u32 %v3951_v40, 16  ;;  %v3740_v16 = vld [vmem:[#allocation2 + $0x48] sm:$0x1]  ;;  %v6662_v19 = vor.u32 %v8977_v47, %v8975_v13 }
 0x246   :  { %v6634_v26 = vor.u32 %v7253_v0, %v6633_v44  ;;  %v3739_v45 = vld [vmem:[#allocation2 + $0x44] sm:$0xf]  ;;  %v3884_v25 = vsel %vm7847_vm5, %v3879_v55, %v3883_v46  ;;  %v3706_v3 = vld [vmem:[#allocation2 + $0x40] sm:$0xf]  ;;  %v3888_v14 = vor.u32 %v3887_v9, %v3883_v46  ;;  %v3901_v62 = vshll.u32 %v3740_v16, 16 }
 0x247   :  { %v5431_v42 = vpop.f32.mrf.mxu1  ;;  %v7357_v60 = vld [vmem:[#allocation4 + $0x210] sm:$0xff]  ;;  %v8991_v18 = vrot.slane %v4077_v33, 7  ;;  %v3891_v38 = vshll.u32 %v3739_v45, 16  ;;  %3934 = vst [vmem:[#allocation3 + $0x1e8] sm:$0xf] %v3884_v25  ;;  %v3895_v52 = vshrl.u32 %v3739_v45, 16  ;;  %v4196_v15 = vsel %vm7847_vm5, %v8980_v41, %v8965_v20 }
 0x248   :  { %v5432_v48 = vadd.f32 %v8890_v27, %v5431_v42  ;;  %v7257_v24 = vld [vmem:[#allocation3 + $0x134] sm:$0xf]  ;;  %5804 = vmatpush.bf16.msra.mxu1 %v7357_v60  ;;  %3722 = vst [vmem:[#allocation3 + $0x208] sm:$0xf] %v3706_v3  ;;  %v4201_v53 = vrot.slane %v4200_v39, 4  ;;  %v3889_v31 = vrot.slane %v3888_v14, 4 }
 0x249   :  { %v4082_v6 = vor.u32 %v4080_v11, %v8991_v18  ;;  %v6666_v42 = vor.u32 %v7257_v24, %v6663_v43  ;;  %v3897_v63 = vrot.slane %v3895_v52, 4  ;;  %v4169_v56 = vld [vmem:[#allocation2 + $0x18] sm:$0xf]  ;;  %v3903_v10 = vrot.slane %v3901_v62, 5  ;;  %v4148_v0 = vld [vmem:[#allocation2 + $0x44] sm:$0xf] }
 0x24a   :  { %v8973_v5 = vadd.f32 %v5480_v50, %v5432_v48  ;;  %v3893_v50 = vrot.slane %v3891_v38, 5  ;;  %v4209_v48 = vrot.slane %v4207_v23, 4  ;;  %v3952_v44 = vld [vmem:[#allocation2 + $0x44] sm:$0xf]  ;;  %v3953_v55 = vld [vmem:[#allocation2 + $0x48] sm:$0xf] }
 0x24b   :  { %5626 = vmatmul.bf16.gmra.mxu1 %v6626_v35  ;;  %v8997_v35 = vpop.f32.mrf.mxu0  ;;  %v4083_v51 = vsel %vm7617_vm2, %v4075_v22, %v4082_v6  ;;  %v4086_v49 = vshrl.u32 %v3952_v44, 16  ;;  %v4098_v40 = vshll.u32 %v3953_v55, 16  ;;  %v4206_v22 = vsel %vm7847_vm5, %v4201_v53, %v8983_v4  ;;  %v4170_v39 = vld [vmem:[#allocation2 + $0x1c] sm:$0xf]  ;;  %4164 = vst [vmem:[#allocation3 + $0x214] sm:$0xf] %v4148_v0 }
 0x24c   :  { %v5526_v28 = vpop.f32.mrf.mxu3  ;;  %4131 = vst [vmem:[#allocation3 + $0x1ec] sm:$0xf] %v4083_v51  ;;  %v3894_v36 = vsel %vm7847_vm5, %v3889_v31, %v3893_v50  ;;  %v3898_v59 = vor.u32 %v3897_v63, %v3893_v50  ;;  %v4210_v61 = vor.u32 %v4209_v48, %v8983_v4  ;;  %v4084_v43 = vrot.slane %v8991_v18, 4  ;;  %v6671_v3 = vld [vmem:[#allocation3 + $0x15c] sm:$0xf0] }
 0x24d   :  { %v8987_v1 = vadd.f32 %v5526_v28, %v8952_v8  ;;  %5773 = vmatmul.bf16.gmra.mxu0 %v6638_v54  ;;  %v5482_v32 = vpop.f32.mrf.mxu2  ;;  %v3707_v8 = vld [vmem:[#allocation2 + $0x44] sm:$0xf]  ;;  %3935 = vst [vmem:[#allocation3 + $0x20c] sm:$0xf] %v3894_v36  ;;  %v4095_v54 = vshrl.u32 %v3953_v55, 16  ;;  %v4213_v46 = vshll.u32 %v4169_v56, 16 }
 0x24e   :  { %3723 = vst [vmem:[#allocation3 + $0x22c] sm:$0xf] %v3707_v8  ;;  %v3899_v41 = vrot.slane %v3898_v59, 4  ;;  %v4217_v33 = vshrl.u32 %v4169_v56, 16  ;;  %v4089_v11 = vshll.u32 %v3952_v44, 16  ;;  %v4211_v9 = vrot.slane %v4210_v61, 4 }
 0x24f   :  { %v5433_v12 = vpop.f32.mrf.mxu1  ;;  %v4097_v45 = vrot.slane %v4095_v54, 7  ;;  %4363 = vst [vmem:[#allocation3 + $0x20] sm:$0xf] %v4196_v15  ;;  %v4223_v14 = vshll.u32 %v4170_v39, 16  ;;  %v4227_v52 = vshrl.u32 %v4170_v39, 16  ;;  %v7356_v44 = vld [vmem:[#allocation4 + $0x208] sm:$0xff] }
 0x250   :  { %v5434_v58 = vadd.f32 %v8890_v27, %v5433_v12  ;;  %v3904_v4 = vsel %vm7847_vm5, %v3899_v41, %v3903_v10  ;;  %4364 = vst [vmem:[#allocation3 + $0x44] sm:$0xf] %v4206_v22  ;;  %v4219_v60 = vrot.slane %v4217_v33, 4  ;;  %v4171_v62 = vld [vmem:[#allocation2 + $0x20] sm:$0xf]  ;;  %5805 = vmatpush.bf16.msra.mxu1 %v7356_v44 }
 0x251   :  { %5724 = vmatmul.bf16.gmra.mxu3 %v6634_v26  ;;  %v4088_v26 = vrot.slane %v4086_v49, 7  ;;  %3936 = vst [vmem:[#allocation3 + $0x230] sm:$0xf] %v3904_v4  ;;  %v4172_v50 = vld [vmem:[#allocation2 + $0x24] sm:$0xf]  ;;  %v4225_v31 = vrot.slane %v4223_v14, 5 }
 0x252   :  { %v8999_v57 = vadd.f32 %v5482_v32, %v5434_v58  ;;  %v4215_v32 = vrot.slane %v4213_v46, 5  ;;  %v7258_v53 = vld [vmem:[#allocation3 + $0x13c] sm:$0xf]  ;;  %v4229_v47 = vrot.slane %v4227_v52, 4  ;;  %v6699_v51 = vld [vmem:[#allocation3 + $0x19c] sm:$0xf0] }
 0x253   :  { %5680 = vmatmul.bf16.gmra.mxu2 %v6666_v42  ;;  %v4091_v18 = vor.u32 %v4089_v11, %v4088_v26  ;;  %v4093_v38 = vrot.slane %v4088_v26, 4  ;;  %v9029_v63 = vpop.f32.mrf.mxu0  ;;  %v6674_v56 = vor.u32 %v7258_v53, %v6671_v3  ;;  %v7262_v13 = vld [vmem:[#allocation3 + $0x158] sm:$0xf0]  ;;  %v4237_v10 = vshrl.u32 %v4171_v62, 16  ;;  %v6669_v36 = vld [vmem:[#allocation3 + $0x138] sm:$0xf] }
 0x254   :  { %v5529_v20 = vpop.f32.mrf.mxu3  ;;  %v4220_v12 = vor.u32 %v4219_v60, %v4215_v32  ;;  %v4216_v6 = vsel %vm7847_vm5, %v4211_v9, %v4215_v32  ;;  %v4243_v0 = vshll.u32 %v4172_v50, 16  ;;  %v4230_v55 = vor.u32 %v4229_v47, %v4225_v31  ;;  %v7266_v54 = vld [vmem:[#allocation3 + $0x17c] sm:$0xf]  ;;  %v6707_v47 = vld [vmem:[#allocation3 + $0x1a4] sm:$0xf0] }
 0x255   :  { %v9015_v23 = vadd.f32 %v5529_v20, %v8973_v5  ;;  %v5485_v28 = vpop.f32.mrf.mxu2  ;;  %v4100_v5 = vor.u32 %v4098_v40, %v4097_v45  ;;  %v4092_v58 = vsel %vm7617_vm2, %v4084_v43, %v4091_v18  ;;  %4365 = vst [vmem:[#allocation3 + $0x68] sm:$0xf] %v4216_v6  ;;  %v4239_v40 = vrot.slane %v4237_v10, 4  ;;  %v7270_v3 = vld [vmem:[#allocation3 + $0x198] sm:$0xf0] }
 0x256   :  { %4132 = vst [vmem:[#allocation3 + $0x210] sm:$0xf] %v4092_v58  ;;  %v4221_v42 = vrot.slane %v4220_v12, 4  ;;  %v4245_v22 = vrot.slane %v4243_v0, 5  ;;  %v4247_v39 = vshrl.u32 %v4172_v50, 16  ;;  %v6670_v20 = vor.u32 %v7262_v13, %v6669_v36 }
 0x257   :  { %v5436_v16 = vpop.f32.mrf.mxu1  ;;  %v4101_v24 = vsel %vm7617_vm2, %v4093_v38, %v4100_v5  ;;  %v6702_v43 = vor.u32 %v7266_v54, %v6699_v51  ;;  %v4231_v46 = vrot.slane %v4230_v55, 4  ;;  %v6697_v5 = vld [vmem:[#allocation3 + $0x178] sm:$0xf]  ;;  %v7271_v0 = vld [vmem:[#allocation3 + $0x1a0] sm:$0xf0] }
 0x258   :  { %v5437_v25 = vadd.f32 %v8890_v27, %v5436_v16  ;;  %4133 = vst [vmem:[#allocation3 + $0x234] sm:$0xf] %v4101_v24  ;;  %v4226_v34 = vsel %vm7847_vm5, %v4221_v42, %v4225_v31  ;;  %v4249_v26 = vrot.slane %v4247_v39, 4  ;;  %v6698_v31 = vor.u32 %v7270_v3, %v6697_v5  ;;  %v6735_v44 = vld [vmem:[#allocation3 + $0x1e4] sm:$0xf0]  ;;  %v7355_v55 = vld [vmem:[#allocation4 + $0x200] sm:$0xff] }
 0x259   :  { %4366 = vst [vmem:[#allocation3 + $0x8c] sm:$0xf] %v4226_v34  ;;  %5806 = vmatpush.bf16.msra.mxu1 %v7355_v55 }
 0x25a   :  { %v5486_v8 = vadd.f32 %v5485_v28, %v5437_v25  ;;  %v4174_v28 = vld [vmem:[#allocation2 + $0x2c] sm:$0xf]  ;;  %v4250_v32 = vor.u32 %v4249_v26, %v4245_v22 }
 0x25b   :  { %5631 = vmatmul.bf16.gmra.mxu1 %v6662_v19  ;;  %v4233_v19 = vshll.u32 %v4171_v62, 16  ;;  %v4263_v18 = vshll.u32 %v4174_v28, 16  ;;  %v9041_v52 = vpop.f32.mrf.mxu0  ;;  %v4267_v53 = vshrl.u32 %v4174_v28, 16 }
 0x25c   :  { %v5531_v48 = vpop.f32.mrf.mxu3  ;;  %v4251_v14 = vrot.slane %v4250_v32, 4  ;;  %v7279_v32 = vld [vmem:[#allocation3 + $0x1e0] sm:$0xf0]  ;;  %v6569_v21 = vld [vmem:[#allocation3 + $0x68] sm:$0xf] }
 0x25d   :  { %v9034_v15 = vadd.f32 %v5531_v48, %v8999_v57  ;;  %5778 = vmatmul.bf16.gmra.mxu0 %v6674_v56  ;;  %v5487_v59 = vpop.f32.mrf.mxu2  ;;  %v4235_v61 = vrot.slane %v4233_v19, 5  ;;  %v4173_v57 = vld [vmem:[#allocation2 + $0x28] sm:$0xf]  ;;  %v4265_v13 = vrot.slane %v4263_v18, 5  ;;  %v7267_v48 = vld [vmem:[#allocation3 + $0x184] sm:$0xf] }
 0x25e   :  { %v4253_v11 = vshll.u32 %v4173_v57, 16  ;;  %v4257_v45 = vshrl.u32 %v4173_v57, 16  ;;  %v4269_v51 = vrot.slane %v4267_v53, 4  ;;  %v6710_v34 = vor.u32 %v7267_v48, %v6707_v47 }
 0x25f   :  { %v5438_v49 = vpop.f32.mrf.mxu1  ;;  %v4240_v33 = vor.u32 %v4239_v40, %v4235_v61  ;;  %v4236_v4 = vsel %vm7847_vm5, %v4231_v46, %v4235_v61  ;;  %v6705_v61 = vld [vmem:[#allocation3 + $0x180] sm:$0xf] }
 0x260   :  { %v5439_v41 = vadd.f32 %v8890_v27, %v5438_v49  ;;  %4367 = vst [vmem:[#allocation3 + $0xb0] sm:$0xf] %v4236_v4  ;;  %v4255_v60 = vrot.slane %v4253_v11, 5  ;;  %v4259_v25 = vrot.slane %v4257_v45, 4  ;;  %v4270_v54 = vor.u32 %v4269_v51, %v4265_v13  ;;  %v7284_v51 = vld [vmem:[#allocation3 + $0x20c] sm:$0xf] }
 0x261   :  { %5729 = vmatmul.bf16.gmra.mxu3 %v6670_v20  ;;  %v4241_v9 = vrot.slane %v4240_v33, 4  ;;  %v7275_v20 = vld [vmem:[#allocation3 + $0x1c4] sm:$0xf] }
 0x262   :  { %v5488_v16 = vadd.f32 %v5487_v59, %v5439_v41  ;;  %v4260_v24 = vor.u32 %v4259_v25, %v4255_v60  ;;  %v4256_v50 = vsel %vm7847_vm5, %v4251_v14, %v4255_v60  ;;  %v4175_v41 = vld [vmem:[#allocation2 + $0x30] sm:$0xf]  ;;  %v6738_v46 = vor.u32 %v7275_v20, %v6735_v44  ;;  %v9062_v14 = vld [vmem:[%s9269_s4] ss:$0 sm:$0xff] }
 0x263   :  { %5685 = vmatmul.bf16.gmra.mxu2 %v6702_v43  ;;  %v4246_v12 = vsel %vm7847_vm5, %v4241_v9, %v4245_v22  ;;  %4369 = vst [vmem:[#allocation3 + $0xf8] sm:$0xf] %v4256_v50  ;;  %v9052_v40 = vpop.f32.mrf.mxu0  ;;  %v6706_v22 = vor.u32 %v7271_v0, %v6705_v61  ;;  %v4176_v43 = vld [vmem:[#allocation2 + $0x34] sm:$0xf]  ;;  %v4273_v57 = vshll.u32 %v4175_v41, 16  ;;  %v4277_v33 = vshrl.u32 %v4175_v41, 16 }
 0x264   :  { %v5534_v38 = vpop.f32.mrf.mxu3  ;;  %4368 = vst [vmem:[#allocation3 + $0xd4] sm:$0xf] %v4246_v12  ;;  %v4261_v56 = vrot.slane %v4260_v24, 4  ;;  %v4271_v26 = vrot.slane %v4270_v54, 4  ;;  %v6733_v9 = vld [vmem:[#allocation3 + $0x1c0] sm:$0xf] }
 0x265   :  { %v9043_v62 = vadd.f32 %v5534_v38, %v5486_v8  ;;  %v4275_v11 = vrot.slane %v4273_v57, 5  ;;  %v4279_v45 = vrot.slane %v4277_v33, 4  ;;  %v4287_v12 = vshrl.u32 %v4176_v43, 16  ;;  %v4177_v61 = vld [vmem:[#allocation2 + $0x38] sm:$0xf] }
 0x266   :  { %v5490_v58 = vpop.f32.mrf.mxu2  ;;  %v4266_v8 = vsel %vm7847_vm5, %v4261_v56, %v4265_v13  ;;  %v6734_v24 = vor.u32 %v7279_v32, %v6733_v9 }
 0x267   :  { %4370 = vst [vmem:[#allocation3 + $0x11c] sm:$0xf] %v4266_v8  ;;  %v4280_v60 = vor.u32 %v4279_v45, %v4275_v11  ;;  %v4289_v56 = vrot.slane %v4287_v12, 4  ;;  %v6779_v12 = vld [vmem:[#allocation3 + $0x234] sm:$0xf0] }
 0x268   :  { %v5441_v6 = vpop.f32.mrf.mxu1 }
 0x269   :  { %v5442_v42 = vadd.f32 %v8890_v27, %v5441_v6  ;;  %v4281_v5 = vrot.slane %v4280_v60, 4  ;;  %v6743_v6 = vld [vmem:[#allocation3 + $0x1ec] sm:$0xf0] }
 0x26b   :  { %5636 = vmatmul.bf16.gmra.mxu1 %v6698_v31  ;;  %v5491_v19 = vadd.f32 %v5490_v58, %v5442_v42  ;;  %v9067_v53 = vpop.f32.mrf.mxu0  ;;  %v7276_v31 = vld [vmem:[#allocation3 + $0x1cc] sm:$0xf] }
 0x26c   :  { %v5536_v10 = vpop.f32.mrf.mxu3  ;;  %v6746_v13 = vor.u32 %v7276_v31, %v6743_v6  ;;  %v6777_v31 = vld [vmem:[#allocation3 + $0x210] sm:$0xf] }
 0x26d   :  { %v9050_v36 = vadd.f32 %v5536_v10, %v5488_v16  ;;  %5783 = vmatmul.bf16.gmra.mxu0 %v6710_v34  ;;  %v4283_v16 = vshll.u32 %v4176_v43, 16  ;;  %v6771_v34 = vld [vmem:[#allocation3 + $0x22c] sm:$0xf0]  ;;  %v6741_v10 = vld [vmem:[#allocation3 + $0x1c8] sm:$0xf] }
 0x26e   :  { %v5492_v59 = vpop.f32.mrf.mxu2  ;;  %v6774_v54 = vor.u32 %v7284_v51, %v6771_v34 }
 0x26f   :  { %v4285_v3 = vrot.slane %v4283_v16, 5 }
 0x270   :  { %v5443_v49 = vpop.f32.mrf.mxu1 }
 0x271   :  { %v5444_v39 = vadd.f32 %v8890_v27, %v5443_v49  ;;  %5734 = vmatmul.bf16.gmra.mxu3 %v6706_v22  ;;  %v4276_v27 = vsel %vm7847_vm5, %v4271_v26, %v4275_v11  ;;  %v4286_v50 = vsel %vm7847_vm5, %v4281_v5, %v4285_v3  ;;  %v4178_v49 = vld [vmem:[#allocation2 + $0x3c] sm:$0xf]  ;;  %v4293_v22 = vshll.u32 %v4177_v61, 16  ;;  %v6769_v26 = vld [vmem:[#allocation3 + $0x208] sm:$0xf] }
 0x272   :  { %4371 = vst [vmem:[#allocation3 + $0x140] sm:$0xf] %v4276_v27  ;;  %v4303_v57 = vshll.u32 %v4178_v49, 16  ;;  %v7288_v11 = vld [vmem:[#allocation3 + $0x228] sm:$0xf0]  ;;  %v4307_v9 = vshrl.u32 %v4178_v49, 16 }
 0x273   :  { %v5493_v28 = vadd.f32 %v5492_v59, %v5444_v39  ;;  %5690 = vmatmul.bf16.gmra.mxu2 %v6738_v46  ;;  %4372 = vst [vmem:[#allocation3 + $0x164] sm:$0xf] %v4286_v50  ;;  %v4290_v59 = vor.u32 %v4289_v56, %v4285_v3  ;;  %v4297_v39 = vshrl.u32 %v4177_v61, 16  ;;  %v4295_v43 = vrot.slane %v4293_v22, 5  ;;  %v9072_v33 = vpop.f32.mrf.mxu0  ;;  %v7285_v3 = vld [vmem:[#allocation3 + $0x214] sm:$0xf] }
 0x274   :  { %v5539_v4 = vpop.f32.mrf.mxu3  ;;  %v6770_v5 = vor.u32 %v7288_v11, %v6769_v26  ;;  %v4309_v6 = vrot.slane %v4307_v9, 4  ;;  %v6782_v50 = vor.u32 %v7285_v3, %v6779_v12  ;;  %v7289_v56 = vld [vmem:[#allocation3 + $0x230] sm:$0xf0]  ;;  %v6533_v9 = vld [vmem:[#allocation3 + $0x20] sm:$0xf] }
 0x275   :  { %v9057_v25 = vadd.f32 %v5539_v4, %v5491_v19  ;;  %v7280_v19 = vld [vmem:[#allocation3 + $0x1e8] sm:$0xf0]  ;;  %v4291_v41 = vrot.slane %v4290_v59, 4  ;;  %v4299_v46 = vrot.slane %v4297_v39, 4  ;;  %v6778_v51 = vor.u32 %v7289_v56, %v6777_v31 }
 0x276   :  { %v5495_v18 = vpop.f32.mrf.mxu2  ;;  %v6742_v44 = vor.u32 %v7280_v19, %v6741_v10  ;;  %v4179_v10 = vld [vmem:[#allocation2 + $0x40] sm:$0xf] }
 0x277   :  { %v4296_v45 = vsel %vm7847_vm5, %v4291_v41, %v4295_v43  ;;  %v4300_v16 = vor.u32 %v4299_v46, %v4295_v43 }
 0x278   :  { %v5446_v38 = vpop.f32.mrf.mxu1  ;;  %4373 = vst [vmem:[#allocation3 + $0x188] sm:$0xf] %v4296_v45  ;;  %v5564_v45 = vadd.f32 %v8967_v30, %v8909_v2  ;;  %v5566_v30 = vadd.f32 %v8997_v35, %v8923_v17  ;;  %v7245_v35 = vld [vmem:[#allocation3 + $0xd0] sm:$0xf0] }
 0x279   :  { %v5447_v58 = vadd.f32 %v9062_v14, %v5446_v38  ;;  %v4301_v60 = vrot.slane %v4300_v16, 4 }
 0x27b   :  { %5641 = vmatmul.bf16.gmra.mxu1 %v6734_v24  ;;  %v5496_v42 = vadd.f32 %v5495_v18, %v5447_v58  ;;  %v4305_v18 = vrot.slane %v4303_v57, 5  ;;  %v7227_v57 = vld [vmem:[#allocation3 + $0x40] sm:$0xf0] }
 0x27c   :  { %v5541_v47 = vpop.f32.mrf.mxu3 }
 0x27d   :  { %v9069_v8 = vadd.f32 %v5541_v47, %v5493_v28  ;;  %5788 = vmatmul.bf16.gmra.mxu0 %v6746_v13  ;;  %v4306_v58 = vsel %vm7847_vm5, %v4301_v60, %v4305_v18  ;;  %v9081_v13 = vpop.f32.mrf.mxu0  ;;  %v4310_v19 = vor.u32 %v4309_v6, %v4305_v18  ;;  %v6534_v18 = vor.u32 %v7227_v57, %v6533_v9  ;;  %v7236_v6 = vld [vmem:[#allocation3 + $0x88] sm:$0xf0] }
 0x27e   :  { %v5497_v48 = vpop.f32.mrf.mxu2  ;;  %4374 = vst [vmem:[#allocation3 + $0x1ac] sm:$0xf] %v4306_v58 }
 0x27f   :  { %v4311_v22 = vrot.slane %v4310_v19, 4  ;;  %v6570_v19 = vor.u32 %v7236_v6, %v6569_v21 }
 0x280   :  { %v5448_v0 = vpop.f32.mrf.mxu1 }
 0x281   :  { %v5449_v55 = vadd.f32 %v9062_v14, %v5448_v0  ;;  %5739 = vmatmul.bf16.gmra.mxu3 %v6742_v44  ;;  %v4180_v0 = vld [vmem:[#allocation2 + $0x44] sm:$0xf]  ;;  %v4313_v44 = vshll.u32 %v4179_v10, 16 }
 0x282   :  { %v4323_v61 = vshll.u32 %v4180_v0, 16  ;;  %v4327_v49 = vshrl.u32 %v4180_v0, 16 }
 0x283   :  { %v5498_v20 = vadd.f32 %v5497_v48, %v5449_v55  ;;  %5695 = vmatmul.bf16.gmra.mxu2 %v6774_v54  ;;  %v4317_v55 = vshrl.u32 %v4179_v10, 16  ;;  %v4315_v39 = vrot.slane %v4313_v44, 5  ;;  %v5574_v10 = vadd.f32 %v9052_v40, %v8962_v37  ;;  %v6641_v37 = vld [vmem:[#allocation3 + $0xf8] sm:$0xf] }
 0x284   :  { %v5544_v28 = vpop.f32.mrf.mxu3  ;;  %v4329_v43 = vrot.slane %v4327_v49, 4  ;;  %v7254_v49 = vld [vmem:[#allocation3 + $0x118] sm:$0xf0] }
 0x285   :  { %v9076_v4 = vadd.f32 %v5544_v28, %v5496_v42  ;;  %v4319_v41 = vrot.slane %v4317_v55, 4  ;;  %v4316_v28 = vsel %vm7847_vm5, %v4311_v22, %v4315_v39  ;;  %v5576_v55 = vadd.f32 %v9067_v53, %v8987_v1  ;;  %v7263_v53 = vld [vmem:[#allocation3 + $0x160] sm:$0xf0] }
 0x286   :  { %v5500_v32 = vpop.f32.mrf.mxu2  ;;  %4375 = vst [vmem:[#allocation3 + $0x1d0] sm:$0xf] %v4316_v28  ;;  %v6677_v28 = vld [vmem:[#allocation3 + $0x140] sm:$0xf] }
 0x288   :  { %v5451_v27 = vpop.f32.mrf.mxu1 }
 0x289   :  { %v5452_v38 = vadd.f32 %v9062_v14, %v5451_v27 }
 0x28b   :  { %5646 = vmatmul.bf16.gmra.mxu1 %v6770_v5  ;;  %v5501_v24 = vadd.f32 %v5500_v32, %v5452_v38  ;;  %v9278_v5 = vld [vmem:[#allocation7_spill] sm:$0xff] }
 0x28c   :  { %v5546_v42 = vpop.f32.mrf.mxu3 }
 0x28d   :  { %v9083_v47 = vadd.f32 %v5546_v42, %v5498_v20  ;;  %5793 = vmatmul.bf16.gmra.mxu0 %v6782_v50  ;;  %v4325_v20 = vrot.slane %v4323_v61, 5  ;;  %v5569_v50 = vadd.f32 %v9029_v63, %v8935_v29  ;;  %v5583_v42 = vpop.f32.mrf.mxu0  ;;  %v6605_v29 = vld [vmem:[#allocation3 + $0xb0] sm:$0xf] }
 0x28e   :  { %v5502_v59 = vpop.f32.mrf.mxu2 }
 0x28f   :  { %v4330_v26 = vor.u32 %v4329_v43, %v4325_v20 }
 0x290   :  { %v5453_v48 = vpop.f32.mrf.mxu1 }
 0x291   :  { %v5454_v34 = vadd.f32 %v9062_v14, %v5453_v48  ;;  %5744 = vmatmul.bf16.gmra.mxu3 %v6778_v51  ;;  %v4320_v14 = vor.u32 %v4319_v41, %v4315_v39  ;;  %v4331_v27 = vrot.slane %v4330_v26, 4  ;;  %v5571_v48 = vadd.f32 %v9041_v52, %v8944_v7 }
 0x292   :  { %v6642_v39 = vor.u32 %v7254_v49, %v6641_v37  ;;  %v5581_v41 = vadd.f32 %v9081_v13, %v9034_v15  ;;  %v7272_v13 = vld [vmem:[#allocation3 + $0x1a8] sm:$0xf0] }
 0x293   :  { %v5503_v54 = vadd.f32 %v5502_v59, %v5454_v34  ;;  %v4321_v32 = vrot.slane %v4320_v14, 4  ;;  %v4336_v3 = vsel %vm7847_vm5, %v4331_v27, %v9278_v5  ;;  %v6606_v59 = vor.u32 %v7245_v35, %v6605_v29  ;;  %v6713_v27 = vld [vmem:[#allocation3 + $0x188] sm:$0xf] }
 0x294   :  { %v5549_v46 = vpop.f32.mrf.mxu3  ;;  %4377 = vst [vmem:[#allocation3 + $0x218] sm:$0xf] %v4336_v3 }
 0x295   :  { %v9088_v11 = vadd.f32 %v5549_v46, %v5501_v24  ;;  %v4326_v38 = vsel %vm7847_vm5, %v4321_v32, %v4325_v20  ;;  %v5585_v17 = vpop.f32.mrf.mxu0  ;;  %v5584_v46 = vadd.f32 %v5583_v42, %v9043_v62  ;;  %v6714_v62 = vor.u32 %v7272_v13, %v6713_v27  ;;  %v5849_v13 = vld [vmem:[%s9265_s0 + $0x8] sm:$0xff] }
 0x296   :  { %4376 = vst [vmem:[#allocation3 + $0x1f4] sm:$0xf] %v4326_v38  ;;  %v5586_v26 = vadd.f32 %v5585_v17, %v9050_v36 }
 0x298   :  { %v5612_v16 = vpop.f32.mrf.mxu1 }
 0x299   :  { %v9092_v60 = vadd.f32 %v5612_v16, %v5564_v45 }
 0x29b   :  { %5807 = vmatmul.bf16.vlgmr.msra.gmra.mxu1 %v6534_v18  ;;  %v6785_v29 = vld [vmem:[#allocation3 + $0x218] sm:$0xf] }
 0x29c   :  { %v5551_v12 = vpop.f32.mrf.mxu3 }
 0x29d   :  { %v9099_v2 = vadd.f32 %v5551_v12, %v5503_v54  ;;  %v5588_v44 = vpop.f32.mrf.mxu0  ;;  %v5579_v54 = vadd.f32 %v9072_v33, %v9015_v23  ;;  %v6678_v23 = vor.u32 %v7263_v53, %v6677_v28  ;;  %v5661_v12 = vpop.f32.mrf.mxu2 }
 0x29e   :  { %v5589_v9 = vadd.f32 %v5588_v44, %v9057_v25  ;;  %v6749_v25 = vld [vmem:[#allocation3 + $0x1d0] sm:$0xf]  ;;  %v5662_v37 = vadd.f32 %v5661_v12, %v9092_v60 }
 0x2a0   :  { %v5614_v58 = vpop.f32.mrf.mxu1 }
 0x2a1   :  { %v9103_v24 = vadd.f32 %v5614_v58, %v5566_v30  ;;  %v7281_v58 = vld [vmem:[#allocation3 + $0x1f0] sm:$0xf0] }
 0x2a2   :  { %v6750_v21 = vor.u32 %v7281_v58, %v6749_v25 }
 0x2a4   :  { %v5710_v36 = vpop.f32.mrf.mxu3 }
 0x2a5   :  { %v5590_v52 = vpop.f32.mrf.mxu0 }
 0x2a6   :  { %v5591_v5 = vadd.f32 %v5590_v52, %v9069_v8 }
 0x2a8   :  { %v5617_v31 = vpop.f32.mrf.mxu1 }
 0x2a9   :  { %v9107_v56 = vadd.f32 %v5617_v31, %v5569_v50 }
 0x2ab   :  { %5812 = vmatmul.bf16.gmra.mxu1 %v6570_v19  ;;  %v5663_v19 = vpop.f32.mrf.mxu2 }
 0x2ad   :  { %v5593_v20 = vpop.f32.mrf.mxu0 }
 0x2ae   :  { %v5594_v6 = vadd.f32 %v5593_v20, %v9076_v4 }
 0x2b0   :  { %v5619_v51 = vpop.f32.mrf.mxu1 }
 0x2b1   :  { %v9111_v34 = vadd.f32 %v5619_v51, %v5571_v48  ;;  %v5712_v48 = vpop.f32.mrf.mxu3 }
 0x2b5   :  { %v5595_v33 = vpop.f32.mrf.mxu0 }
 0x2b6   :  { %v5596_v51 = vadd.f32 %v5595_v33, %v9083_v47 }
 0x2b8   :  { %v5622_v0 = vpop.f32.mrf.mxu1 }
 0x2b9   :  { %v9115_v63 = vadd.f32 %v5622_v0, %v5574_v10  ;;  %v5666_v10 = vpop.f32.mrf.mxu2  ;;  %v5715_v0 = vpop.f32.mrf.mxu3 }
 0x2bb   :  { %5817 = vmatmul.bf16.gmra.mxu1 %v6606_v59  ;;  %v7290_v59 = vld [vmem:[#allocation3 + $0x238] sm:$0xf0] }
 0x2bd   :  { %v5598_v15 = vpop.f32.mrf.mxu0 }
 0x2be   :  { %v5599_v4 = vadd.f32 %v5598_v15, %v9088_v11  ;;  %v5848_v11 = vld [vmem:[%s9265_s0] sm:$0xff] }
 0x2c0   :  { %v5624_v61 = vpop.f32.mrf.mxu1 }
 0x2c1   :  { %v9119_v7 = vadd.f32 %v5624_v61, %v5576_v55  ;;  %v6786_v61 = vor.u32 %v7290_v59, %v6785_v29  ;;  %v5668_v49 = vpop.f32.mrf.mxu2  ;;  %v5717_v47 = vpop.f32.mrf.mxu3 }
 0x2c2   :  { %v5669_v58 = vadd.f32 %v5668_v49, %v9111_v34  ;;  %v5852_v49 = vld [vmem:[%s9265_s0 + $0x20] sm:$0xff] }
 0x2c5   :  { %v5600_v38 = vpop.f32.mrf.mxu0 }
 0x2c8   :  { %v5627_v22 = vpop.f32.mrf.mxu1 }
 0x2c9   :  { %v9123_v40 = vadd.f32 %v5627_v22, %v5579_v54  ;;  %v5601_v54 = vadd.f32 %v5600_v38, %v9099_v2 }
 0x2cb   :  { %5822 = vmatmul.bf16.gmra.mxu1 %v6642_v39 }
 0x2cd   :  { %v5759_v50 = vpop.f32.mrf.mxu0 }
 0x2d0   :  { %v5629_v43 = vpop.f32.mrf.mxu1 }
 0x2d1   :  { %v9127_v1 = vadd.f32 %v5629_v43, %v5581_v41  ;;  %v5711_v41 = vadd.f32 %v5710_v36, %v5662_v37  ;;  %v5850_v36 = vld [vmem:[%s9265_s0 + $0x10] sm:$0xff] }
 0x2d3   :  { %v5760_v43 = vadd.f32 %v5759_v50, %v5711_v41  ;;  %v5718_v50 = vadd.f32 %v5717_v47, %v5669_v58 }
 0x2d5   :  { %v5761_v35 = vpop.f32.mrf.mxu0 }
 0x2d8   :  { %v5632_v57 = vpop.f32.mrf.mxu1 }
 0x2d9   :  { %v9130_v14 = vadd.f32 %v5632_v57, %v5584_v46  ;;  %v5664_v46 = vadd.f32 %v5663_v19, %v9103_v24  ;;  %v5671_v57 = vpop.f32.mrf.mxu2 }
 0x2db   :  { %5827 = vmatmul.bf16.gmra.mxu1 %v6678_v23  ;;  %v5720_v23 = vpop.f32.mrf.mxu3  ;;  %v5713_v2 = vadd.f32 %v5712_v48, %v5664_v46 }
 0x2dd   :  { %v5764_v52 = vpop.f32.mrf.mxu0  ;;  %v5762_v60 = vadd.f32 %v5761_v35, %v5713_v2  ;;  %v5672_v35 = vadd.f32 %v5671_v57, %v9115_v63 }
 0x2e0   :  { %v5634_v45 = vpop.f32.mrf.mxu1 }
 0x2e1   :  { %v9133_v16 = vadd.f32 %v5634_v45, %v5586_v26  ;;  %v5673_v27 = vpop.f32.mrf.mxu2 }
 0x2e3   :  { %v5722_v38 = vpop.f32.mrf.mxu3 }
 0x2e5   :  { %v5766_v20 = vpop.f32.mrf.mxu0 }
 0x2e6   :  { %v5767_v48 = vadd.f32 %v5766_v20, %v5718_v50 }
 0x2e8   :  { %v5637_v32 = vpop.f32.mrf.mxu1 }
 0x2e9   :  { %v9136_v18 = vadd.f32 %v5637_v32, %v5589_v9  ;;  %v5667_v9 = vadd.f32 %v5666_v10, %v9107_v56  ;;  %v5676_v25 = vpop.f32.mrf.mxu2  ;;  %v5721_v10 = vadd.f32 %v5720_v23, %v5672_v35 }
 0x2eb   :  { %5832 = vmatmul.bf16.gmra.mxu1 %v6714_v62  ;;  %v5716_v32 = vadd.f32 %v5715_v0, %v5667_v9  ;;  %v5725_v19 = vpop.f32.mrf.mxu3 }
 0x2ed   :  { %v5769_v45 = vpop.f32.mrf.mxu0 }
 0x2f0   :  { %v5639_v3 = vpop.f32.mrf.mxu1 }
 0x2f1   :  { %v9139_v30 = vadd.f32 %v5639_v3, %v5591_v5  ;;  %v5765_v3 = vadd.f32 %v5764_v52, %v5716_v32 }
 0x2f5   :  { %v5771_v56 = vpop.f32.mrf.mxu0 }
 0x2f8   :  { %v5642_v42 = vpop.f32.mrf.mxu1 }
 0x2f9   :  { %v9142_v31 = vadd.f32 %v5642_v42, %v5594_v6 }
 0x2fb   :  { %5837 = vmatmul.bf16.gmra.mxu1 %v6750_v21 }
 0x2fd   :  { %v5774_v29 = vpop.f32.mrf.mxu0 }
 0x300   :  { %v5644_v8 = vpop.f32.mrf.mxu1 }
 0x301   :  { %v9145_v17 = vadd.f32 %v5644_v8, %v5596_v51  ;;  %v5851_v8 = vld [vmem:[%s9265_s0 + $0x18] sm:$0xff] }
 0x305   :  { %v5776_v41 = vpop.f32.mrf.mxu0 }
 0x308   :  { %v5647_v44 = vpop.f32.mrf.mxu1 }
 0x309   :  { %v9148_v55 = vadd.f32 %v5647_v44, %v5599_v4  ;;  %v5678_v4 = vpop.f32.mrf.mxu2  ;;  %v5770_v44 = vadd.f32 %v5769_v45, %v5721_v10  ;;  %v5854_v45 = vld [vmem:[%s9265_s0 + $0x30] sm:$0xff] }
 0x30b   :  { %5842 = vmatmul.bf16.gmra.mxu1 %v6786_v61  ;;  %v5727_v61 = vpop.f32.mrf.mxu3 }
 0x310   :  { %v5649_v22 = vpop.f32.mrf.mxu1 }
 0x311   :  { %v9152_v39 = vadd.f32 %v5649_v22, %v5601_v54  ;;  %v5674_v54 = vadd.f32 %v5673_v27, %v9119_v7  ;;  %v5681_v46 = vpop.f32.mrf.mxu2 }
 0x313   :  { %v5723_v47 = vadd.f32 %v5722_v38, %v5674_v54  ;;  %v5730_v7 = vpop.f32.mrf.mxu3 }
 0x315   :  { %v5772_v20 = vadd.f32 %v5771_v56, %v5723_v47  ;;  %v5858_v47 = vld [vmem:[%s9265_s0 + $0x50] sm:$0xff] }
 0x318   :  { %v5808_v53 = vpop.f32.mrf.mxu1 }
 0x319   :  { %v5809_v28 = vadd.f32 %v5808_v53, %v5760_v43  ;;  %v5853_v53 = vld [vmem:[%s9265_s0 + $0x28] sm:$0xff]  ;;  %v5683_v9 = vpop.f32.mrf.mxu2 }
 0x31b   :  { %v5864_v33 = vadd.f32 %v5848_v11, %v5809_v28  ;;  %v5677_v11 = vadd.f32 %v5676_v25, %v9123_v40  ;;  %v5732_v32 = vpop.f32.mrf.mxu3 }
 0x31d   :  { %v5880_v26 = vmax.f32 %v5864_v33, 0.0  ;;  %v5726_v28 = vadd.f32 %v5725_v19, %v5677_v11  ;;  %v5684_v19 = vadd.f32 %v5683_v9, %v9133_v16 }
 0x31f   :  { %5896 = vst [vmem:[%s9271_s6] sm:$0xff] %v5880_v26  ;;  %v5775_v33 = vadd.f32 %v5774_v29, %v5726_v28  ;;  %v5779_v26 = vpop.f32.mrf.mxu0 }
 0x320   :  { %v5810_v15 = vpop.f32.mrf.mxu1 }
 0x321   :  { %v5811_v24 = vadd.f32 %v5810_v15, %v5762_v60  ;;  %v5679_v15 = vadd.f32 %v5678_v4, %v9127_v1 }
 0x323   :  { %v5865_v62 = vadd.f32 %v5849_v13, %v5811_v24  ;;  %v5728_v13 = vadd.f32 %v5727_v61, %v5679_v15  ;;  %v5735_v50 = vpop.f32.mrf.mxu3 }
 0x325   :  { %v5881_v5 = vmax.f32 %v5865_v62, 0.0  ;;  %v5777_v62 = vadd.f32 %v5776_v41, %v5728_v13 }
 0x327   :  { %5897 = vst [vmem:[%s9271_s6 + $0x8] sm:$0xff] %v5881_v5  ;;  %v5855_v5 = vld [vmem:[%s9265_s0 + $0x38] sm:$0xff]  ;;  %v5781_v1 = vpop.f32.mrf.mxu0 }
 0x328   :  { %v5813_v12 = vpop.f32.mrf.mxu1 }
 0x329   :  { %v5814_v6 = vadd.f32 %v5813_v12, %v5765_v3  ;;  %v5682_v3 = vadd.f32 %v5681_v46, %v9130_v14 }
 0x32b   :  { %v5866_v42 = vadd.f32 %v5850_v36, %v5814_v6  ;;  %v5731_v36 = vadd.f32 %v5730_v7, %v5682_v3  ;;  %v5686_v6 = vpop.f32.mrf.mxu2  ;;  %v5859_v7 = vld [vmem:[%s9265_s0 + $0x58] sm:$0xff] }
 0x32c   :  { %v5687_v4 = vadd.f32 %v5686_v6, %v9136_v18 }
 0x32d   :  { %v5882_v21 = vmax.f32 %v5866_v42, 0.0  ;;  %v5780_v42 = vadd.f32 %v5779_v26, %v5731_v36 }
 0x32f   :  { %5898 = vst [vmem:[%s9271_s6 + $0x10] sm:$0xff] %v5882_v21  ;;  %v5856_v21 = vld [vmem:[%s9265_s0 + $0x40] sm:$0xff] }
 0x330   :  { %v5815_v51 = vpop.f32.mrf.mxu1 }
 0x331   :  { %v5816_v34 = vadd.f32 %v5815_v51, %v5767_v48  ;;  %v5733_v48 = vadd.f32 %v5732_v32, %v5684_v19  ;;  %v5862_v19 = vld [vmem:[%s9265_s0 + $0x70] sm:$0xff] }
 0x333   :  { %v5867_v0 = vadd.f32 %v5851_v8, %v5816_v34  ;;  %v5784_v8 = vpop.f32.mrf.mxu0  ;;  %v5688_v34 = vpop.f32.mrf.mxu2  ;;  %v5782_v10 = vadd.f32 %v5781_v1, %v5733_v48 }
 0x335   :  { %v5883_v59 = vmax.f32 %v5867_v0, 0.0  ;;  %v5737_v0 = vpop.f32.mrf.mxu3 }
 0x337   :  { %5899 = vst [vmem:[%s9271_s6 + $0x18] sm:$0xff] %v5883_v59  ;;  %v5857_v59 = vld [vmem:[%s9265_s0 + $0x48] sm:$0xff] }
 0x338   :  { %v5818_v52 = vpop.f32.mrf.mxu1 }
 0x339   :  { %v5819_v63 = vadd.f32 %v5818_v52, %v5770_v44  ;;  %v5736_v44 = vadd.f32 %v5735_v50, %v5687_v4 }
 0x33b   :  { %v5868_v22 = vadd.f32 %v5852_v49, %v5819_v63  ;;  %v5786_v49 = vpop.f32.mrf.mxu0  ;;  %v5785_v54 = vadd.f32 %v5784_v8, %v5736_v44 }
 0x33d   :  { %v5884_v37 = vmax.f32 %v5868_v22, 0.0  ;;  %v5691_v22 = vpop.f32.mrf.mxu2  ;;  %v5740_v18 = vpop.f32.mrf.mxu3 }
 0x33e   :  { %v5692_v28 = vadd.f32 %v5691_v22, %v9142_v31 }
 0x33f   :  { %5900 = vst [vmem:[%s9271_s6 + $0x20] sm:$0xff] %v5884_v37  ;;  %v5689_v37 = vadd.f32 %v5688_v34, %v9139_v30 }
 0x340   :  { %v5820_v43 = vpop.f32.mrf.mxu1 }
 0x341   :  { %v5821_v57 = vadd.f32 %v5820_v43, %v5772_v20  ;;  %v5738_v20 = vadd.f32 %v5737_v0, %v5689_v37  ;;  %v5863_v0 = vld [vmem:[%s9265_s0 + $0x78] sm:$0xff] }
 0x343   :  { %v5869_v23 = vadd.f32 %v5853_v53, %v5821_v57  ;;  %v5787_v11 = vadd.f32 %v5786_v49, %v5738_v20  ;;  %v5789_v46 = vpop.f32.mrf.mxu0 }
 0x345   :  { %v5885_v2 = vmax.f32 %v5869_v23, 0.0  ;;  %v5693_v30 = vpop.f32.mrf.mxu2  ;;  %v5742_v26 = vpop.f32.mrf.mxu3 }
 0x346   :  { %v5694_v13 = vadd.f32 %v5693_v30, %v9145_v17 }
 0x347   :  { %5901 = vst [vmem:[%s9271_s6 + $0x28] sm:$0xff] %v5885_v2  ;;  %v5741_v2 = vadd.f32 %v5740_v18, %v5692_v28 }
 0x348   :  { %v5823_v60 = vpop.f32.mrf.mxu1 }
 0x349   :  { %v5824_v40 = vadd.f32 %v5823_v60, %v5775_v33 }
 0x34b   :  { %v5870_v24 = vadd.f32 %v5854_v45, %v5824_v40  ;;  %v5790_v45 = vadd.f32 %v5789_v46, %v5741_v2  ;;  %v5860_v40 = vld [vmem:[%s9265_s0 + $0x60] sm:$0xff]  ;;  %v5791_v31 = vpop.f32.mrf.mxu0 }
 0x34d   :  { %v5886_v27 = vmax.f32 %v5870_v24, 0.0  ;;  %v5743_v24 = vadd.f32 %v5742_v26, %v5694_v13 }
 0x34f   :  { %5902 = vst [vmem:[%s9271_s6 + $0x30] sm:$0xff] %v5886_v27  ;;  %v5696_v27 = vpop.f32.mrf.mxu2 }
 0x350   :  { %v5825_v38 = vpop.f32.mrf.mxu1  ;;  %v5697_v1 = vadd.f32 %v5696_v27, %v9148_v55 }
 0x351   :  { %v5826_v12 = vadd.f32 %v5825_v38, %v5777_v62  ;;  %v5745_v38 = vpop.f32.mrf.mxu3 }
 0x352   :  { %v5746_v36 = vadd.f32 %v5745_v38, %v5697_v1 }
 0x353   :  { %v5871_v58 = vadd.f32 %v5855_v5, %v5826_v12  ;;  %v5792_v5 = vadd.f32 %v5791_v31, %v5743_v24  ;;  %v5861_v12 = vld [vmem:[%s9265_s0 + $0x68] sm:$0xff]  ;;  %v5794_v6 = vpop.f32.mrf.mxu0 }
 0x355   :  { %v5887_v56 = vmax.f32 %v5871_v58, 0.0 }
 0x357   :  { %5903 = vst [vmem:[%s9271_s6 + $0x38] sm:$0xff] %v5887_v56  ;;  %v5698_v50 = vpop.f32.mrf.mxu2 }
 0x358   :  { %v5828_v25 = vpop.f32.mrf.mxu1 }
 0x359   :  { %v5829_v14 = vadd.f32 %v5828_v25, %v5780_v42  ;;  %v5795_v42 = vadd.f32 %v5794_v6, %v5746_v36  ;;  %v5747_v25 = vpop.f32.mrf.mxu3 }
 0x35b   :  { %v5872_v51 = vadd.f32 %v5856_v21, %v5829_v14  ;;  %v5699_v14 = vadd.f32 %v5698_v50, %v9152_v39 }
 0x35d   :  { %v5888_v35 = vmax.f32 %v5872_v51, 0.0  ;;  %v5748_v48 = vadd.f32 %v5747_v25, %v5699_v14 }
 0x35f   :  { %5904 = vst [vmem:[%s9271_s6 + $0x40] sm:$0xff] %v5888_v35  ;;  %v5796_v35 = vpop.f32.mrf.mxu0 }
 0x360   :  { %v5830_v29 = vpop.f32.mrf.mxu1  ;;  %v5797_v34 = vadd.f32 %v5796_v35, %v5748_v48 }
 0x361   :  { %v5831_v16 = vadd.f32 %v5830_v29, %v5782_v10 }
 0x363   :  { %v5873_v61 = vadd.f32 %v5857_v59, %v5831_v16 }
 0x365   :  { %v5889_v52 = vmax.f32 %v5873_v61, 0.0 }
 0x367   :  { %5905 = vst [vmem:[%s9271_s6 + $0x48] sm:$0xff] %v5889_v52 }
 0x368   :  { %v5833_v63 = vpop.f32.mrf.mxu1 }
 0x369   :  { %v5834_v41 = vadd.f32 %v5833_v63, %v5785_v54 }
 0x36b   :  { %v5874_v43 = vadd.f32 %v5858_v47, %v5834_v41 }
 0x36d   :  { %v5890_v53 = vmax.f32 %v5874_v43, 0.0 }
 0x36f   :  { %5906 = vst [vmem:[%s9271_s6 + $0x50] sm:$0xff] %v5890_v53 }
 0x370   :  { %v5835_v57 = vpop.f32.mrf.mxu1 }
 0x371   :  { %v5836_v23 = vadd.f32 %v5835_v57, %v5787_v11 }
 0x373   :  { %v5875_v33 = vadd.f32 %v5859_v7, %v5836_v23 }
 0x375   :  { %v5891_v60 = vmax.f32 %v5875_v33, 0.0 }
 0x377   :  { %5907 = vst [vmem:[%s9271_s6 + $0x58] sm:$0xff] %v5891_v60 }
 0x378   :  { %v5838_v15 = vpop.f32.mrf.mxu1 }
 0x379   :  { %v5839_v9 = vadd.f32 %v5838_v15, %v5790_v45 }
 0x37b   :  { %v5876_v32 = vadd.f32 %v5860_v40, %v5839_v9 }
 0x37d   :  { %v5892_v62 = vmax.f32 %v5876_v32, 0.0 }
 0x37f   :  { %5908 = vst [vmem:[%s9271_s6 + $0x60] sm:$0xff] %v5892_v62 }
 0x380   :  { %v5840_v3 = vpop.f32.mrf.mxu1 }
 0x381   :  { %v5841_v17 = vadd.f32 %v5840_v3, %v5792_v5 }
 0x383   :  { %v5877_v58 = vadd.f32 %v5861_v12, %v5841_v17 }
 0x385   :  { %v5893_v56 = vmax.f32 %v5877_v58, 0.0 }
 0x387   :  { %5909 = vst [vmem:[%s9271_s6 + $0x68] sm:$0xff] %v5893_v56 }
 0x388   :  { %v5843_v21 = vpop.f32.mrf.mxu1 }
 0x389   :  { %v5844_v55 = vadd.f32 %v5843_v21, %v5795_v42 }
 0x38b   :  { %v5878_v51 = vadd.f32 %v5862_v19, %v5844_v55 }
 0x38d   :  { %v5894_v8 = vmax.f32 %v5878_v51, 0.0 }
 0x38f   :  { %5910 = vst [vmem:[%s9271_s6 + $0x70] sm:$0xff] %v5894_v8 }
 0x390   :  { %v5845_v10 = vpop.f32.mrf.mxu1 }
 0x391   :  { %v5846_v29 = vadd.f32 %v5845_v10, %v5797_v34 }
 0x393   :  { %v5879_v59 = vadd.f32 %v5863_v0, %v5846_v29 }
 0x395   :  { %v5895_v4 = vmax.f32 %v5879_v59, 0.0 }
 0x397   :  { %5911 = vst [vmem:[%s9271_s6 + $0x78] sm:$0xff] %v5895_v4 }
 0x398   :  { %5916 = vsyncpa [#allocation5], 1 }

</bundles_post_ra>
